<compile_context>
chip_gen: v6e
topology: v6e:2x2x1
jax: 0.10.0
libtpu: 0.0.40
codegen_flags: <defaults>
</compile_context>

<pallas_src>
import math
from functools import partial

import numpy as onp
import jax
import jax.numpy as jnp
from jax.experimental import pallas as pl
from jax.experimental.pallas import tpu as pltpu


def fsq_kernel(x_ref, w_in_ref, b_in_ref, w_out_ref, b_out_ref, p_ref,
               out_ref, idx_ref, *, idx_base, n_sub):
    """One grid step over `tn` tokens.

    x_ref     : (tn, F)   activations
    w_in_ref  : (F, C)    input projection (pre-transposed for x @ W)
    b_in_ref  : (1, C)    input bias with bound()'s shift folded in
    w_out_ref : (C, F)    output projection pre-scaled by 1/half (takes q)
    b_out_ref : (1, F)
    p_ref     : (16, C)   packed constants: rows 0..7 = basis (replicated),
                          row 8 = half_bound, row 9 = offset
    out_ref   : (tn, F)
    idx_ref   : (tn//128, 128)  lane-dense indexes, token t -> [t//128, t%128]
    """
    x = x_ref[...]

    # Input projection (MXU).  bound()'s shift is already folded into b_in.
    z = jnp.dot(x, w_in_ref[...], preferred_element_type=jnp.float32) + b_in_ref[...]

    # bound(): tanh(z + shift) * half_bound - offset
    half_b = p_ref[8:9, :]
    offset = p_ref[9:10, :]
    zb = jnp.tanh(z) * half_b - offset

    # quantize(): straight-through estimator == round() in the forward pass.
    # q = codes * half; the division by half is folded into w_out host-side,
    # so `codes` is never materialized.
    q = jnp.round(zb)

    # Output projection (MXU) on the un-normalized codes.
    out = jnp.dot(q, w_out_ref[...], preferred_element_type=jnp.float32) + b_out_ref[...]
    out_ref[...] = out.astype(out_ref.dtype)
    # TODO(synk): with F < 128 this store is still lane-masked; a 128-lane
    # token-packed layout (4 tokens/row for F=32) would make it fully dense.

    # indexes(): idx = q . basis + sum(half * basis).
    # Transposed-RHS matmul (flash-attention NT pattern) puts tokens on lanes,
    # so the int32 store is lane-dense with no sublane->lane relayout.
    basis8 = p_ref[0:8, :]                                           # (8, C)
    idx8 = jax.lax.dot_general(basis8, q, (((1,), (1,)), ((), ())),
                               preferred_element_type=jnp.float32)   # (8, tn)
    # idx >= 0 and exact in f32 (pages < 2^24); +0.5 + truncate == round.
    idx_i = (idx8 + (idx_base + 0.5)).astype(jnp.int32)
    for s in range(n_sub):                                           # static unroll
        idx_ref[s:s + 1, :] = idx_i[0:1, s * 128:(s + 1) * 128]
    # TODO(synk): torch returns int64 idxes; int32 here (x64 off by default),
    # and the f32 accumulation is exact only while prod(levels) < 2^24.


def fsq_forward(z, kparams, *, tn=1024):
    """z: (B, T, F) float32 -> (out (B, T, F) f32, 0, idxes (B, T) int32)."""
    w_in, b_in_eff, w_out_eff, b_out, p, idx_base = kparams
    B, T, F = z.shape
    C = w_in.shape[1]
    assert tn % 1024 == 0, "tn must be a multiple of 1024 (lane-dense idx tiles)"

    N = B * T
    n_blocks = max(1, -(-N // tn))
    N_pad = n_blocks * tn
    x = z.reshape(N, F)
    if N_pad != N:
        x = jnp.pad(x, ((0, N_pad - N), (0, 0)))
    n_sub = tn // 128

    # VMEM budget: double-buffered lane-padded x/out tiles + resident weights,
    # with headroom; capped at 48 MiB so it stays valid on v7x's 64 MiB VMEM.
    lane = 128
    f_pad = -(-F // lane) * lane
    est = 2 * 2 * tn * f_pad * 4 + 2 * n_sub * lane * 4 + (2 << 20)
    vmem_limit = int(min(max(est, 32 << 20), 48 << 20))

    kernel = partial(fsq_kernel, idx_base=float(idx_base), n_sub=n_sub)
    const = lambda i: (0, 0)

    out, idx = pl.pallas_call(
        kernel,
        out_shape=(
            jax.ShapeDtypeStruct((N_pad, F), jnp.float32),
            jax.ShapeDtypeStruct((N_pad // 128, 128), jnp.int32),
        ),
        grid_spec=pltpu.PrefetchScalarGridSpec(
            num_scalar_prefetch=0,
            grid=(n_blocks,),
            in_specs=[
                pl.BlockSpec((tn, F), lambda i: (i, 0)),   # x tile
                pl.BlockSpec((F, C), const),               # W_in (F, C)
                pl.BlockSpec((1, C), const),               # b_in + shift
                pl.BlockSpec((C, F), const),               # W_out / half
                pl.BlockSpec((1, F), const),               # b_out
                pl.BlockSpec((16, C), const),              # packed constants
            ],
            out_specs=[
                pl.BlockSpec((tn, F), lambda i: (i, 0)),
                pl.BlockSpec((n_sub, 128), lambda i: (i, 0)),
            ],
        ),
        compiler_params=pltpu.CompilerParams(
            dimension_semantics=("parallel",),
            vmem_limit_bytes=vmem_limit,
        ),
    )(x, w_in, b_in_eff, w_out_eff, b_out, p)

    out = out[:N].reshape(B, T, F)
    idx = idx.reshape(-1)[:N].reshape(B, T)
    return out, 0, idx


def make_raw_params(features, levels, eps=1e-3, seed=0):
    """Deterministic synthetic parameters mirroring FSQuantiser.__init__."""
    C = len(levels)
    lv_i = onp.asarray(levels, dtype=onp.int64)
    lv_f = lv_i.astype(onp.float32)
    basis = onp.concatenate(([1.0], onp.cumprod(lv_f[:-1]))).astype(onp.float32)
    half_b = ((lv_f - 1.0) * (1.0 + eps) / 2.0).astype(onp.float32)
    offset = onp.where(lv_i % 2 == 1, 0.0, 0.5).astype(onp.float32)
    shift = onp.arctanh(offset / half_b).astype(onp.float32)
    half_i = (lv_i // 2).astype(onp.float32)

    key = jax.random.PRNGKey(seed)
    k1, k2, k3, k4 = jax.random.split(key, 4)
    # torch.nn.Linear default init: U(-1/sqrt(fan_in), 1/sqrt(fan_in))
    bi = 1.0 / math.sqrt(features)
    bo = 1.0 / math.sqrt(C)
    w_in = jax.random.uniform(k1, (features, C), jnp.float32, -bi, bi)   # (F, C)
    b_in = jax.random.uniform(k2, (C,), jnp.float32, -bi, bi)
    w_out = jax.random.uniform(k3, (C, features), jnp.float32, -bo, bo)  # (C, F)
    b_out = jax.random.uniform(k4, (features,), jnp.float32, -bo, bo)
    return dict(w_in=w_in, b_in=b_in, w_out=w_out, b_out=b_out,
                half_b=jnp.asarray(half_b), offset=jnp.asarray(offset),
                shift=jnp.asarray(shift), half_i=jnp.asarray(half_i),
                basis=jnp.asarray(basis))


def fuse_params(raw):
    """Fold shift into b_in, 1/half into W_out, pack per-code constants."""
    C = raw['w_in'].shape[1]
    b_in_eff = (raw['b_in'] + raw['shift']).reshape(1, C)
    w_out_eff = raw['w_out'] / raw['half_i'][:, None]
    b_out = raw['b_out'].reshape(1, -1)
    p = jnp.zeros((16, C), jnp.float32)
    p = p.at[0:8, :].set(jnp.broadcast_to(raw['basis'], (8, C)))
    p = p.at[8, :].set(raw['half_b'])
    p = p.at[9, :].set(raw['offset'])
    idx_base = float(jnp.sum(raw['half_i'] * raw['basis']))
    return (raw['w_in'], b_in_eff, w_out_eff, b_out, p, idx_base)


def fsq_reference(z, raw):
    """Pure-JAX reference of the torch forward (unfused parameters)."""
    z1 = z @ raw['w_in'] + raw['b_in']
    zb = jnp.tanh(z1 + raw['shift']) * raw['half_b'] - raw['offset']
    q = jnp.round(zb)
    codes = q / raw['half_i']
    idx = jnp.sum((codes * raw['half_i'] + raw['half_i']) * raw['basis'],
                  axis=-1).astype(jnp.int32)
    out = codes @ raw['w_out'] + raw['b_out']
    return out, 0, idx, zb


def check(z, raw, out, idx, atol=2e-4, rtol=2e-4):
    ref_out, _, ref_idx, ref_zb = fsq_reference(z, raw)
    out = onp.asarray(out); idx = onp.asarray(idx)
    ref_out = onp.asarray(ref_out); ref_idx = onp.asarray(ref_idx)
    ref_zb = onp.asarray(ref_zb)
    assert out.shape == ref_out.shape and idx.shape == ref_idx.shape
    assert idx.dtype == onp.int32
    # Tokens whose bounded pre-round value sits within 1e-3 of a rounding
    # boundary may legitimately round differently (MXU vs XLA accumulation
    # order); exclude them from the exact comparison.
    near = onp.any(0.5 - onp.abs(ref_zb - onp.round(ref_zb)) < 1e-3, axis=-1)
    ok = ~near
    assert ok.mean() > 0.8
    assert onp.array_equal(idx[ok], ref_idx[ok])
    assert onp.allclose(out[ok], ref_out[ok], atol=atol, rtol=rtol)


if __name__ == "__main__":
    features = 32
    levels = [8, 5, 5, 5]          # codes = 4, pages = 1000

    raw = make_raw_params(features, levels, seed=0)
    kparams = fuse_params(raw)

    key = jax.random.PRNGKey(0)

    # Tiny canonical shape (single grid step, exercises the padding path).
    z_small = jax.random.normal(jax.random.fold_in(key, 1), (2, 8, features),
                                jnp.float32)
    out_s, aux_s, idx_s = fsq_forward(z_small, kparams)
    jax.block_until_ready((out_s, idx_s))
    assert aux_s == 0
    check(z_small, raw, out_s, idx_s)

    # Larger shape: multi-step grid (feeds both v7x TCs) + ragged tail padding.
    z_big = jax.random.normal(jax.random.fold_in(key, 2), (4, 1000, features),
                              jnp.float32)
    out_b, aux_b, idx_b = fsq_forward(z_big, kparams)
    jax.block_until_ready((out_b, idx_b))
    assert aux_b == 0
    check(z_big, raw, out_b, idx_b)

    print("KERNEL_OK")
</pallas_src>

<mosaic_0001>
module attributes {stable_mosaic.version = 11 : i64} {
  func.func @fsq_kernel(%arg0: i32, %arg1: memref<1024x32xf32, #tpu.memory_space<vmem>>, %arg2: memref<32x4xf32, #tpu.memory_space<vmem>>, %arg3: memref<1x4xf32, #tpu.memory_space<vmem>>, %arg4: memref<4x32xf32, #tpu.memory_space<vmem>>, %arg5: memref<1x32xf32, #tpu.memory_space<vmem>>, %arg6: memref<16x4xf32, #tpu.memory_space<vmem>>, %arg7: memref<1024x32xf32, #tpu.memory_space<vmem>>, %arg8: memref<8x128xi32, #tpu.memory_space<vmem>>) attributes {dimension_semantics = [#tpu.dimension_semantics<parallel>], iteration_bounds = array<i64: 1>, scalar_prefetch = 0 : i64, scratch_operands = 0 : i64, tpu.core_type = #tpu.core_type<tc>, window_params = [{transform_indices = @transform_0, window_bounds = array<i64: 1024, 32>}, {pipeline_mode = #tpu.pipeline_mode<synchronous>, transform_indices = @transform_1, window_bounds = array<i64: 32, 4>}, {pipeline_mode = #tpu.pipeline_mode<synchronous>, transform_indices = @transform_2, window_bounds = array<i64: 1, 4>}, {pipeline_mode = #tpu.pipeline_mode<synchronous>, transform_indices = @transform_3, window_bounds = array<i64: 4, 32>}, {pipeline_mode = #tpu.pipeline_mode<synchronous>, transform_indices = @transform_4, window_bounds = array<i64: 1, 32>}, {pipeline_mode = #tpu.pipeline_mode<synchronous>, transform_indices = @transform_5, window_bounds = array<i64: 16, 4>}, {transform_indices = @transform_6, window_bounds = array<i64: 1024, 32>}, {transform_indices = @transform_7, window_bounds = array<i64: 8, 128>}]} {
    %c0 = arith.constant 0 : index
    %c0_0 = arith.constant 0 : index
    %0 = vector.load %arg1[%c0, %c0_0] : memref<1024x32xf32, #tpu.memory_space<vmem>>, vector<1024x32xf32>
    %c0_1 = arith.constant 0 : index
    %c0_2 = arith.constant 0 : index
    %1 = vector.load %arg2[%c0_1, %c0_2] : memref<32x4xf32, #tpu.memory_space<vmem>>, vector<32x4xf32>
    %cst = arith.constant dense<0.000000e+00> : vector<1024x4xf32>
    %2 = tpu.matmul %0, %1, %cst {dimension_numbers = #tpu.dot_dimension_numbers<[1], [0], [0], [1], [0, 0, 1, 1], [], []>} : vector<1024x32xf32>, vector<32x4xf32>, vector<1024x4xf32> -> vector<1024x4xf32>
    %c0_3 = arith.constant 0 : index
    %c0_4 = arith.constant 0 : index
    %3 = vector.load %arg3[%c0_3, %c0_4] : memref<1x4xf32, #tpu.memory_space<vmem>>, vector<1x4xf32>
    %4 = vector.broadcast %3 : vector<1x4xf32> to vector<1024x4xf32>
    %5 = arith.addf %2, %4 : vector<1024x4xf32>
    %c8 = arith.constant 8 : index
    %c0_5 = arith.constant 0 : index
    %6 = vector.load %arg6[%c8, %c0_5] : memref<16x4xf32, #tpu.memory_space<vmem>>, vector<1x4xf32>
    %c9 = arith.constant 9 : index
    %c0_6 = arith.constant 0 : index
    %7 = vector.load %arg6[%c9, %c0_6] : memref<16x4xf32, #tpu.memory_space<vmem>>, vector<1x4xf32>
    %8 = math.tanh %5 : vector<1024x4xf32>
    %9 = vector.broadcast %6 : vector<1x4xf32> to vector<1024x4xf32>
    %10 = arith.mulf %8, %9 : vector<1024x4xf32>
    %11 = vector.broadcast %7 : vector<1x4xf32> to vector<1024x4xf32>
    %12 = arith.subf %10, %11 : vector<1024x4xf32>
    %13 = math.roundeven %12 : vector<1024x4xf32>
    %c0_7 = arith.constant 0 : index
    %c0_8 = arith.constant 0 : index
    %14 = vector.load %arg4[%c0_7, %c0_8] : memref<4x32xf32, #tpu.memory_space<vmem>>, vector<4x32xf32>
    %cst_9 = arith.constant dense<0.000000e+00> : vector<1024x32xf32>
    %15 = tpu.matmul %13, %14, %cst_9 {dimension_numbers = #tpu.dot_dimension_numbers<[1], [0], [0], [1], [0, 0, 1, 1], [], []>} : vector<1024x4xf32>, vector<4x32xf32>, vector<1024x32xf32> -> vector<1024x32xf32>
    %c0_10 = arith.constant 0 : index
    %c0_11 = arith.constant 0 : index
    %16 = vector.load %arg5[%c0_10, %c0_11] : memref<1x32xf32, #tpu.memory_space<vmem>>, vector<1x32xf32>
    %17 = vector.broadcast %16 : vector<1x32xf32> to vector<1024x32xf32>
    %18 = arith.addf %15, %17 : vector<1024x32xf32>
    %c0_12 = arith.constant 0 : index
    %c0_13 = arith.constant 0 : index
    %19 = vector.load %arg7[%c0_12, %c0_13] : memref<1024x32xf32, #tpu.memory_space<vmem>>, vector<1024x32xf32>
    tpu.vector_store %arg7[%c0_12, %c0_13], %18 {strides = array<i32>} : memref<1024x32xf32, #tpu.memory_space<vmem>>, vector<1024x32xf32>,
    %c0_14 = arith.constant 0 : index
    %c0_15 = arith.constant 0 : index
    %20 = vector.load %arg6[%c0_14, %c0_15] : memref<16x4xf32, #tpu.memory_space<vmem>>, vector<8x4xf32>
    %cst_16 = arith.constant dense<0.000000e+00> : vector<8x1024xf32>
    %21 = tpu.matmul %20, %13, %cst_16 {dimension_numbers = #tpu.dot_dimension_numbers<[1], [1], [0], [0], [0, 0, 1, 0], [], []>} : vector<8x4xf32>, vector<1024x4xf32>, vector<8x1024xf32> -> vector<8x1024xf32>
    %cst_17 = arith.constant 5.005000e+02 : f32
    %22 = vector.broadcast %cst_17 : f32 to vector<8x1024xf32>
    %23 = arith.addf %21, %22 : vector<8x1024xf32>
    %24 = arith.fptosi %23 : vector<8x1024xf32> to vector<8x1024xi32>
    %25 = vector.extract_strided_slice %24 {offsets = [0, 0], sizes = [1, 128], strides = [1, 1]} : vector<8x1024xi32> to vector<1x128xi32>
    %c0_18 = arith.constant 0 : index
    %c0_19 = arith.constant 0 : index
    %26 = vector.load %arg8[%c0_18, %c0_19] : memref<8x128xi32, #tpu.memory_space<vmem>>, vector<1x128xi32>
    tpu.vector_store %arg8[%c0_18, %c0_19], %25 {strides = array<i32>} : memref<8x128xi32, #tpu.memory_space<vmem>>, vector<1x128xi32>,
    %27 = vector.extract_strided_slice %24 {offsets = [0, 128], sizes = [1, 128], strides = [1, 1]} : vector<8x1024xi32> to vector<1x128xi32>
    %c1 = arith.constant 1 : index
    %c0_20 = arith.constant 0 : index
    %28 = vector.load %arg8[%c1, %c0_20] : memref<8x128xi32, #tpu.memory_space<vmem>>, vector<1x128xi32>
    tpu.vector_store %arg8[%c1, %c0_20], %27 {strides = array<i32>} : memref<8x128xi32, #tpu.memory_space<vmem>>, vector<1x128xi32>,
    %29 = vector.extract_strided_slice %24 {offsets = [0, 256], sizes = [1, 128], strides = [1, 1]} : vector<8x1024xi32> to vector<1x128xi32>
    %c2 = arith.constant 2 : index
    %c0_21 = arith.constant 0 : index
    %30 = vector.load %arg8[%c2, %c0_21] : memref<8x128xi32, #tpu.memory_space<vmem>>, vector<1x128xi32>
    tpu.vector_store %arg8[%c2, %c0_21], %29 {strides = array<i32>} : memref<8x128xi32, #tpu.memory_space<vmem>>, vector<1x128xi32>,
    %31 = vector.extract_strided_slice %24 {offsets = [0, 384], sizes = [1, 128], strides = [1, 1]} : vector<8x1024xi32> to vector<1x128xi32>
    %c3 = arith.constant 3 : index
    %c0_22 = arith.constant 0 : index
    %32 = vector.load %arg8[%c3, %c0_22] : memref<8x128xi32, #tpu.memory_space<vmem>>, vector<1x128xi32>
    tpu.vector_store %arg8[%c3, %c0_22], %31 {strides = array<i32>} : memref<8x128xi32, #tpu.memory_space<vmem>>, vector<1x128xi32>,
    %33 = vector.extract_strided_slice %24 {offsets = [0, 512], sizes = [1, 128], strides = [1, 1]} : vector<8x1024xi32> to vector<1x128xi32>
    %c4 = arith.constant 4 : index
    %c0_23 = arith.constant 0 : index
    %34 = vector.load %arg8[%c4, %c0_23] : memref<8x128xi32, #tpu.memory_space<vmem>>, vector<1x128xi32>
    tpu.vector_store %arg8[%c4, %c0_23], %33 {strides = array<i32>} : memref<8x128xi32, #tpu.memory_space<vmem>>, vector<1x128xi32>,
    %35 = vector.extract_strided_slice %24 {offsets = [0, 640], sizes = [1, 128], strides = [1, 1]} : vector<8x1024xi32> to vector<1x128xi32>
    %c5 = arith.constant 5 : index
    %c0_24 = arith.constant 0 : index
    %36 = vector.load %arg8[%c5, %c0_24] : memref<8x128xi32, #tpu.memory_space<vmem>>, vector<1x128xi32>
    tpu.vector_store %arg8[%c5, %c0_24], %35 {strides = array<i32>} : memref<8x128xi32, #tpu.memory_space<vmem>>, vector<1x128xi32>,
    %37 = vector.extract_strided_slice %24 {offsets = [0, 768], sizes = [1, 128], strides = [1, 1]} : vector<8x1024xi32> to vector<1x128xi32>
    %c6 = arith.constant 6 : index
    %c0_25 = arith.constant 0 : index
    %38 = vector.load %arg8[%c6, %c0_25] : memref<8x128xi32, #tpu.memory_space<vmem>>, vector<1x128xi32>
    tpu.vector_store %arg8[%c6, %c0_25], %37 {strides = array<i32>} : memref<8x128xi32, #tpu.memory_space<vmem>>, vector<1x128xi32>,
    %39 = vector.extract_strided_slice %24 {offsets = [0, 896], sizes = [1, 128], strides = [1, 1]} : vector<8x1024xi32> to vector<1x128xi32>
    %c7 = arith.constant 7 : index
    %c0_26 = arith.constant 0 : index
    %40 = vector.load %arg8[%c7, %c0_26] : memref<8x128xi32, #tpu.memory_space<vmem>>, vector<1x128xi32>
    tpu.vector_store %arg8[%c7, %c0_26], %39 {strides = array<i32>} : memref<8x128xi32, #tpu.memory_space<vmem>>, vector<1x128xi32>,
    return
  }
  func.func @transform_0(%arg0: i32) -> (i32, i32) {
    %c0_i32 = arith.constant 0 : i32
    %c0_i32_0 = arith.constant 0 : i32
    return %arg0, %c0_i32 : i32, i32
  }
  func.func @transform_1(%arg0: i32) -> (i32, i32) {
    %c0_i32 = arith.constant 0 : i32
    %c0_i32_0 = arith.constant 0 : i32
    %c0_i32_1 = arith.constant 0 : i32
    return %c0_i32, %c0_i32_0 : i32, i32
  }
  func.func @transform_2(%arg0: i32) -> (i32, i32) {
    %c0_i32 = arith.constant 0 : i32
    %c0_i32_0 = arith.constant 0 : i32
    %c0_i32_1 = arith.constant 0 : i32
    return %c0_i32, %c0_i32_0 : i32, i32
  }
  func.func @transform_3(%arg0: i32) -> (i32, i32) {
    %c0_i32 = arith.constant 0 : i32
    %c0_i32_0 = arith.constant 0 : i32
    %c0_i32_1 = arith.constant 0 : i32
    return %c0_i32, %c0_i32_0 : i32, i32
  }
  func.func @transform_4(%arg0: i32) -> (i32, i32) {
    %c0_i32 = arith.constant 0 : i32
    %c0_i32_0 = arith.constant 0 : i32
    %c0_i32_1 = arith.constant 0 : i32
    return %c0_i32, %c0_i32_0 : i32, i32
  }
  func.func @transform_5(%arg0: i32) -> (i32, i32) {
    %c0_i32 = arith.constant 0 : i32
    %c0_i32_0 = arith.constant 0 : i32
    %c0_i32_1 = arith.constant 0 : i32
    return %c0_i32, %c0_i32_0 : i32, i32
  }
  func.func @transform_6(%arg0: i32) -> (i32, i32) {
    %c0_i32 = arith.constant 0 : i32
    %c0_i32_0 = arith.constant 0 : i32
    return %arg0, %c0_i32 : i32, i32
  }
  func.func @transform_7(%arg0: i32) -> (i32, i32) {
    %c0_i32 = arith.constant 0 : i32
    %c0_i32_0 = arith.constant 0 : i32
    return %arg0, %c0_i32 : i32, i32
  }
}

</mosaic_0001>

<bundles_post_ra>
// kernel: tpu_custom_call.1
= control target key start
LH: loop header
LB: loop body
LE: loop exit
PB: predicated region body
PF: predicated region fallthrough
CT: control target
= control target key end

     0   :  { %vm165_vm0 = vcmask 261120   ;;  %s9816_s0 = inlined_call_operand.vmem [shape: f32[1024,32], index: 0, kind: input, shape index: {}]   ;;  %s9817_s1 = inlined_call_operand.vmem [shape: f32[32,4], index: 1, kind: input, shape index: {}]   ;;  %s9818_s2 = inlined_call_operand.vmem [shape: f32[1,4], index: 2, kind: input, shape index: {}]   ;;  %s9819_s3 = inlined_call_operand.vmem [shape: f32[4,32], index: 3, kind: input, shape index: {}]   ;;  %s9820_s4 = inlined_call_operand.vmem [shape: f32[1,32], index: 4, kind: input, shape index: {}]   ;;  %s9821_s5 = inlined_call_operand.vmem [shape: f32[16,4], index: 5, kind: input, shape index: {}]   ;;  %s9822_s6 = inlined_call_operand.vmem [shape: f32[1024,32], index: 6, kind: output, shape index: {0}]   ;;  %s9823_s7 = inlined_call_operand.hbm [shape: s32[8,128], index: 7, kind: output, shape index: {1}]  }
   0x1   :  { %v157_v0 = vld [vmem:[%s9817_s1 + $0x18] sm:$0xff]  ;;  %v156_v1 = vld [vmem:[%s9817_s1 + $0x10] sm:$0xff]  ;;  %v26_v2 = vld [vmem:[%s9816_s0] sm:$0xff] }
   0x2   :  { %4119 = vmatprep.subr.mxu0 %v157_v0  ;;  %v155_v3 = vld [vmem:[%s9817_s1 + $0x8] sm:$0xff]  ;;  %4127 = vmatprep.mubr.msk.f32.mxu0 %vm165_vm0, %v26_v2  ;;  %v154_v4 = vld [vmem:[%s9817_s1] sm:$0xff]  ;;  %v28_v6 = vld [vmem:[%s9816_s0 + $0x10] sm:$0xff] }
   0x3   :  { %4120 = vmatpush3.msra.mxu0 %v157_v0  ;;  %v27_v5 = vld [vmem:[%s9816_s0 + $0x8] sm:$0xff]  ;;  %v29_v7 = vld [vmem:[%s9816_s0 + $0x18] sm:$0xff]  ;;  %v30_v8 = vld [vmem:[%s9816_s0 + $0x20] sm:$0xff] }
   0x4   :  { %4121 = vmatprep.subr.mxu0 %v156_v1  ;;  %v31_v9 = vld [vmem:[%s9816_s0 + $0x28] sm:$0xff]  ;;  %v32_v10 = vld [vmem:[%s9816_s0 + $0x30] sm:$0xff]  ;;  %v33_v11 = vld [vmem:[%s9816_s0 + $0x38] sm:$0xff] }
   0x5   :  { %4122 = vmatpush3.msra.mxu0 %v156_v1  ;;  %v34_v12 = vld [vmem:[%s9816_s0 + $0x40] sm:$0xff]  ;;  %v35_v13 = vld [vmem:[%s9816_s0 + $0x48] sm:$0xff]  ;;  %v36_v14 = vld [vmem:[%s9816_s0 + $0x50] sm:$0xff] }
   0x6   :  { %4123 = vmatprep.subr.mxu0 %v155_v3  ;;  %v37_v15 = vld [vmem:[%s9816_s0 + $0x58] sm:$0xff] }
   0x7   :  { %4124 = vmatpush3.msra.mxu0 %v155_v3 }
   0x8   :  { %4125 = vmatprep.subr.mxu0 %v154_v4 }
   0x9   :  { %4126 = vmatpush3.msra.mxu0 %v154_v4 }
   0xa   :  { %4128 = vmatmul.mubr.msk.f32.vlgmr.msra.gmra.mxu0 %vm165_vm0, %v27_v5 }
   0xb   :  { %4130 = vmatprep.mubr.msk.f32.mxu0 %vm165_vm0, %v28_v6 }
   0xe   :  { %4131 = vmatmul.mubr.msk.f32.gmra.mxu0 %vm165_vm0, %v29_v7 }
   0xf   :  { %4133 = vmatprep.mubr.msk.f32.mxu0 %vm165_vm0, %v30_v8 }
  0x12   :  { %4134 = vmatmul.mubr.msk.f32.gmra.mxu0 %vm165_vm0, %v31_v9 }
  0x13   :  { %4136 = vmatprep.mubr.msk.f32.mxu0 %vm165_vm0, %v32_v10 }
  0x16   :  { %4137 = vmatmul.mubr.msk.f32.gmra.mxu0 %vm165_vm0, %v33_v11 }
  0x17   :  { %4139 = vmatprep.mubr.msk.f32.mxu0 %vm165_vm0, %v34_v12 }
  0x1a   :  { %4140 = vmatmul.mubr.msk.f32.gmra.mxu0 %vm165_vm0, %v35_v13 }
  0x1b   :  { %4142 = vmatprep.mubr.msk.f32.mxu0 %vm165_vm0, %v36_v14 }
  0x1c   :  { %13 = vsyncpa [#allocation3], 0  ;;  %v38_v16 = vld [vmem:[%s9816_s0 + $0x60] sm:$0xff]  ;;  %v39_v17 = vld [vmem:[%s9816_s0 + $0x68] sm:$0xff]  ;;  %vm2170_vm1 = vcmask 1043456   ;;  %vm1785_vm2 = vcmask 31744  }
  0x1d   :  { %v40_v18 = vld [vmem:[%s9816_s0 + $0x70] sm:$0xff]  ;;  %v41_v19 = vld [vmem:[%s9816_s0 + $0x78] sm:$0xff]  ;;  %v42_v20 = vld [vmem:[%s9816_s0 + $0x80] sm:$0xff] }
  0x1e   :  { %4143 = vmatmul.mubr.msk.f32.gmra.mxu0 %vm165_vm0, %v37_v15  ;;  %v43_v21 = vld [vmem:[%s9816_s0 + $0x88] sm:$0xff]  ;;  %v44_v22 = vld [vmem:[%s9816_s0 + $0x90] sm:$0xff]  ;;  %v45_v23 = vld [vmem:[%s9816_s0 + $0x98] sm:$0xff] }
  0x1f   :  { %4145 = vmatprep.mubr.msk.f32.mxu0 %vm165_vm0, %v38_v16  ;;  %v46_v24 = vld [vmem:[%s9816_s0 + $0xa0] sm:$0xff]  ;;  %v47_v25 = vld [vmem:[%s9816_s0 + $0xa8] sm:$0xff]  ;;  %v48_v26 = vld [vmem:[%s9816_s0 + $0xb0] sm:$0xff] }
  0x20   :  { %v49_v27 = vld [vmem:[%s9816_s0 + $0xb8] sm:$0xff]  ;;  %v50_v28 = vld [vmem:[%s9816_s0 + $0xc0] sm:$0xff]  ;;  %v51_v29 = vld [vmem:[%s9816_s0 + $0xc8] sm:$0xff] }
  0x21   :  { %v52_v30 = vld [vmem:[%s9816_s0 + $0xd0] sm:$0xff]  ;;  %v53_v31 = vld [vmem:[%s9816_s0 + $0xd8] sm:$0xff]  ;;  %v54_v32 = vld [vmem:[%s9816_s0 + $0xe0] sm:$0xff] }
  0x22   :  { %4146 = vmatmul.mubr.msk.f32.gmra.mxu0 %vm165_vm0, %v39_v17  ;;  %v55_v33 = vld [vmem:[%s9816_s0 + $0xe8] sm:$0xff]  ;;  %v56_v34 = vld [vmem:[%s9816_s0 + $0xf0] sm:$0xff]  ;;  %v57_v35 = vld [vmem:[%s9816_s0 + $0xf8] sm:$0xff] }
  0x23   :  { %4148 = vmatprep.mubr.msk.f32.mxu0 %vm165_vm0, %v40_v18  ;;  %v58_v36 = vld [vmem:[%s9816_s0 + $0x100] sm:$0xff]  ;;  %v59_v37 = vld [vmem:[%s9816_s0 + $0x108] sm:$0xff]  ;;  %v60_v38 = vld [vmem:[%s9816_s0 + $0x110] sm:$0xff] }
  0x24   :  { %v61_v39 = vld [vmem:[%s9816_s0 + $0x118] sm:$0xff]  ;;  %v62_v40 = vld [vmem:[%s9816_s0 + $0x120] sm:$0xff]  ;;  %v63_v41 = vld [vmem:[%s9816_s0 + $0x128] sm:$0xff] }
  0x25   :  { %v64_v42 = vld [vmem:[%s9816_s0 + $0x130] sm:$0xff]  ;;  %v65_v43 = vld [vmem:[%s9816_s0 + $0x138] sm:$0xff]  ;;  %v66_v44 = vld [vmem:[%s9816_s0 + $0x140] sm:$0xff] }
  0x26   :  { %4149 = vmatmul.mubr.msk.f32.gmra.mxu0 %vm165_vm0, %v41_v19  ;;  %v67_v45 = vld [vmem:[%s9816_s0 + $0x148] sm:$0xff]  ;;  %v68_v46 = vld [vmem:[%s9816_s0 + $0x150] sm:$0xff]  ;;  %v69_v47 = vld [vmem:[%s9816_s0 + $0x158] sm:$0xff] }
  0x27   :  { %4151 = vmatprep.mubr.msk.f32.mxu0 %vm165_vm0, %v42_v20  ;;  %v70_v48 = vld [vmem:[%s9816_s0 + $0x160] sm:$0xff]  ;;  %v71_v49 = vld [vmem:[%s9816_s0 + $0x168] sm:$0xff]  ;;  %v72_v50 = vld [vmem:[%s9816_s0 + $0x170] sm:$0xff] }
  0x28   :  { %v73_v51 = vld [vmem:[%s9816_s0 + $0x178] sm:$0xff]  ;;  %v74_v52 = vld [vmem:[%s9816_s0 + $0x180] sm:$0xff]  ;;  %v75_v53 = vld [vmem:[%s9816_s0 + $0x188] sm:$0xff] }
  0x29   :  { %v76_v54 = vld [vmem:[%s9816_s0 + $0x190] sm:$0xff]  ;;  %v1777_v55 = vld [vmem:[%s9819_s3] sm:$0xf]  ;;  %v77_v56 = vld [vmem:[%s9816_s0 + $0x198] sm:$0xff] }
  0x2a   :  { %4152 = vmatmul.mubr.msk.f32.gmra.mxu0 %vm165_vm0, %v43_v21  ;;  %4319 = vmatprep.subr.msk.mxu1 %vm2170_vm1, %v1777_v55  ;;  %v78_v57 = vld [vmem:[%s9816_s0 + $0x1a0] sm:$0xff]  ;;  %v79_v58 = vld [vmem:[%s9816_s0 + $0x1a8] sm:$0xff]  ;;  %v80_v59 = vld [vmem:[%s9816_s0 + $0x1b0] sm:$0xff] }
  0x2b   :  { %4154 = vmatprep.mubr.msk.f32.mxu0 %vm165_vm0, %v44_v22  ;;  %4320 = vmatpush3.msk.msra.mxu1 %vm2170_vm1, %v1777_v55  ;;  %v81_v60 = vld [vmem:[%s9816_s0 + $0x1b8] sm:$0xff]  ;;  %v82_v61 = vld [vmem:[%s9816_s0 + $0x1c0] sm:$0xff]  ;;  %v83_v62 = vld [vmem:[%s9816_s0 + $0x1c8] sm:$0xff] }
  0x2c   :  { %v84_v63 = vld [vmem:[%s9816_s0 + $0x1d0] sm:$0xff]  ;;  %v85_v0 = vld [vmem:[%s9816_s0 + $0x1d8] sm:$0xff]  ;;  %v86_v1 = vld [vmem:[%s9816_s0 + $0x1e0] sm:$0xff] }
  0x2d   :  { %v87_v2 = vld [vmem:[%s9816_s0 + $0x1e8] sm:$0xff]  ;;  %v88_v3 = vld [vmem:[%s9816_s0 + $0x1f0] sm:$0xff]  ;;  %v89_v4 = vld [vmem:[%s9816_s0 + $0x1f8] sm:$0xff] }
  0x2e   :  { %4155 = vmatmul.mubr.msk.f32.gmra.mxu0 %vm165_vm0, %v45_v23  ;;  %v90_v5 = vld [vmem:[%s9816_s0 + $0x200] sm:$0xff]  ;;  %v91_v6 = vld [vmem:[%s9816_s0 + $0x208] sm:$0xff]  ;;  %v92_v7 = vld [vmem:[%s9816_s0 + $0x210] sm:$0xff] }
  0x2f   :  { %4157 = vmatprep.mubr.msk.f32.mxu0 %vm165_vm0, %v46_v24  ;;  %v93_v8 = vld [vmem:[%s9816_s0 + $0x218] sm:$0xff]  ;;  %v94_v9 = vld [vmem:[%s9816_s0 + $0x220] sm:$0xff]  ;;  %v95_v10 = vld [vmem:[%s9816_s0 + $0x228] sm:$0xff] }
  0x30   :  { %v96_v11 = vld [vmem:[%s9816_s0 + $0x230] sm:$0xff]  ;;  %v97_v12 = vld [vmem:[%s9816_s0 + $0x238] sm:$0xff]  ;;  %v98_v13 = vld [vmem:[%s9816_s0 + $0x240] sm:$0xff] }
  0x31   :  { %v99_v14 = vld [vmem:[%s9816_s0 + $0x248] sm:$0xff]  ;;  %v100_v15 = vld [vmem:[%s9816_s0 + $0x250] sm:$0xff]  ;;  %v101_v16 = vld [vmem:[%s9816_s0 + $0x258] sm:$0xff] }
  0x32   :  { %4158 = vmatmul.mubr.msk.f32.gmra.mxu0 %vm165_vm0, %v47_v25  ;;  %v102_v17 = vld [vmem:[%s9816_s0 + $0x260] sm:$0xff]  ;;  %v103_v18 = vld [vmem:[%s9816_s0 + $0x268] sm:$0xff]  ;;  %v104_v19 = vld [vmem:[%s9816_s0 + $0x270] sm:$0xff] }
  0x33   :  { %4160 = vmatprep.mubr.msk.f32.mxu0 %vm165_vm0, %v48_v26  ;;  %v105_v20 = vld [vmem:[%s9816_s0 + $0x278] sm:$0xff]  ;;  %v106_v21 = vld [vmem:[%s9816_s0 + $0x280] sm:$0xff]  ;;  %v107_v22 = vld [vmem:[%s9816_s0 + $0x288] sm:$0xff] }
  0x34   :  { %v108_v23 = vld [vmem:[%s9816_s0 + $0x290] sm:$0xff]  ;;  %v109_v24 = vld [vmem:[%s9816_s0 + $0x298] sm:$0xff]  ;;  %v110_v25 = vld [vmem:[%s9816_s0 + $0x2a0] sm:$0xff] }
  0x35   :  { %v111_v26 = vld [vmem:[%s9816_s0 + $0x2a8] sm:$0xff]  ;;  %v129_v55 = vld [vmem:[%s9816_s0 + $0x338] sm:$0xff] }
  0x36   :  { %4161 = vmatmul.mubr.msk.f32.gmra.mxu0 %vm165_vm0, %v49_v27  ;;  %v112_v27 = vld [vmem:[%s9816_s0 + $0x2b0] sm:$0xff] }
  0x37   :  { %4163 = vmatprep.mubr.msk.f32.mxu0 %vm165_vm0, %v50_v28  ;;  %v113_v28 = vld [vmem:[%s9816_s0 + $0x2b8] sm:$0xff] }
  0x3a   :  { %4164 = vmatmul.mubr.msk.f32.gmra.mxu0 %vm165_vm0, %v51_v29  ;;  %v114_v29 = vld [vmem:[%s9816_s0 + $0x2c0] sm:$0xff] }
  0x3b   :  { %4166 = vmatprep.mubr.msk.f32.mxu0 %vm165_vm0, %v52_v30  ;;  %v115_v30 = vld [vmem:[%s9816_s0 + $0x2c8] sm:$0xff] }
  0x3e   :  { %4167 = vmatmul.mubr.msk.f32.gmra.mxu0 %vm165_vm0, %v53_v31  ;;  %v116_v31 = vld [vmem:[%s9816_s0 + $0x2d0] sm:$0xff] }
  0x3f   :  { %4169 = vmatprep.mubr.msk.f32.mxu0 %vm165_vm0, %v54_v32  ;;  %v117_v32 = vld [vmem:[%s9816_s0 + $0x2d8] sm:$0xff] }
  0x42   :  { %4170 = vmatmul.mubr.msk.f32.gmra.mxu0 %vm165_vm0, %v55_v33  ;;  %v118_v33 = vld [vmem:[%s9816_s0 + $0x2e0] sm:$0xff] }
  0x43   :  { %4172 = vmatprep.mubr.msk.f32.mxu0 %vm165_vm0, %v56_v34  ;;  %v119_v34 = vld [vmem:[%s9816_s0 + $0x2e8] sm:$0xff] }
  0x46   :  { %4173 = vmatmul.mubr.msk.f32.gmra.mxu0 %vm165_vm0, %v57_v35  ;;  %v120_v35 = vld [vmem:[%s9816_s0 + $0x2f0] sm:$0xff] }
  0x47   :  { %4175 = vmatprep.mubr.msk.f32.mxu0 %vm165_vm0, %v58_v36  ;;  %v121_v36 = vld [vmem:[%s9816_s0 + $0x2f8] sm:$0xff] }
  0x4a   :  { %4176 = vmatmul.mubr.msk.f32.gmra.mxu0 %vm165_vm0, %v59_v37  ;;  %v122_v37 = vld [vmem:[%s9816_s0 + $0x300] sm:$0xff] }
  0x4b   :  { %4178 = vmatprep.mubr.msk.f32.mxu0 %vm165_vm0, %v60_v38  ;;  %v123_v38 = vld [vmem:[%s9816_s0 + $0x308] sm:$0xff] }
  0x4e   :  { %4179 = vmatmul.mubr.msk.f32.gmra.mxu0 %vm165_vm0, %v61_v39  ;;  %v6295_v39 = vld [vmem:[%s9818_s2] ss:$0 sm:$0xff] }
  0x4f   :  { %4181 = vmatprep.mubr.msk.f32.mxu0 %vm165_vm0, %v62_v40  ;;  %v124_v40 = vld [vmem:[%s9816_s0 + $0x310] sm:$0xff] }
  0x52   :  { %4182 = vmatmul.mubr.msk.f32.gmra.mxu0 %vm165_vm0, %v63_v41 }
  0x53   :  { %4184 = vmatprep.mubr.msk.f32.mxu0 %vm165_vm0, %v64_v42 }
  0x56   :  { %4185 = vmatmul.mubr.msk.f32.gmra.mxu0 %vm165_vm0, %v65_v43  ;;  %v125_v43 = vld [vmem:[%s9816_s0 + $0x318] sm:$0xff] }
  0x57   :  { %4187 = vmatprep.mubr.msk.f32.mxu0 %vm165_vm0, %v66_v44 }
  0x5a   :  { %4188 = vmatmul.mubr.msk.f32.gmra.mxu0 %vm165_vm0, %v67_v45  ;;  %v126_v45 = vld [vmem:[%s9816_s0 + $0x320] sm:$0xff] }
  0x5b   :  { %4190 = vmatprep.mubr.msk.f32.mxu0 %vm165_vm0, %v68_v46 }
  0x5e   :  { %4191 = vmatmul.mubr.msk.f32.gmra.mxu0 %vm165_vm0, %v69_v47 }
  0x5f   :  { %4193 = vmatprep.mubr.msk.f32.mxu0 %vm165_vm0, %v70_v48 }
  0x62   :  { %4194 = vmatmul.mubr.msk.f32.gmra.mxu0 %vm165_vm0, %v71_v49  ;;  %v127_v49 = vld [vmem:[%s9816_s0 + $0x328] sm:$0xff] }
  0x63   :  { %4196 = vmatprep.mubr.msk.f32.mxu0 %vm165_vm0, %v72_v50 }
  0x66   :  { %4197 = vmatmul.mubr.msk.f32.gmra.mxu0 %vm165_vm0, %v73_v51  ;;  %v128_v51 = vld [vmem:[%s9816_s0 + $0x330] sm:$0xff] }
  0x67   :  { %4199 = vmatprep.mubr.msk.f32.mxu0 %vm165_vm0, %v74_v52 }
  0x6a   :  { %4200 = vmatmul.mubr.msk.f32.gmra.mxu0 %vm165_vm0, %v75_v53 }
  0x6b   :  { %4202 = vmatprep.mubr.msk.f32.mxu0 %vm165_vm0, %v76_v54 }
  0x6e   :  { %4203 = vmatmul.mubr.msk.f32.gmra.mxu0 %vm165_vm0, %v77_v56 }
  0x6f   :  { %4205 = vmatprep.mubr.msk.f32.mxu0 %vm165_vm0, %v78_v57  ;;  %v130_v57 = vld [vmem:[%s9816_s0 + $0x340] sm:$0xff] }
  0x72   :  { %4206 = vmatmul.mubr.msk.f32.gmra.mxu0 %vm165_vm0, %v79_v58 }
  0x73   :  { %4208 = vmatprep.mubr.msk.f32.mxu0 %vm165_vm0, %v80_v59 }
  0x76   :  { %4209 = vmatmul.mubr.msk.f32.gmra.mxu0 %vm165_vm0, %v81_v60  ;;  %v131_v60 = vld [vmem:[%s9816_s0 + $0x348] sm:$0xff] }
  0x77   :  { %4211 = vmatprep.mubr.msk.f32.mxu0 %vm165_vm0, %v82_v61 }
  0x7a   :  { %4212 = vmatmul.mubr.msk.f32.gmra.mxu0 %vm165_vm0, %v83_v62  ;;  %v132_v62 = vld [vmem:[%s9816_s0 + $0x350] sm:$0xff] }
  0x7b   :  { %4214 = vmatprep.mubr.msk.f32.mxu0 %vm165_vm0, %v84_v63  ;;  %v6341_v63 = vld [vmem:[%s9821_s5 + $0x8] ss:$0 sm:$0xff] }
  0x7e   :  { %4215 = vmatmul.mubr.msk.f32.gmra.mxu0 %vm165_vm0, %v85_v0 }
  0x7f   :  { %4217 = vmatprep.mubr.msk.f32.mxu0 %vm165_vm0, %v86_v1 }
  0x82   :  { %4218 = vmatmul.mubr.msk.f32.gmra.mxu0 %vm165_vm0, %v87_v2 }
  0x83   :  { %4220 = vmatprep.mubr.msk.f32.mxu0 %vm165_vm0, %v88_v3 }
  0x86   :  { %4221 = vmatmul.mubr.msk.f32.gmra.mxu0 %vm165_vm0, %v89_v4  ;;  %v6349_v4 = vld [vmem:[%s9821_s5 + $0x9] ss:$0 sm:$0xff] }
  0x87   :  { %4223 = vmatprep.mubr.msk.f32.mxu0 %vm165_vm0, %v90_v5 }
  0x8a   :  { %4224 = vmatmul.mubr.msk.f32.gmra.mxu0 %vm165_vm0, %v91_v6  ;;  %v133_v6 = vld [vmem:[%s9816_s0 + $0x358] sm:$0xff] }
  0x8b   :  { %4226 = vmatprep.mubr.msk.f32.mxu0 %vm165_vm0, %v92_v7 }
  0x8e   :  { %4227 = vmatmul.mubr.msk.f32.gmra.mxu0 %vm165_vm0, %v93_v8 }
  0x8f   :  { %4229 = vmatprep.mubr.msk.f32.mxu0 %vm165_vm0, %v94_v9 }
  0x92   :  { %4230 = vmatmul.mubr.msk.f32.gmra.mxu0 %vm165_vm0, %v95_v10  ;;  %v134_v10 = vld [vmem:[%s9816_s0 + $0x360] sm:$0xff] }
  0x93   :  { %4232 = vmatprep.mubr.msk.f32.mxu0 %vm165_vm0, %v96_v11 }
  0x96   :  { %4233 = vmatmul.mubr.msk.f32.gmra.mxu0 %vm165_vm0, %v97_v12 }
  0x97   :  { %4235 = vmatprep.mubr.msk.f32.mxu0 %vm165_vm0, %v98_v13 }
  0x9a   :  { %4236 = vmatmul.mubr.msk.f32.gmra.mxu0 %vm165_vm0, %v99_v14 }
  0x9b   :  { %4238 = vmatprep.mubr.msk.f32.mxu0 %vm165_vm0, %v100_v15 }
  0x9e   :  { %4239 = vmatmul.mubr.msk.f32.gmra.mxu0 %vm165_vm0, %v101_v16 }
  0x9f   :  { %4241 = vmatprep.mubr.msk.f32.mxu0 %vm165_vm0, %v102_v17  ;;  %v135_v17 = vld [vmem:[%s9816_s0 + $0x368] sm:$0xff] }
  0xa2   :  { %4242 = vmatmul.mubr.msk.f32.gmra.mxu0 %vm165_vm0, %v103_v18 }
  0xa3   :  { %4244 = vmatprep.mubr.msk.f32.mxu0 %vm165_vm0, %v104_v19 }
  0xa6   :  { %4245 = vmatmul.mubr.msk.f32.gmra.mxu0 %vm165_vm0, %v105_v20 }
  0xa7   :  { %4247 = vmatprep.mubr.msk.f32.mxu0 %vm165_vm0, %v106_v21 }
  0xaa   :  { %4248 = vmatmul.mubr.msk.f32.gmra.mxu0 %vm165_vm0, %v107_v22  ;;  %v136_v22 = vld [vmem:[%s9816_s0 + $0x370] sm:$0xff] }
  0xab   :  { %4250 = vmatprep.mubr.msk.f32.mxu0 %vm165_vm0, %v108_v23 }
  0xae   :  { %4251 = vmatmul.mubr.msk.f32.gmra.mxu0 %vm165_vm0, %v109_v24 }
  0xaf   :  { %4253 = vmatprep.mubr.msk.f32.mxu0 %vm165_vm0, %v110_v25 }
  0xb2   :  { %4254 = vmatmul.mubr.msk.f32.gmra.mxu0 %vm165_vm0, %v111_v26 }
  0xb3   :  { %4256 = vmatprep.mubr.msk.f32.mxu0 %vm165_vm0, %v112_v27 }
  0xb6   :  { %4257 = vmatmul.mubr.msk.f32.gmra.mxu0 %vm165_vm0, %v113_v28 }
  0xb7   :  { %4259 = vmatprep.mubr.msk.f32.mxu0 %vm165_vm0, %v114_v29 }
  0xba   :  { %4260 = vmatmul.mubr.msk.f32.gmra.mxu0 %vm165_vm0, %v115_v30 }
  0xbb   :  { %4262 = vmatprep.mubr.msk.f32.mxu0 %vm165_vm0, %v116_v31 }
  0xbe   :  { %4263 = vmatmul.mubr.msk.f32.gmra.mxu0 %vm165_vm0, %v117_v32 }
  0xbf   :  { %4265 = vmatprep.mubr.msk.f32.mxu0 %vm165_vm0, %v118_v33 }
  0xc2   :  { %4266 = vmatmul.mubr.msk.f32.gmra.mxu0 %vm165_vm0, %v119_v34 }
  0xc3   :  { %4268 = vmatprep.mubr.msk.f32.mxu0 %vm165_vm0, %v120_v35 }
  0xc6   :  { %4269 = vmatmul.mubr.msk.f32.gmra.mxu0 %vm165_vm0, %v121_v36  ;;  %v137_v36 = vld [vmem:[%s9816_s0 + $0x378] sm:$0xff] }
  0xc7   :  { %4271 = vmatprep.mubr.msk.f32.mxu0 %vm165_vm0, %v122_v37 }
  0xca   :  { %v4129_v41 = vpop.f32.mrf.mxu0  ;;  %4272 = vmatmul.mubr.msk.f32.gmra.mxu0 %vm165_vm0, %v123_v38 }
  0xcb   :  { %v622_v42 = vadd.f32 %v4129_v41, %v6295_v39  ;;  %4274 = vmatprep.mubr.msk.f32.mxu0 %vm165_vm0, %v124_v40 }
  0xcc   :  { %v616_v44 = vpop.f32.mrf.mxu0 }
  0xcd   :  { %5554 = vtanh.f32 %v622_v42  ;;  %v617_v46 = vadd.f32 %v6295_v39, %v616_v44  ;;  %v138_v42 = vld [vmem:[%s9816_s0 + $0x380] sm:$0xff] }
  0xce   :  { %v4132_v47 = vpop.f32.mrf.mxu0  ;;  %4275 = vmatmul.mubr.msk.f32.gmra.mxu0 %vm165_vm0, %v125_v43 }
  0xcf   :  { %5556 = vtanh.f32 %v617_v46  ;;  %v632_v48 = vadd.f32 %v4132_v47, %v6295_v39  ;;  %4277 = vmatprep.mubr.msk.f32.mxu0 %vm165_vm0, %v126_v45 }
  0xd0   :  { %v626_v50 = vpop.f32.mrf.mxu0 }
  0xd1   :  { %5558 = vtanh.f32 %v632_v48  ;;  %v627_v52 = vadd.f32 %v6295_v39, %v626_v50 }
  0xd2   :  { %v4135_v53 = vpop.f32.mrf.mxu0  ;;  %4278 = vmatmul.mubr.msk.f32.gmra.mxu0 %vm165_vm0, %v127_v49 }
  0xd3   :  { %5560 = vtanh.f32 %v627_v52  ;;  %v642_v54 = vadd.f32 %v4135_v53, %v6295_v39  ;;  %4280 = vmatprep.mubr.msk.f32.mxu0 %vm165_vm0, %v128_v51 }
  0xd4   :  { %v636_v56 = vpop.f32.mrf.mxu0 }
  0xd5   :  { %5562 = vtanh.f32 %v642_v54  ;;  %v637_v58 = vadd.f32 %v6295_v39, %v636_v56  ;;  %v139_v56 = vld [vmem:[%s9816_s0 + $0x388] sm:$0xff] }
  0xd6   :  { %v4138_v59 = vpop.f32.mrf.mxu0  ;;  %4281 = vmatmul.mubr.msk.f32.gmra.mxu0 %vm165_vm0, %v129_v55 }
  0xd7   :  { %5564 = vtanh.f32 %v637_v58  ;;  %4283 = vmatprep.mubr.msk.f32.mxu0 %vm165_vm0, %v130_v57  ;;  %v652_v2 = vadd.f32 %v4138_v59, %v6295_v39 }
  0xd8   :  { %v646_v61 = vpop.f32.mrf.mxu0 }
  0xd9   :  { %v647_v0 = vadd.f32 %v6295_v39, %v646_v61 }
  0xda   :  { %v5555_v1 = vpop.eup %5554  ;;  %v4141_v3 = vpop.f32.mrf.mxu0  ;;  %4284 = vmatmul.mubr.msk.f32.gmra.mxu0 %vm165_vm0, %v131_v60 }
  0xdb   :  { %5566 = vtanh.f32 %v647_v0  ;;  %v662_v5 = vadd.f32 %v4141_v3, %v6295_v39  ;;  %4286 = vmatprep.mubr.msk.f32.mxu0 %vm165_vm0, %v132_v62  ;;  %v1390_v7 = vmul.f32 %v5555_v1, %v6341_v63  ;;  %v140_v62 = vld [vmem:[%s9816_s0 + $0x390] sm:$0xff] }
  0xdc   :  { %v5557_v8 = vpop.eup %5556  ;;  %v656_v9 = vpop.f32.mrf.mxu0  ;;  %5568 = vtanh.f32 %v652_v2 }
  0xdd   :  { %v657_v11 = vadd.f32 %v6295_v39, %v656_v9  ;;  %v1389_v12 = vmul.f32 %v5557_v8, %v6341_v63  ;;  %v1522_v13 = vsub.f32 %v1390_v7, %v6349_v4  ;;  %5570 = vtanh.f32 %v662_v5 }
  0xde   :  { %v5559_v14 = vpop.eup %5558  ;;  %v4144_v15 = vpop.f32.mrf.mxu0  ;;  %4287 = vmatmul.mubr.msk.f32.gmra.mxu0 %vm165_vm0, %v133_v6 }
  0xdf   :  { %v672_v16 = vadd.f32 %v4144_v15, %v6295_v39  ;;  %4289 = vmatprep.mubr.msk.f32.mxu0 %vm165_vm0, %v134_v10  ;;  %v1521_v18 = vsub.f32 %v1389_v12, %v6349_v4  ;;  %v4521_v19 = vand.u32 2147483647, %v1522_v13  ;;  %5572 = vtanh.f32 %v657_v11 }
  0xe0   :  { %v5561_v20 = vpop.eup %5560  ;;  %v666_v21 = vpop.f32.mrf.mxu0  ;;  %v4523_v23 = vcvt.f32.s32 %v1522_v13  ;;  %v4526_v24 = vand.u32 2147483648, %v1522_v13  ;;  %v1392_v25 = vmul.f32 %v5559_v14, %v6341_v63  ;;  %v141_v14 = vld [vmem:[%s9816_s0 + $0x398] sm:$0xff] }
  0xe1   :  { %5574 = vtanh.f32 %v672_v16  ;;  %v667_v26 = vadd.f32 %v6295_v39, %v666_v21  ;;  %v4513_v27 = vand.u32 2147483647, %v1521_v18  ;;  %v4515_v28 = vcvt.f32.s32 %v1521_v18  ;;  %v142_v21 = vld [vmem:[%s9816_s0 + $0x3a0] sm:$0xff] }
  0xe2   :  { %v5563_v29 = vpop.eup %5562  ;;  %v4147_v30 = vpop.f32.mrf.mxu0  ;;  %4290 = vmatmul.mubr.msk.f32.gmra.mxu0 %vm165_vm0, %v135_v17  ;;  %v4518_v31 = vand.u32 2147483648, %v1521_v18  ;;  %vm6376_vm3 = vcmp.lt.f32.partialorder %v4521_v19, 8388608.0  ;;  %v4524_v33 = vcvt.s32.f32 %v4523_v23  ;;  %v1391_v34 = vmul.f32 %v5561_v20, %v6341_v63 }
  0xe3   :  { %5576 = vtanh.f32 %v667_v26  ;;  %v682_v35 = vadd.f32 %v4147_v30, %v6295_v39  ;;  %4292 = vmatprep.mubr.msk.f32.mxu0 %vm165_vm0, %v136_v22  ;;  %vm6386_vm4 = vcmp.lt.f32.partialorder %v4513_v27, 8388608.0  ;;  %v4516_v38 = vcvt.s32.f32 %v4515_v28 }
  0xe4   :  { %v5565_v40 = vpop.eup %5564  ;;  %v676_v41 = vpop.f32.mrf.mxu0  ;;  %v4525_v43 = vand.u32 2147483647, %v4524_v33  ;;  %v1523_v44 = vsub.f32 %v1391_v34, %v6349_v4  ;;  %v6395_v45 = vsub.f32 %v1392_v25, %v6349_v4  ;;  %v1394_v46 = vmul.f32 %v5563_v29, %v6341_v63 }
  0xe5   :  { %5578 = vtanh.f32 %v682_v35  ;;  %v677_v47 = vadd.f32 %v6295_v39, %v676_v41  ;;  %v4517_v48 = vand.u32 2147483647, %v4516_v38  ;;  %v1393_v49 = vmul.f32 %v5565_v40, %v6341_v63  ;;  %v143_v35 = vld [vmem:[%s9816_s0 + $0x3a8] sm:$0xff] }
  0xe6   :  { %v4150_v50 = vpop.f32.mrf.mxu0  ;;  %4293 = vmatmul.mubr.msk.f32.gmra.mxu0 %vm165_vm0, %v137_v36  ;;  %v4527_v51 = vor.u32 %v4526_v24, %v4525_v43  ;;  %v4529_v52 = vand.u32 2147483647, %v1523_v44  ;;  %v4531_v53 = vcvt.f32.s32 %v1523_v44  ;;  %v4534_v54 = vand.u32 2147483648, %v1523_v44 }
  0xe7   :  { %5580 = vtanh.f32 %v677_v47  ;;  %v692_v55 = vadd.f32 %v4150_v50, %v6295_v39  ;;  %4295 = vmatprep.mubr.msk.f32.mxu0 %vm165_vm0, %v138_v42  ;;  %v4519_v57 = vor.u32 %v4518_v31, %v4517_v48  ;;  %v4537_v58 = vand.u32 2147483647, %v6395_v45 }
  0xe8   :  { %v5567_v59 = vpop.eup %5566  ;;  %v686_v60 = vpop.f32.mrf.mxu0  ;;  %v6409_v61 = vsel %vm6376_vm3, %v4527_v51, %v1522_v13  ;;  %vm6414_vm5 = vcmp.lt.f32.partialorder %v4529_v52, 8388608.0  ;;  %v4532_v1 = vcvt.s32.f32 %v4531_v53  ;;  %v4539_v2 = vcvt.f32.s32 %v6395_v45 }
  0xe9   :  { %9903 = vst [vmem:[#allocation5_spill] sm:$0xff] %v6409_v61  ;;  %5582 = vtanh.f32 %v692_v55  ;;  %v687_v3 = vadd.f32 %v6295_v39, %v686_v60  ;;  %v6422_v5 = vsel %vm6386_vm4, %v4519_v57, %v1521_v18  ;;  %vm6424_vm6 = vcmp.lt.f32.partialorder %v4537_v58, 8388608.0  ;;  %v5569_v12 = vpop.eup %5568  ;;  %v145_v57 = vld [vmem:[%s9816_s0 + $0x3b8] sm:$0xff] }
  0xea   :  { %9906 = vst [vmem:[#allocation6_spill] sm:$0xff] %v6422_v5  ;;  %v4153_v7 = vpop.f32.mrf.mxu0  ;;  %4296 = vmatmul.mubr.msk.f32.gmra.mxu0 %vm165_vm0, %v139_v56  ;;  %4321 = vmatprep.mubr.msk.f32.mxu1 %vm1785_vm2, %v6422_v5  ;;  %v4533_v8 = vand.u32 2147483647, %v4532_v1  ;;  %v4540_v9 = vcvt.s32.f32 %v4539_v2  ;;  %v4542_v10 = vand.u32 2147483648, %v6395_v45  ;;  %v1525_v11 = vsub.f32 %v1393_v49, %v6349_v4  ;;  %v6444_v17 = vpop.eup %5570  ;;  %v146_v2 = vld [vmem:[%s9816_s0 + $0x3c0] sm:$0xff] }
  0xeb   :  { %5584 = vtanh.f32 %v687_v3  ;;  %v702_v13 = vadd.f32 %v4153_v7, %v6295_v39  ;;  %4322 = vmatmul.mubr.msk.f32.vlgmr.msra.gmra.mxu1 %vm1785_vm2, %v6409_v61  ;;  %4298 = vmatprep.mubr.msk.f32.mxu0 %vm165_vm0, %v140_v62  ;;  %v6441_v15 = vsub.f32 %v1394_v46, %v6349_v4  ;;  %v1395_v16 = vmul.f32 %v5567_v59, %v6341_v63 }
  0xec   :  { %v696_v18 = vpop.f32.mrf.mxu0  ;;  %v4535_v19 = vor.u32 %v4534_v54, %v4533_v8  ;;  %v4541_v20 = vand.u32 2147483647, %v4540_v9  ;;  %v4545_v22 = vand.u32 2147483647, %v1525_v11  ;;  %v4547_v23 = vcvt.f32.s32 %v1525_v11  ;;  %v5573_v24 = vpop.eup %5572 }
  0xed   :  { %5586 = vtanh.f32 %v702_v13  ;;  %v697_v25 = vadd.f32 %v6295_v39, %v696_v18  ;;  %v4550_v26 = vand.u32 2147483648, %v1525_v11  ;;  %v4553_v27 = vand.u32 2147483647, %v6441_v15 }
  0xee   :  { %v6451_v28 = vpop.eup %5574  ;;  %v4156_v29 = vpop.f32.mrf.mxu0  ;;  %4299 = vmatmul.mubr.msk.f32.gmra.mxu0 %vm165_vm0, %v141_v14  ;;  %v6456_v30 = vsel %vm6414_vm5, %v4535_v19, %v1523_v44  ;;  %v4543_v31 = vor.u32 %v4542_v10, %v4541_v20  ;;  %vm6458_vm7 = vcmp.lt.f32.partialorder %v4545_v22, 8388608.0  ;;  %v4548_v33 = vcvt.s32.f32 %v4547_v23  ;;  %v144_v44 = vld [vmem:[%s9816_s0 + $0x3b0] sm:$0xff]  ;;  %v147_v20 = vld [vmem:[%s9816_s0 + $0x3c8] sm:$0xff] }
  0xef   :  { %9909 = vst [vmem:[#allocation7_spill] sm:$0xff] %v6456_v30  ;;  %5588 = vtanh.f32 %v697_v25  ;;  %v712_v34 = vadd.f32 %v4156_v29, %v6295_v39  ;;  %4324 = vmatprep.mubr.msk.f32.mxu1 %vm1785_vm2, %v6456_v30  ;;  %4301 = vmatprep.mubr.msk.f32.mxu0 %vm165_vm0, %v142_v21  ;;  %vm6469_vm8 = vcmp.lt.f32.partialorder %v4553_v27, 8388608.0  ;;  %v4555_v37 = vcvt.f32.s32 %v6441_v15 }
  0xf0   :  { %v6474_v38 = vpop.eup %5576  ;;  %v6479_v40 = vsel %vm6424_vm6, %v4543_v31, %v6395_v45  ;;  %v706_v41 = vpop.f32.mrf.mxu0  ;;  %v4549_v42 = vand.u32 2147483647, %v4548_v33  ;;  %v4558_v43 = vand.u32 2147483648, %v6441_v15  ;;  %v1527_v46 = vsub.f32 %v1395_v16, %v6349_v4 }
  0xf1   :  { %9914 = vst [vmem:[#allocation8_spill] sm:$0xff] %v6479_v40  ;;  %5590 = vtanh.f32 %v712_v34  ;;  %4325 = vmatmul.mubr.msk.f32.gmra.mxu1 %vm1785_vm2, %v6479_v40  ;;  %v707_v47 = vadd.f32 %v6295_v39, %v706_v41  ;;  %v4556_v48 = vcvt.s32.f32 %v4555_v37  ;;  %v1396_v45 = vmul.f32 %v5569_v12, %v6341_v63 }
  0xf2   :  { %v6490_v49 = vpop.eup %5578  ;;  %v4159_v50 = vpop.f32.mrf.mxu0  ;;  %4302 = vmatmul.mubr.msk.f32.gmra.mxu0 %vm165_vm0, %v143_v35  ;;  %v4551_v51 = vor.u32 %v4550_v26, %v4549_v42  ;;  %v4561_v52 = vand.u32 2147483647, %v1527_v46  ;;  %v4563_v53 = vcvt.f32.s32 %v1527_v46  ;;  %v4566_v54 = vand.u32 2147483648, %v1527_v46  ;;  %v148_v26 = vld [vmem:[%s9816_s0 + $0x3d0] sm:$0xff]  ;;  %v149_v42 = vld [vmem:[%s9816_s0 + $0x3d8] sm:$0xff] }
  0xf3   :  { %5592 = vtanh.f32 %v707_v47  ;;  %v722_v55 = vadd.f32 %v4159_v50, %v6295_v39  ;;  %v4557_v56 = vand.u32 2147483647, %v4556_v48  ;;  %4304 = vmatprep.mubr.msk.f32.mxu0 %vm165_vm0, %v144_v44  ;;  %v6499_v58 = vsub.f32 %v1396_v45, %v6349_v4  ;;  %v150_v50 = vld [vmem:[%s9816_s0 + $0x3e0] sm:$0xff] }
  0xf4   :  { %v5581_v59 = vpop.eup %5580  ;;  %v6503_v60 = vsel %vm6458_vm7, %v4551_v51, %v1525_v11  ;;  %v716_v62 = vpop.f32.mrf.mxu0  ;;  %vm6505_vm9 = vcmp.lt.f32.partialorder %v4561_v52, 8388608.0  ;;  %v4564_v1 = vcvt.s32.f32 %v4563_v53  ;;  %v1397_v3 = vmul.f32 %v5573_v24, %v6341_v63 }
  0xf5   :  { %9915 = vst [vmem:[#allocation9_spill] sm:$0xff] %v6503_v60  ;;  %5594 = vtanh.f32 %v722_v55  ;;  %4327 = vmatprep.mubr.msk.f32.mxu1 %vm1785_vm2, %v6503_v60  ;;  %v4559_v6 = vor.u32 %v4558_v43, %v4557_v56  ;;  %v717_v7 = vadd.f32 %v6295_v39, %v716_v62  ;;  %v4569_v8 = vand.u32 2147483647, %v6499_v58 }
  0xf6   :  { %v6517_v9 = vpop.eup %5582  ;;  %v4162_v10 = vpop.f32.mrf.mxu0  ;;  %4305 = vmatmul.mubr.msk.f32.gmra.mxu0 %vm165_vm0, %v145_v57  ;;  %v4565_v11 = vand.u32 2147483647, %v4564_v1  ;;  %v4571_v12 = vcvt.f32.s32 %v6499_v58  ;;  %v4574_v13 = vand.u32 2147483648, %v6499_v58  ;;  %v1529_v14 = vsub.f32 %v1397_v3, %v6349_v4 }
  0xf7   :  { %v6526_v16 = vsel %vm6469_vm8, %v4559_v6, %v6441_v15  ;;  %5596 = vtanh.f32 %v717_v7  ;;  %v732_v18 = vadd.f32 %v4162_v10, %v6295_v39  ;;  %vm6529_vm10 = vcmp.lt.f32.partialorder %v4569_v8, 8388608.0  ;;  %4307 = vmatprep.mubr.msk.f32.mxu0 %vm165_vm0, %v146_v2  ;;  %v151_v2 = vld [vmem:[%s9816_s0 + $0x3e8] sm:$0xff] }
  0xf8   :  { %9918 = vst [vmem:[#allocation10_spill] sm:$0xff] %v6526_v16  ;;  %v6537_v21 = vpop.eup %5584  ;;  %4328 = vmatmul.mubr.msk.f32.gmra.mxu1 %vm1785_vm2, %v6526_v16  ;;  %v4567_v15 = vor.u32 %v4566_v54, %v4565_v11  ;;  %v4572_v22 = vcvt.s32.f32 %v4571_v12  ;;  %v726_v23 = vpop.f32.mrf.mxu0  ;;  %v4577_v24 = vand.u32 2147483647, %v1529_v14  ;;  %v4579_v25 = vcvt.f32.s32 %v1529_v14  ;;  %v152_v11 = vld [vmem:[%s9816_s0 + $0x3f0] sm:$0xff] }
  0xf9   :  { %5598 = vtanh.f32 %v732_v18  ;;  %v727_v27 = vadd.f32 %v6295_v39, %v726_v23  ;;  %v4582_v29 = vand.u32 2147483648, %v1529_v14  ;;  %v1398_v31 = vmul.f32 %v6444_v17, %v6341_v63 }
  0xfa   :  { %v6547_v32 = vpop.eup %5586  ;;  %v6551_v33 = vsel %vm6505_vm9, %v4567_v15, %v1527_v46  ;;  %v4573_v34 = vand.u32 2147483647, %v4572_v22  ;;  %v4165_v35 = vpop.f32.mrf.mxu0  ;;  %4308 = vmatmul.mubr.msk.f32.gmra.mxu0 %vm165_vm0, %v147_v20  ;;  %vm6554_vm11 = vcmp.lt.f32.partialorder %v4577_v24, 8388608.0  ;;  %v4580_v37 = vcvt.s32.f32 %v4579_v25 }
  0xfb   :  { %9921 = vst [vmem:[#allocation11_spill] sm:$0xff] %v6551_v33  ;;  %4330 = vmatprep.mubr.msk.f32.mxu1 %vm1785_vm2, %v6551_v33  ;;  %5600 = vtanh.f32 %v727_v27  ;;  %v742_v17 = vadd.f32 %v4165_v35, %v6295_v39  ;;  %v1530_v41 = vsub.f32 %v1398_v31, %v6349_v4  ;;  %4310 = vmatprep.mubr.msk.f32.mxu0 %vm165_vm0, %v148_v26 }
  0xfc   :  { %v1399_v43 = vmul.f32 %v6474_v38, %v6341_v63  ;;  %v6568_v44 = vpop.eup %5588  ;;  %v4575_v46 = vor.u32 %v4574_v13, %v4573_v34  ;;  %v4581_v47 = vand.u32 2147483647, %v4580_v37  ;;  %v736_v48 = vpop.f32.mrf.mxu0  ;;  %v1400_v45 = vmul.f32 %v6451_v28, %v6341_v63 }
  0xfd   :  { %v1401_v51 = vmul.f32 %v5581_v59, %v6341_v63  ;;  %5602 = vtanh.f32 %v742_v17  ;;  %v4585_v52 = vand.u32 2147483647, %v1530_v41  ;;  %v4587_v53 = vcvt.f32.s32 %v1530_v41 }
  0xfe   :  { %v4590_v54 = vand.u32 2147483648, %v1530_v41  ;;  %v6576_v55 = vpop.eup %5590  ;;  %v6581_v38 = vsel %vm6529_vm10, %v4575_v46, %v6499_v58  ;;  %v4583_v56 = vor.u32 %v4582_v29, %v4581_v47  ;;  %v737_v28 = vadd.f32 %v6295_v39, %v736_v48  ;;  %v4168_v57 = vpop.f32.mrf.mxu0  ;;  %4311 = vmatmul.mubr.msk.f32.gmra.mxu0 %vm165_vm0, %v149_v42  ;;  %v153_v29 = vld [vmem:[%s9816_s0 + $0x3f8] sm:$0xff] }
  0xff   :  { %v1531_v62 = vsub.f32 %v1399_v43, %v6349_v4  ;;  %4331 = vmatmul.mubr.msk.f32.gmra.mxu1 %vm1785_vm2, %v6581_v38  ;;  %vm6588_vm12 = vcmp.lt.f32.partialorder %v4585_v52, 8388608.0  ;;  %v4588_v0 = vcvt.s32.f32 %v4587_v53  ;;  %v752_v1 = vadd.f32 %v4168_v57, %v6295_v39  ;;  %4313 = vmatprep.mubr.msk.f32.mxu0 %vm165_vm0, %v150_v50 }
 0x100   :  { %v6594_v58 = vsub.f32 %v1400_v45, %v6349_v4  ;;  %v6600_v3 = vpop.eup %5592  ;;  %v6604_v6 = vsel %vm6554_vm11, %v4583_v56, %v1529_v14  ;;  %5604 = vtanh.f32 %v737_v28  ;;  %v746_v10 = vpop.f32.mrf.mxu0  ;;  %v1533_v36 = vsub.f32 %v1401_v51, %v6349_v4 }
 0x101   :  { %v4593_v7 = vand.u32 2147483647, %v1531_v62  ;;  %v4595_v8 = vcvt.f32.s32 %v1531_v62  ;;  %4333 = vmatprep.mubr.msk.f32.mxu1 %vm1785_vm2, %v6604_v6  ;;  %v4589_v12 = vand.u32 2147483647, %v4588_v0  ;;  %5606 = vtanh.f32 %v752_v1 }
 0x102   :  { %v4598_v13 = vand.u32 2147483648, %v1531_v62  ;;  %v4601_v18 = vand.u32 2147483647, %v6594_v58  ;;  %v6612_v19 = vpop.eup %5594  ;;  %v4603_v15 = vcvt.f32.s32 %v6594_v58  ;;  %v4606_v22 = vand.u32 2147483648, %v6594_v58  ;;  %v4171_v23 = vpop.f32.mrf.mxu0  ;;  %4314 = vmatmul.mubr.msk.f32.gmra.mxu0 %vm165_vm0, %v151_v2 }
 0x103   :  { %vm6614_vm13 = vcmp.lt.f32.partialorder %v4593_v7, 8388608.0  ;;  %v4596_v20 = vcvt.s32.f32 %v4595_v8  ;;  %v4591_v24 = vor.u32 %v4590_v54, %v4589_v12  ;;  %v747_v26 = vadd.f32 %v6295_v39, %v746_v10  ;;  %4316 = vmatprep.mubr.msk.f32.mxu0 %vm165_vm0, %v152_v11 }
 0x104   :  { %vm6621_vm14 = vcmp.lt.f32.partialorder %v4601_v18, 8388608.0  ;;  %v762_v27 = vadd.f32 %v4171_v23, %v6295_v39  ;;  %v6631_v31 = vpop.eup %5596  ;;  %v4604_v35 = vcvt.s32.f32 %v4603_v15  ;;  %v1402_v37 = vmul.f32 %v6490_v49, %v6341_v63  ;;  %v756_v17 = vpop.f32.mrf.mxu0 }
 0x105   :  { %v4597_v34 = vand.u32 2147483647, %v4596_v20  ;;  %v6638_v42 = vsel %vm6588_vm12, %v4591_v24, %v1530_v41  ;;  %5608 = vtanh.f32 %v747_v26  ;;  %v757_v43 = vadd.f32 %v6295_v39, %v756_v17 }
 0x106   :  { %v1403_v46 = vmul.f32 %v6537_v21, %v6341_v63  ;;  %v6643_v47 = vpop.eup %5598  ;;  %4334 = vmatmul.mubr.msk.f32.gmra.mxu1 %vm1785_vm2, %v6638_v42  ;;  %v4605_v45 = vand.u32 2147483647, %v4604_v35  ;;  %5610 = vtanh.f32 %v762_v27  ;;  %v4609_v49 = vand.u32 2147483647, %v1533_v36  ;;  %v4174_v50 = vpop.f32.mrf.mxu0  ;;  %4317 = vmatmul.mubr.msk.f32.gmra.mxu0 %vm165_vm0, %v153_v29 }
 0x107   :  { %v4599_v48 = vor.u32 %v4598_v13, %v4597_v34  ;;  %v4611_v41 = vcvt.f32.s32 %v1533_v36  ;;  %v4614_v51 = vand.u32 2147483648, %v1533_v36  ;;  %v1534_v52 = vsub.f32 %v1402_v37, %v6349_v4 }
 0x108   :  { %5612 = vtanh.f32 %v757_v43  ;;  %v6649_v53 = vpop.eup %5600  ;;  %v4607_v54 = vor.u32 %v4606_v22, %v4605_v45  ;;  %vm6655_vm15 = vcmp.lt.f32.partialorder %v4609_v49, 8388608.0  ;;  %v772_v28 = vadd.f32 %v4174_v50, %v6295_v39  ;;  %v766_v57 = vpop.f32.mrf.mxu0 }
 0x109   :  { %v6653_v21 = vsel %vm6614_vm13, %v4599_v48, %v1531_v62  ;;  %v4612_v59 = vcvt.s32.f32 %v4611_v41  ;;  %v4617_v0 = vand.u32 2147483647, %v1534_v52  ;;  %v4619_v1 = vcvt.f32.s32 %v1534_v52 }
 0x10a   :  { %4336 = vmatprep.mubr.msk.f32.mxu1 %vm1785_vm2, %v6653_v21  ;;  %v4622_v2 = vand.u32 2147483648, %v1534_v52  ;;  %v6662_v7 = vpop.eup %5602  ;;  %v6667_v62 = vsel %vm6621_vm14, %v4607_v54, %v6594_v58  ;;  %5614 = vtanh.f32 %v772_v28  ;;  %v1535_v8 = vsub.f32 %v1403_v46, %v6349_v4  ;;  %v4177_v11 = vpop.f32.mrf.mxu0 }
 0x10b   :  { %v1404_v10 = vmul.f32 %v6517_v9, %v6341_v63  ;;  %4337 = vmatmul.mubr.msk.f32.gmra.mxu1 %vm1785_vm2, %v6667_v62  ;;  %v4613_v12 = vand.u32 2147483647, %v4612_v59  ;;  %vm6674_vm1 = vcmp.lt.f32.partialorder %v4617_v0, 8388608.0  ;;  %v4620_v18 = vcvt.s32.f32 %v4619_v1 }
 0x10c   :  { %v767_v14 = vadd.f32 %v6295_v39, %v766_v57  ;;  %v4625_v58 = vand.u32 2147483647, %v1535_v8  ;;  %v4627_v20 = vcvt.f32.s32 %v1535_v8  ;;  %v4630_v15 = vand.u32 2147483648, %v1535_v8  ;;  %v776_v23 = vpop.f32.mrf.mxu0 }
 0x10d   :  { %v1536_v22 = vsub.f32 %v1404_v10, %v6349_v4  ;;  %v6680_v24 = vpop.eup %5604  ;;  %v4615_v9 = vor.u32 %v4614_v51, %v4613_v12  ;;  %v4621_v25 = vand.u32 2147483647, %v4620_v18  ;;  %v782_v26 = vadd.f32 %v4177_v11, %v6295_v39 }
 0x10e   :  { %5616 = vtanh.f32 %v767_v14  ;;  %v6683_v27 = vpop.eup %5606  ;;  %vm6685_vm3 = vcmp.lt.f32.partialorder %v4625_v58, 8388608.0  ;;  %v4628_v34 = vcvt.s32.f32 %v4627_v20  ;;  %v4180_v17 = vpop.f32.mrf.mxu0  ;;  %v1405_v41 = vmul.f32 %v6568_v44, %v6341_v63 }
 0x10f   :  { %v4633_v35 = vand.u32 2147483647, %v1536_v22  ;;  %v4635_v37 = vcvt.f32.s32 %v1536_v22  ;;  %v6691_v43 = vsel %vm6655_vm15, %v4615_v9, %v1533_v36  ;;  %v4623_v46 = vor.u32 %v4622_v2, %v4621_v25 }
 0x110   :  { %v4638_v48 = vand.u32 2147483648, %v1536_v22  ;;  %5618 = vtanh.f32 %v782_v26  ;;  %4339 = vmatprep.mubr.msk.f32.mxu1 %vm1785_vm2, %v6691_v43  ;;  %v4629_v45 = vand.u32 2147483647, %v4628_v34  ;;  %v786_v51 = vpop.f32.mrf.mxu0  ;;  %v1406_v54 = vmul.f32 %v6547_v32, %v6341_v63 }
 0x111   :  { %vm6695_vm4 = vcmp.lt.f32.partialorder %v4633_v35, 8388608.0  ;;  %v4636_v50 = vcvt.s32.f32 %v4635_v37  ;;  %v6703_v36 = vsel %vm6674_vm1, %v4623_v46, %v1534_v52  ;;  %v777_v56 = vadd.f32 %v6295_v39, %v776_v23 }
 0x112   :  { %v792_v28 = vadd.f32 %v4180_v17, %v6295_v39  ;;  %v6709_v57 = vpop.eup %5608  ;;  %4340 = vmatmul.mubr.msk.f32.gmra.mxu1 %vm1785_vm2, %v6703_v36  ;;  %v4631_v59 = vor.u32 %v4630_v15, %v4629_v45  ;;  %v1537_v44 = vsub.f32 %v1405_v41, %v6349_v4  ;;  %v1407_v52 = vmul.f32 %v6600_v3, %v6341_v63  ;;  %v4183_v1 = vpop.f32.mrf.mxu0 }
 0x113   :  { %v4637_v0 = vand.u32 2147483647, %v4636_v50  ;;  %v6716_v2 = vpop.eup %5610  ;;  %v1538_v32 = vsub.f32 %v1406_v54, %v6349_v4  ;;  %5620 = vtanh.f32 %v777_v56  ;;  %v1408_v10 = vmul.f32 %v6576_v55, %v6341_v63 }
 0x114   :  { %v787_v11 = vadd.f32 %v6295_v39, %v786_v51  ;;  %v6726_v13 = vsel %vm6685_vm3, %v4631_v59, %v1535_v8  ;;  %v4641_v14 = vand.u32 2147483647, %v1537_v44  ;;  %v4643_v3 = vcvt.f32.s32 %v1537_v44  ;;  %v796_v58 = vpop.f32.mrf.mxu0 }
 0x115   :  { %v6722_v12 = vpop.eup %5612  ;;  %v4639_v18 = vor.u32 %v4638_v48, %v4637_v0  ;;  %4342 = vmatprep.mubr.msk.f32.mxu1 %vm1785_vm2, %v6726_v13  ;;  %v4646_v20 = vand.u32 2147483648, %v1537_v44  ;;  %v4649_v15 = vand.u32 2147483647, %v1538_v32  ;;  %v4651_v23 = vcvt.f32.s32 %v1538_v32 }
 0x116   :  { %v4654_v9 = vand.u32 2147483648, %v1538_v32  ;;  %vm6734_vm5 = vcmp.lt.f32.partialorder %v4641_v14, 8388608.0  ;;  %v4644_v8 = vcvt.s32.f32 %v4643_v3  ;;  %5622 = vtanh.f32 %v792_v28  ;;  %v4186_v26 = vpop.f32.mrf.mxu0 }
 0x117   :  { %v6732_v55 = vsel %vm6695_vm4, %v4639_v18, %v1536_v22  ;;  %v6738_v29 = vpop.eup %5614  ;;  %vm6742_vm6 = vcmp.lt.f32.partialorder %v4649_v15, 8388608.0  ;;  %v4652_v35 = vcvt.s32.f32 %v4651_v23  ;;  %v1539_v22 = vsub.f32 %v1407_v52, %v6349_v4 }
 0x118   :  { %4343 = vmatmul.mubr.msk.f32.gmra.mxu1 %vm1785_vm2, %v6732_v55  ;;  %v1540_v37 = vsub.f32 %v1408_v10, %v6349_v4  ;;  %v4645_v17 = vand.u32 2147483647, %v4644_v8  ;;  %5624 = vtanh.f32 %v787_v11  ;;  %v802_v46 = vadd.f32 %v4183_v1, %v6295_v39  ;;  %v806_v45 = vpop.f32.mrf.mxu0 }
 0x119   :  { %v1409_v48 = vmul.f32 %v6631_v31, %v6341_v63  ;;  %v4653_v49 = vand.u32 2147483647, %v4652_v35  ;;  %v4657_v50 = vand.u32 2147483647, %v1539_v22  ;;  %v4659_v41 = vcvt.f32.s32 %v1539_v22 }
 0x11a   :  { %v4662_v51 = vand.u32 2147483648, %v1539_v22  ;;  %v4647_v56 = vor.u32 %v4646_v20, %v4645_v17  ;;  %v4665_v28 = vand.u32 2147483647, %v1540_v37  ;;  %v4667_v59 = vcvt.f32.s32 %v1540_v37  ;;  %v4189_v52 = vpop.f32.mrf.mxu0 }
 0x11b   :  { %v6751_v54 = vpop.eup %5616  ;;  %v4670_v0 = vand.u32 2147483648, %v1540_v37  ;;  %v4655_v10 = vor.u32 %v4654_v9, %v4653_v49  ;;  %vm6753_vm7 = vcmp.lt.f32.partialorder %v4657_v50, 8388608.0  ;;  %v4660_v1 = vcvt.s32.f32 %v4659_v41 }
 0x11c   :  { %5626 = vtanh.f32 %v802_v46  ;;  %v6761_v18 = vsel %vm6734_vm5, %v4647_v56, %v1537_v44  ;;  %vm6763_vm8 = vcmp.lt.f32.partialorder %v4665_v28, 8388608.0  ;;  %v4668_v3 = vcvt.s32.f32 %v4667_v59  ;;  %v6768_v15 = vpop.f32.mrf.mxu0 }
 0x11d   :  { %v6757_v31 = vpop.eup %5618  ;;  %9944 = vst [vmem:[#allocation12_spill] sm:$0xff] %v6761_v18  ;;  %v1541_v20 = vsub.f32 %v1409_v48, %v6349_v4  ;;  %4345 = vmatprep.mubr.msk.f32.mxu1 %vm1785_vm2, %v6761_v18  ;;  %v6774_v23 = vsel %vm6742_vm6, %v4655_v10, %v1538_v32  ;;  %v4661_v9 = vand.u32 2147483647, %v4660_v1  ;;  %v1410_v44 = vmul.f32 %v6612_v19, %v6341_v63 }
 0x11e   :  { %9947 = vst [vmem:[#allocation13_spill] sm:$0xff] %v6774_v23  ;;  %v797_v25 = vadd.f32 %v6295_v39, %v796_v58  ;;  %4346 = vmatmul.mubr.msk.f32.gmra.mxu1 %vm1785_vm2, %v6774_v23  ;;  %v4669_v8 = vand.u32 2147483647, %v4668_v3  ;;  %v6781_v48 = vpop.f32.mrf.mxu0  ;;  %v812_v32 = vadd.f32 %v4186_v26, %v6295_v39  ;;  %v1411_v56 = vmul.f32 %v6649_v53, %v6341_v63 }
 0x11f   :  { %v4673_v35 = vand.u32 2147483647, %v1541_v20  ;;  %v4675_v17 = vcvt.f32.s32 %v1541_v20  ;;  %v4678_v46 = vand.u32 2147483648, %v1541_v20  ;;  %v4663_v49 = vor.u32 %v4662_v51, %v4661_v9 }
 0x120   :  { %v1542_v34 = vsub.f32 %v1410_v44, %v6349_v4  ;;  %5628 = vtanh.f32 %v797_v25  ;;  %v6785_v50 = vpop.eup %5620  ;;  %v4671_v19 = vor.u32 %v4670_v0, %v4669_v8  ;;  %v6793_v28 = vpop.f32.mrf.mxu0  ;;  %v1543_v53 = vsub.f32 %v1411_v56, %v6349_v4 }
 0x121   :  { %vm6787_vm9 = vcmp.lt.f32.partialorder %v4673_v35, 8388608.0  ;;  %v4676_v41 = vcvt.s32.f32 %v4675_v17  ;;  %v6797_v51 = vsel %vm6753_vm7, %v4663_v49, %v1539_v22  ;;  %5630 = vtanh.f32 %v812_v32 }
 0x122   :  { %9950 = vst [vmem:[#allocation14_spill] sm:$0xff] %v6797_v51  ;;  %v4681_v59 = vand.u32 2147483647, %v1542_v34  ;;  %v4683_v10 = vcvt.f32.s32 %v1542_v34  ;;  %v4686_v26 = vand.u32 2147483648, %v1542_v34  ;;  %4348 = vmatprep.mubr.msk.f32.mxu1 %vm1785_vm2, %v6797_v51  ;;  %v6803_v0 = vsel %vm6763_vm8, %v4671_v19, %v1540_v37  ;;  %v6806_v3 = vpop.f32.mrf.mxu0 }
 0x123   :  { %9951 = vst [vmem:[#allocation15_spill] sm:$0xff] %v6803_v0  ;;  %v4677_v1 = vand.u32 2147483647, %v4676_v41  ;;  %v6808_v9 = vpop.eup %5622  ;;  %4349 = vmatmul.mubr.msk.f32.gmra.mxu1 %vm1785_vm2, %v6803_v0  ;;  %v1412_v37 = vmul.f32 %v6643_v47, %v6341_v63  ;;  %v807_v14 = vadd.f32 %v6295_v39, %v806_v45  ;;  %v4689_v25 = vand.u32 2147483647, %v1543_v53 }
 0x124   :  { %vm6812_vm10 = vcmp.lt.f32.partialorder %v4681_v59, 8388608.0  ;;  %v4684_v11 = vcvt.s32.f32 %v4683_v10  ;;  %v4691_v8 = vcvt.f32.s32 %v1543_v53  ;;  %v4694_v35 = vand.u32 2147483648, %v1543_v53  ;;  %v6819_v17 = vpop.f32.mrf.mxu0 }
 0x125   :  { %v4679_v44 = vor.u32 %v4678_v46, %v4677_v1  ;;  %v6821_v49 = vpop.eup %5624  ;;  %v1544_v19 = vsub.f32 %v1412_v37, %v6349_v4  ;;  %5632 = vtanh.f32 %v807_v14  ;;  %v822_v41 = vadd.f32 %v4189_v52, %v6295_v39 }
 0x126   :  { %v4685_v32 = vand.u32 2147483647, %v4684_v11  ;;  %vm6829_vm11 = vcmp.lt.f32.partialorder %v4689_v25, 8388608.0  ;;  %v4692_v45 = vcvt.s32.f32 %v4691_v8  ;;  %v1413_v46 = vmul.f32 %v6680_v24, %v6341_v63  ;;  %v6835_v59 = vpop.f32.mrf.mxu0 }
 0x127   :  { %v6827_v56 = vsel %vm6787_vm9, %v4679_v44, %v1541_v20  ;;  %v4697_v1 = vand.u32 2147483647, %v1544_v19  ;;  %v4699_v52 = vcvt.f32.s32 %v1544_v19  ;;  %v4702_v11 = vand.u32 2147483648, %v1544_v19 }
 0x128   :  { %9954 = vst [vmem:[#allocation16_spill] sm:$0xff] %v6827_v56  ;;  %4351 = vmatprep.mubr.msk.f32.mxu1 %vm1785_vm2, %v6827_v56  ;;  %v4687_v10 = vor.u32 %v4686_v26, %v4685_v32  ;;  %v4693_v20 = vand.u32 2147483647, %v4692_v45  ;;  %5634 = vtanh.f32 %v822_v41  ;;  %v1545_v37 = vsub.f32 %v1413_v46, %v6349_v4  ;;  %v6844_v44 = vpop.f32.mrf.mxu0 }
 0x129   :  { %v6839_v58 = vpop.eup %5626  ;;  %v1414_v14 = vmul.f32 %v6662_v7, %v6341_v63  ;;  %vm6850_vm12 = vcmp.lt.f32.partialorder %v4697_v1, 8388608.0  ;;  %v4700_v25 = vcvt.s32.f32 %v4699_v52  ;;  %v817_v8 = vadd.f32 %v6295_v39, %v6768_v15 }
 0x12a   :  { %v6848_v24 = vsel %vm6812_vm10, %v4687_v10, %v1542_v34  ;;  %v4695_v32 = vor.u32 %v4694_v35, %v4693_v20  ;;  %v4705_v41 = vand.u32 2147483647, %v1545_v37  ;;  %v4707_v7 = vcvt.f32.s32 %v1545_v37  ;;  %v6858_v46 = vpop.f32.mrf.mxu0 }
 0x12b   :  { %9957 = vst [vmem:[#allocation17_spill] sm:$0xff] %v6848_v24  ;;  %4352 = vmatmul.mubr.msk.f32.gmra.mxu1 %vm1785_vm2, %v6848_v24  ;;  %v4710_v45 = vand.u32 2147483648, %v1545_v37  ;;  %v4701_v22 = vand.u32 2147483647, %v4700_v25  ;;  %v1546_v34 = vsub.f32 %v1414_v14, %v6349_v4  ;;  %5636 = vtanh.f32 %v817_v8 }
 0x12c   :  { %v832_v10 = vadd.f32 %v6781_v48, %v6295_v39  ;;  %v6867_v15 = vsel %vm6829_vm11, %v4695_v32, %v1543_v53  ;;  %vm6869_vm13 = vcmp.lt.f32.partialorder %v4705_v41, 8388608.0  ;;  %v4708_v52 = vcvt.s32.f32 %v4707_v7  ;;  %v6875_v25 = vpop.f32.mrf.mxu0 }
 0x12d   :  { %v6863_v1 = vpop.eup %5628  ;;  %v1415_v20 = vmul.f32 %v6709_v57, %v6341_v63  ;;  %4354 = vmatprep.mubr.msk.f32.mxu1 %vm1785_vm2, %v6867_v15  ;;  %v4703_v39 = vor.u32 %v4702_v11, %v4701_v22  ;;  %v4713_v48 = vand.u32 2147483647, %v1546_v34  ;;  %v4715_v14 = vcvt.f32.s32 %v1546_v34 }
 0x12e   :  { %v4718_v8 = vand.u32 2147483648, %v1546_v34  ;;  %v4709_v47 = vand.u32 2147483647, %v4708_v52  ;;  %5638 = vtanh.f32 %v832_v10  ;;  %v1416_v32 = vmul.f32 %v6683_v27, %v6341_v63  ;;  %v6882_v41 = vpop.f32.mrf.mxu0  ;;  %v6884_v7 = vpop.eup %5630  ;;  %v6897_v10 = vld [vmem:[%s9818_s2] ss:$0 sm:$0xff] }
 0x12f   :  { %v1547_v53 = vsub.f32 %v1415_v20, %v6349_v4  ;;  %v6888_v57 = vsel %vm6850_vm12, %v4703_v39, %v1544_v19  ;;  %vm6890_vm14 = vcmp.lt.f32.partialorder %v4713_v48, 8388608.0  ;;  %v4716_v22 = vcvt.s32.f32 %v4715_v14 }
 0x130   :  { %v827_v27 = vadd.f32 %v6897_v10, %v6793_v28  ;;  %4355 = vmatmul.mubr.msk.f32.gmra.mxu1 %vm1785_vm2, %v6888_v57  ;;  %v4711_v52 = vor.u32 %v4710_v45, %v4709_v47  ;;  %v6903_v39 = vpop.f32.mrf.mxu0  ;;  %v1548_v14 = vsub.f32 %v1416_v32, %v6349_v4  ;;  %v842_v5 = vadd.f32 %v6897_v10, %v6806_v3 }
 0x131   :  { %v4721_v26 = vand.u32 2147483647, %v1547_v53  ;;  %v4723_v19 = vcvt.f32.s32 %v1547_v53  ;;  %v4726_v20 = vand.u32 2147483648, %v1547_v53  ;;  %v4717_v48 = vand.u32 2147483647, %v4716_v22 }
 0x132   :  { %5640 = vtanh.f32 %v827_v27  ;;  %v6908_v18 = vpop.eup %5632  ;;  %v6912_v28 = vsel %vm6869_vm13, %v4711_v52, %v1545_v37  ;;  %v1417_v22 = vmul.f32 %v6722_v12, %v6341_v63  ;;  %v6920_v61 = vpop.f32.mrf.mxu0  ;;  %v4729_v32 = vand.u32 2147483647, %v1548_v14 }
 0x133   :  { %vm6914_vm15 = vcmp.lt.f32.partialorder %v4721_v26, 8388608.0  ;;  %v4724_v47 = vcvt.s32.f32 %v4723_v19  ;;  %4357 = vmatprep.mubr.msk.f32.mxu1 %vm1785_vm2, %v6912_v28  ;;  %v4719_v3 = vor.u32 %v4718_v8, %v4717_v48  ;;  %v4731_v27 = vcvt.f32.s32 %v1548_v14 }
 0x134   :  { %v4734_v23 = vand.u32 2147483648, %v1548_v14  ;;  %5642 = vtanh.f32 %v842_v5  ;;  %v1549_v37 = vsub.f32 %v1417_v22, %v6349_v4  ;;  %v1418_v52 = vmul.f32 %v6716_v2, %v6341_v63  ;;  %v6927_v26 = vpop.f32.mrf.mxu0 }
 0x135   :  { %v4725_v35 = vand.u32 2147483647, %v4724_v47  ;;  %v6929_v19 = vpop.eup %5634  ;;  %v6933_v12 = vsel %vm6890_vm14, %v4719_v3, %v1546_v34  ;;  %vm6935_vm1 = vcmp.lt.f32.partialorder %v4729_v32, 8388608.0  ;;  %v4732_v48 = vcvt.s32.f32 %v4731_v27  ;;  %v6948_v34 = vld [vmem:[%s9821_s5 + $0x9] ss:$0 sm:$0xff] }
 0x136   :  { %v837_v5 = vadd.f32 %v6897_v10, %v6819_v17  ;;  %4358 = vmatmul.mubr.msk.f32.gmra.mxu1 %vm1785_vm2, %v6933_v12  ;;  %v4737_v4 = vand.u32 2147483647, %v1549_v37  ;;  %v4739_v2 = vcvt.f32.s32 %v1549_v37  ;;  %v4742_v47 = vand.u32 2147483648, %v1549_v37  ;;  %v6943_v22 = vpop.f32.mrf.mxu0  ;;  %v6954_v17 = vld [vmem:[%s9821_s5 + $0x8] ss:$0 sm:$0xff] }
 0x137   :  { %v4727_v63 = vor.u32 %v4726_v20, %v4725_v35  ;;  %v4733_v11 = vand.u32 2147483647, %v4732_v48  ;;  %v1550_v3 = vsub.f32 %v1418_v52, %v6948_v34  ;;  %v1420_v20 = vmul.f32 %v6954_v17, %v6738_v29 }
 0x138   :  { %5644 = vtanh.f32 %v837_v5  ;;  %v6958_v32 = vpop.eup %5636  ;;  %vm6964_vm3 = vcmp.lt.f32.partialorder %v4737_v4, 8388608.0  ;;  %v4740_v52 = vcvt.s32.f32 %v4739_v2  ;;  %v852_v48 = vadd.f32 %v6897_v10, %v6835_v59  ;;  %v6970_v5 = vpop.f32.mrf.mxu0 }
 0x139   :  { %v6962_v27 = vsel %vm6914_vm15, %v4727_v63, %v1547_v53  ;;  %v4735_v29 = vor.u32 %v4734_v23, %v4733_v11  ;;  %v4745_v30 = vand.u32 2147483647, %v1550_v3  ;;  %v4747_v51 = vcvt.f32.s32 %v1550_v3 }
 0x13a   :  { %4360 = vmatprep.mubr.msk.f32.mxu1 %vm1785_vm2, %v6962_v27  ;;  %v4750_v40 = vand.u32 2147483648, %v1550_v3  ;;  %v4741_v45 = vand.u32 2147483647, %v4740_v52  ;;  %v1552_v53 = vsub.f32 %v1420_v20, %v6948_v34  ;;  %5646 = vtanh.f32 %v852_v48  ;;  %v6977_v4 = vpop.f32.mrf.mxu0 }
 0x13b   :  { %v1419_v63 = vmul.f32 %v6954_v17, %v6751_v54  ;;  %v6979_v2 = vpop.eup %5638  ;;  %v6983_v59 = vsel %vm6935_vm1, %v4735_v29, %v1548_v14  ;;  %vm6985_vm4 = vcmp.lt.f32.partialorder %v4745_v30, 8388608.0  ;;  %v4748_v11 = vcvt.s32.f32 %v4747_v51 }
 0x13c   :  { %v847_v20 = vadd.f32 %v6897_v10, %v6844_v44  ;;  %4361 = vmatmul.mubr.msk.f32.gmra.mxu1 %vm1785_vm2, %v6983_v59  ;;  %v4743_v54 = vor.u32 %v4742_v47, %v4741_v45  ;;  %v4761_v52 = vand.u32 2147483647, %v1552_v53  ;;  %v4763_v48 = vcvt.f32.s32 %v1552_v53  ;;  %v6993_v60 = vpop.f32.mrf.mxu0 }
 0x13d   :  { %v4766_v0 = vand.u32 2147483648, %v1552_v53  ;;  %v4749_v8 = vand.u32 2147483647, %v4748_v11  ;;  %v1551_v14 = vsub.f32 %v1419_v63, %v6948_v34  ;;  %v862_v30 = vadd.f32 %v6897_v10, %v6858_v46 }
 0x13e   :  { %5648 = vtanh.f32 %v847_v20  ;;  %v7002_v44 = vsel %vm6964_vm3, %v4743_v54, %v1549_v37  ;;  %vm7004_vm5 = vcmp.lt.f32.partialorder %v4761_v52, 8388608.0  ;;  %v4764_v29 = vcvt.s32.f32 %v4763_v48  ;;  %v7010_v11 = vpop.f32.mrf.mxu0 }
 0x13f   :  { %v6998_v51 = vpop.eup %5640  ;;  %v1421_v45 = vmul.f32 %v6954_v17, %v6785_v50  ;;  %4363 = vmatprep.mubr.msk.f32.mxu1 %vm1785_vm2, %v7002_v44  ;;  %v4751_v46 = vor.u32 %v4750_v40, %v4749_v8  ;;  %v4753_v63 = vand.u32 2147483647, %v1551_v14  ;;  %v4755_v20 = vcvt.f32.s32 %v1551_v14 }
 0x140   :  { %v4758_v56 = vand.u32 2147483648, %v1551_v14  ;;  %v4765_v35 = vand.u32 2147483647, %v4764_v29  ;;  %5650 = vtanh.f32 %v862_v30  ;;  %v1422_v54 = vmul.f32 %v6954_v17, %v6757_v31  ;;  %v7017_v52 = vpop.f32.mrf.mxu0 }
 0x141   :  { %v1553_v37 = vsub.f32 %v1421_v45, %v6948_v34  ;;  %v7019_v48 = vpop.eup %5642  ;;  %v4752_v50 = vsel %vm6985_vm4, %v4751_v46, %v1550_v3  ;;  %vm7023_vm6 = vcmp.lt.f32.partialorder %v4753_v63, 8388608.0  ;;  %v4756_v40 = vcvt.s32.f32 %v4755_v20 }
 0x142   :  { %v857_v8 = vadd.f32 %v6897_v10, %v6875_v25  ;;  %4364 = vmatmul.mubr.msk.f32.gmra.mxu1 %vm1785_vm2, %v4752_v50  ;;  %v4767_v30 = vor.u32 %v4766_v0, %v4765_v35  ;;  %v7030_v24 = vpop.f32.mrf.mxu0  ;;  %v1554_v23 = vsub.f32 %v1422_v54, %v6948_v34  ;;  %v872_v3 = vadd.f32 %v6897_v10, %v6882_v41 }
 0x143   :  { %v4769_v29 = vand.u32 2147483647, %v1553_v37  ;;  %v4771_v31 = vcvt.f32.s32 %v1553_v37  ;;  %v4774_v45 = vand.u32 2147483648, %v1553_v37  ;;  %v4757_v33 = vand.u32 2147483647, %v4756_v40 }
 0x144   :  { %5652 = vtanh.f32 %v857_v8  ;;  %v4768_v25 = vsel %vm7004_vm5, %v4767_v30, %v1552_v53  ;;  %v1423_v20 = vmul.f32 %v6954_v17, %v6821_v49  ;;  %v7045_v35 = vpop.f32.mrf.mxu0  ;;  %v4777_v40 = vand.u32 2147483647, %v1554_v23 }
 0x145   :  { %v7035_v46 = vpop.eup %5644  ;;  %vm7039_vm7 = vcmp.lt.f32.partialorder %v4769_v29, 8388608.0  ;;  %v4772_v0 = vcvt.s32.f32 %v4771_v31  ;;  %3983 = vmatprep.subr.msk.mxu1 %vm1785_vm2, %v4768_v25  ;;  %v4759_v54 = vor.u32 %v4758_v56, %v4757_v33  ;;  %v4779_v41 = vcvt.f32.s32 %v1554_v23 }
 0x146   :  { %v4782_v8 = vand.u32 2147483648, %v1554_v23  ;;  %3984 = vmatpush3.xpose.msk.msra.mxu1 %vm1785_vm2, %v6732_v55  ;;  %5654 = vtanh.f32 %v872_v3  ;;  %v1555_v47 = vsub.f32 %v1423_v20, %v6948_v34  ;;  %v1424_v30 = vmul.f32 %v6954_v17, %v6808_v9  ;;  %v7053_v29 = vpop.f32.mrf.mxu0 }
 0x147   :  { %v4773_v53 = vand.u32 2147483647, %v4772_v0  ;;  %v7055_v49 = vpop.eup %5646  ;;  %v4760_v33 = vsel %vm7023_vm6, %v4759_v54, %v1551_v14  ;;  %vm7059_vm8 = vcmp.lt.f32.partialorder %v4777_v40, 8388608.0  ;;  %v4780_v31 = vcvt.s32.f32 %v4779_v41 }
 0x148   :  { %9978 = vst [vmem:[#allocation18_spill] sm:$0xff] %v7055_v49  ;;  %v867_v55 = vadd.f32 %v6897_v10, %v6903_v39  ;;  %4366 = vmatprep.mubr.msk.f32.mxu1 %vm1785_vm2, %v4760_v33  ;;  %3985 = vmatprep.subr.msk.mxu1 %vm1785_vm2, %v4760_v33  ;;  %v4785_v3 = vand.u32 2147483647, %v1555_v47  ;;  %v4787_v0 = vcvt.f32.s32 %v1555_v47  ;;  %v4790_v20 = vand.u32 2147483648, %v1555_v47  ;;  %v7067_v49 = vpop.f32.mrf.mxu0 }
 0x149   :  { %v4775_v9 = vor.u32 %v4774_v45, %v4773_v53  ;;  %4367 = vmatmul.mubr.msk.f32.gmra.mxu1 %vm1785_vm2, %v4768_v25  ;;  %v4781_v16 = vand.u32 2147483647, %v4780_v31  ;;  %v1556_v14 = vsub.f32 %v1424_v30, %v6948_v34  ;;  %v882_v54 = vadd.f32 %v6897_v10, %v6920_v61 }
 0x14a   :  { %5656 = vtanh.f32 %v867_v55  ;;  %3986 = vmatpush3.xpose.msk.msra.mxu1 %vm1785_vm2, %v6726_v13  ;;  %vm7081_vm9 = vcmp.lt.f32.partialorder %v4785_v3, 8388608.0  ;;  %v4788_v25 = vcvt.s32.f32 %v4787_v0  ;;  %v1425_v41 = vmul.f32 %v6954_v17, %v6863_v1  ;;  %v7087_v53 = vpop.f32.mrf.mxu0 }
 0x14b   :  { %v7073_v39 = vpop.eup %5648  ;;  %v7079_v45 = vsel %vm7039_vm7, %v4775_v9, %v1553_v37  ;;  %3987 = vmatprep.subr.msk.mxu1 %vm1785_vm2, %v4752_v50  ;;  %v4783_v61 = vor.u32 %v4782_v8, %v4781_v16  ;;  %v4793_v13 = vand.u32 2147483647, %v1556_v14  ;;  %v4795_v63 = vcvt.f32.s32 %v1556_v14 }
 0x14c   :  { %9981 = vst [vmem:[#allocation19_spill] sm:$0xff] %v7079_v45  ;;  %4369 = vmatprep.mubr.msk.f32.mxu1 %vm1785_vm2, %v7079_v45  ;;  %v4798_v37 = vand.u32 2147483648, %v1556_v14  ;;  %v4789_v30 = vand.u32 2147483647, %v4788_v25  ;;  %5658 = vtanh.f32 %v882_v54  ;;  %v1557_v33 = vsub.f32 %v1425_v41, %v6948_v34  ;;  %v7095_v55 = vpop.f32.mrf.mxu0 }
 0x14d   :  { %v1426_v31 = vmul.f32 %v6954_v17, %v6839_v58  ;;  %v7097_v1 = vpop.eup %5650  ;;  %v7101_v9 = vsel %vm7059_vm8, %v4783_v61, %v1554_v23  ;;  %vm7103_vm10 = vcmp.lt.f32.partialorder %v4793_v13, 8388608.0  ;;  %v4796_v8 = vcvt.s32.f32 %v4795_v63 }
 0x14e   :  { %9984 = vst [vmem:[#allocation20_spill] sm:$0xff] %v7101_v9  ;;  %v877_v3 = vadd.f32 %v6897_v10, %v6927_v26  ;;  %4370 = vmatmul.mubr.msk.f32.gmra.mxu1 %vm1785_vm2, %v7101_v9  ;;  %v4791_v58 = vor.u32 %v4790_v20, %v4789_v30  ;;  %v4801_v0 = vand.u32 2147483647, %v1557_v33  ;;  %v4803_v16 = vcvt.f32.s32 %v1557_v33  ;;  %v7111_v25 = vpop.f32.mrf.mxu0 }
 0x14f   :  { %v4806_v54 = vand.u32 2147483648, %v1557_v33  ;;  %3988 = vmatpush3.xpose.msk.msra.mxu1 %vm1785_vm2, %v6703_v36  ;;  %v4797_v23 = vand.u32 2147483647, %v4796_v8  ;;  %v1558_v56 = vsub.f32 %v1426_v31, %v6948_v34  ;;  %v892_v41 = vadd.f32 %v6897_v10, %v6943_v22 }
 0x150   :  { %5660 = vtanh.f32 %v877_v3  ;;  %v7122_v20 = vsel %vm7081_vm9, %v4791_v58, %v1555_v47  ;;  %3989 = vmatprep.subr.msk.mxu1 %vm1785_vm2, %v7002_v44  ;;  %vm7126_vm11 = vcmp.lt.f32.partialorder %v4801_v0, 8388608.0  ;;  %v4804_v36 = vcvt.s32.f32 %v4803_v16  ;;  %v7132_v63 = vpop.f32.mrf.mxu0 }
 0x151   :  { %v7118_v26 = vpop.eup %5652  ;;  %9987 = vst [vmem:[#allocation21_spill] sm:$0xff] %v7122_v20  ;;  %v1427_v13 = vmul.f32 %v6954_v17, %v6908_v18  ;;  %4372 = vmatprep.mubr.msk.f32.mxu1 %vm1785_vm2, %v7122_v20  ;;  %v4799_v22 = vor.u32 %v4798_v37, %v4797_v23  ;;  %v4809_v40 = vand.u32 2147483647, %v1558_v56  ;;  %v4811_v47 = vcvt.f32.s32 %v1558_v56  ;;  %v10032_v20 = vld [vmem:[#allocation7_spill] sm:$0xff] }
 0x152   :  { %v4814_v30 = vand.u32 2147483648, %v1558_v56  ;;  %v4805_v31 = vand.u32 2147483647, %v4804_v36  ;;  %5662 = vtanh.f32 %v892_v41  ;;  %v1428_v8 = vmul.f32 %v6954_v17, %v6884_v7  ;;  %v7139_v3 = vpop.f32.mrf.mxu0 }
 0x153   :  { %v1559_v44 = vsub.f32 %v1427_v13, %v6948_v34  ;;  %v7141_v58 = vpop.eup %5654  ;;  %v7145_v18 = vsel %vm7103_vm10, %v4799_v22, %v1556_v14  ;;  %3990 = vmatpush3.xpose.msk.msra.mxu1 %vm1785_vm2, %v6691_v43  ;;  %vm7149_vm12 = vcmp.lt.f32.partialorder %v4809_v40, 8388608.0  ;;  %v4812_v0 = vcvt.s32.f32 %v4811_v47 }
 0x154   :  { %9990 = vst [vmem:[#allocation22_spill] sm:$0xff] %v7145_v18  ;;  %v887_v16 = vadd.f32 %v6897_v10, %v6970_v5  ;;  %4373 = vmatmul.mubr.msk.f32.gmra.mxu1 %vm1785_vm2, %v7145_v18  ;;  %v4807_v7 = vor.u32 %v4806_v54, %v4805_v31  ;;  %3991 = vmatprep.subr.msk.mxu1 %vm1785_vm2, %v6983_v59  ;;  %v7159_v41 = vpop.f32.mrf.mxu0 }
 0x155   :  { %v4817_v14 = vand.u32 2147483647, %v1559_v44  ;;  %v4819_v50 = vcvt.f32.s32 %v1559_v44  ;;  %v4822_v23 = vand.u32 2147483648, %v1559_v44  ;;  %v4813_v43 = vand.u32 2147483647, %v4812_v0 }
 0x156   :  { %v1560_v36 = vsub.f32 %v1428_v8, %v6948_v34  ;;  %5664 = vtanh.f32 %v887_v16  ;;  %v902_v13 = vadd.f32 %v6897_v10, %v6977_v4  ;;  %v7168_v54 = vsel %vm7126_vm11, %v4807_v7, %v1557_v33  ;;  %v7176_v47 = vpop.f32.mrf.mxu0 }
 0x157   :  { %v7164_v5 = vpop.eup %5656  ;;  %9993 = vst [vmem:[#allocation23_spill] sm:$0xff] %v7168_v54  ;;  %vm7170_vm13 = vcmp.lt.f32.partialorder %v4817_v14, 8388608.0  ;;  %v4820_v22 = vcvt.s32.f32 %v4819_v50  ;;  %v1429_v40 = vmul.f32 %v6954_v17, %v6958_v32  ;;  %4375 = vmatprep.mubr.msk.f32.mxu1 %vm1785_vm2, %v7168_v54  ;;  %v4815_v4 = vor.u32 %v4814_v30, %v4813_v43  ;;  %3992 = vmatpush3.xpose.msk.msra.mxu1 %vm1785_vm2, %v6667_v62 }
 0x158   :  { %v4825_v61 = vand.u32 2147483647, %v1560_v36  ;;  %v4827_v33 = vcvt.f32.s32 %v1560_v36  ;;  %v4830_v31 = vand.u32 2147483648, %v1560_v36  ;;  %3993 = vmatprep.subr.msk.mxu1 %vm1785_vm2, %v6962_v27  ;;  %5666 = vtanh.f32 %v902_v13  ;;  %v7187_v16 = vpop.f32.mrf.mxu0 }
 0x159   :  { %v4821_v8 = vand.u32 2147483647, %v4820_v22  ;;  %v1561_v0 = vsub.f32 %v1429_v40, %v6948_v34  ;;  %v1430_v32 = vmul.f32 %v6954_v17, %v6929_v19  ;;  %v7189_v7 = vpop.eup %5658  ;;  %v7193_v62 = vsel %vm7149_vm12, %v4815_v4, %v1558_v56 }
 0x15a   :  { %9996 = vst [vmem:[#allocation24_spill] sm:$0xff] %v7193_v62  ;;  %vm7195_vm14 = vcmp.lt.f32.partialorder %v4825_v61, 8388608.0  ;;  %v4828_v14 = vcvt.s32.f32 %v4827_v33  ;;  %v897_v27 = vadd.f32 %v6897_v10, %v6993_v60  ;;  %4376 = vmatmul.mubr.msk.f32.gmra.mxu1 %vm1785_vm2, %v7193_v62  ;;  %v7203_v22 = vpop.f32.mrf.mxu0  ;;  %v912_v40 = vadd.f32 %v6897_v10, %v7010_v11 }
 0x15b   :  { %v4823_v19 = vor.u32 %v4822_v23, %v4821_v8  ;;  %v4833_v50 = vand.u32 2147483647, %v1561_v0  ;;  %v4835_v43 = vcvt.f32.s32 %v1561_v0  ;;  %v4838_v13 = vand.u32 2147483648, %v1561_v0  ;;  %3994 = vmatpush3.xpose.msk.msra.mxu1 %vm1785_vm2, %v6653_v21 }
 0x15c   :  { %v4829_v37 = vand.u32 2147483647, %v4828_v14  ;;  %v1562_v56 = vsub.f32 %v1430_v32, %v6948_v34  ;;  %5668 = vtanh.f32 %v897_v27  ;;  %3995 = vmatprep.subr.msk.mxu1 %vm1785_vm2, %v6933_v12  ;;  %v1431_v21 = vmul.f32 %v6954_v17, %v6998_v51  ;;  %v7224_v33 = vpop.f32.mrf.mxu0 }
 0x15d   :  { %v7210_v60 = vpop.eup %5660  ;;  %v7214_v23 = vsel %vm7170_vm13, %v4823_v19, %v1559_v44  ;;  %vm7216_vm15 = vcmp.lt.f32.partialorder %v4833_v50, 8388608.0  ;;  %v4836_v61 = vcvt.s32.f32 %v4835_v43  ;;  %5670 = vtanh.f32 %v912_v40 }
 0x15e   :  { %9999 = vst [vmem:[#allocation25_spill] sm:$0xff] %v7214_v23  ;;  %4378 = vmatprep.mubr.msk.f32.mxu1 %vm1785_vm2, %v7214_v23  ;;  %v4831_v11 = vor.u32 %v4830_v31, %v4829_v37  ;;  %v4841_v59 = vand.u32 2147483647, %v1562_v56  ;;  %v4843_v44 = vcvt.f32.s32 %v1562_v56  ;;  %v4846_v8 = vand.u32 2147483648, %v1562_v56  ;;  %v7231_v12 = vpop.f32.mrf.mxu0 }
 0x15f   :  { %v4837_v32 = vand.u32 2147483647, %v4836_v61  ;;  %v1563_v14 = vsub.f32 %v1431_v21, %v6948_v34  ;;  %v1432_v27 = vmul.f32 %v6954_v17, %v6979_v2  ;;  %v7233_v19 = vpop.eup %5662  ;;  %3996 = vmatpush3.xpose.msk.msra.mxu1 %vm1785_vm2, %v6638_v42  ;;  %v907_v43 = vadd.f32 %v6897_v10, %v7017_v52 }
 0x160   :  { %v7237_v51 = vsel %vm7195_vm14, %v4831_v11, %v1560_v36  ;;  %vm7239_vm1 = vcmp.lt.f32.partialorder %v4841_v59, 8388608.0  ;;  %v4844_v50 = vcvt.s32.f32 %v4843_v44  ;;  %3997 = vmatprep.subr.msk.mxu1 %vm1785_vm2, %v6912_v28  ;;  %v7251_v36 = vpop.f32.mrf.mxu0  ;;  %v922_v42 = vadd.f32 %v6897_v10, %v7030_v24 }
 0x161   :  { %4379 = vmatmul.mubr.msk.f32.gmra.mxu1 %vm1785_vm2, %v7237_v51  ;;  %v4839_v2 = vor.u32 %v4838_v13, %v4837_v32  ;;  %v4849_v37 = vand.u32 2147483647, %v1563_v14  ;;  %v4851_v40 = vcvt.f32.s32 %v1563_v14  ;;  %v4854_v30 = vand.u32 2147483648, %v1563_v14 }
 0x162   :  { %v4845_v61 = vand.u32 2147483647, %v4844_v50  ;;  %v1564_v21 = vsub.f32 %v1432_v27, %v6948_v34  ;;  %5672 = vtanh.f32 %v907_v43  ;;  %v1433_v59 = vmul.f32 %v6954_v17, %v7035_v46  ;;  %v7268_v44 = vpop.f32.mrf.mxu0 }
 0x163   :  { %v7256_v52 = vpop.eup %5664  ;;  %v7260_v13 = vsel %vm7216_vm15, %v4839_v2, %v1561_v0  ;;  %vm7262_vm3 = vcmp.lt.f32.partialorder %v4849_v37, 8388608.0  ;;  %v4852_v28 = vcvt.s32.f32 %v4851_v40  ;;  %3998 = vmatpush3.xpose.msk.msra.mxu1 %vm1785_vm2, %v6604_v6  ;;  %5674 = vtanh.f32 %v922_v42 }
 0x164   :  { %4381 = vmatprep.mubr.msk.f32.mxu1 %vm1785_vm2, %v7260_v13  ;;  %v4847_v24 = vor.u32 %v4846_v8, %v4845_v61  ;;  %v4857_v32 = vand.u32 2147483647, %v1564_v21  ;;  %v4859_v27 = vcvt.f32.s32 %v1564_v21  ;;  %v4862_v50 = vand.u32 2147483648, %v1564_v21  ;;  %3999 = vmatprep.subr.msk.mxu1 %vm1785_vm2, %v6888_v57  ;;  %v7279_v43 = vpop.f32.mrf.mxu0 }
 0x165   :  { %v4853_v0 = vand.u32 2147483647, %v4852_v28  ;;  %v1565_v4 = vsub.f32 %v1433_v59, %v6948_v34  ;;  %v1434_v46 = vmul.f32 %v6954_v17, %v7019_v48  ;;  %v7281_v2 = vpop.eup %5666  ;;  %v917_v40 = vadd.f32 %v6897_v10, %v7045_v35 }
 0x166   :  { %v7285_v8 = vsel %vm7239_vm1, %v4847_v24, %v1562_v56  ;;  %vm7287_vm4 = vcmp.lt.f32.partialorder %v4857_v32, 8388608.0  ;;  %v4860_v37 = vcvt.s32.f32 %v4859_v27  ;;  %v932_v56 = vadd.f32 %v6897_v10, %v7053_v29 }
 0x167   :  { %4382 = vmatmul.mubr.msk.f32.gmra.mxu1 %vm1785_vm2, %v7285_v8  ;;  %v4855_v57 = vor.u32 %v4854_v30, %v4853_v0  ;;  %v4865_v48 = vand.u32 2147483647, %v1565_v4  ;;  %v4867_v61 = vcvt.f32.s32 %v1565_v4  ;;  %v4870_v42 = vand.u32 2147483648, %v1565_v4 }
 0x168   :  { %v4861_v28 = vand.u32 2147483647, %v4860_v37  ;;  %v1566_v31 = vsub.f32 %v1434_v46, %v6948_v34  ;;  %5676 = vtanh.f32 %v917_v40  ;;  %4000 = vmatpush3.xpose.msk.msra.mxu1 %vm1785_vm2, %v6581_v38  ;;  %v1435_v32 = vmul.f32 %v6954_v17, %v7073_v39  ;;  %v7314_v38 = vpop.f32.mrf.mxu0  ;;  %v10010_v37 = vld [vmem:[#allocation18_spill] sm:$0xff] }
 0x169   :  { %v7300_v59 = vpop.eup %5668  ;;  %v7304_v35 = vsel %vm7262_vm3, %v4855_v57, %v1563_v14  ;;  %vm7306_vm5 = vcmp.lt.f32.partialorder %v4865_v48, 8388608.0  ;;  %v4868_v24 = vcvt.s32.f32 %v4867_v61  ;;  %4001 = vmatprep.subr.msk.mxu1 %vm1785_vm2, %v6867_v15  ;;  %5678 = vtanh.f32 %v932_v56  ;;  %v10013_v61 = vld [vmem:[#allocation11_spill] sm:$0xff] }
 0x16a   :  { %4384 = vmatprep.mubr.msk.f32.mxu1 %vm1785_vm2, %v7304_v35  ;;  %v4863_v29 = vor.u32 %v4862_v50, %v4861_v28  ;;  %v4873_v11 = vand.u32 2147483647, %v1566_v31  ;;  %v4875_v14 = vcvt.f32.s32 %v1566_v31  ;;  %v4878_v27 = vand.u32 2147483648, %v1566_v31  ;;  %v7321_v39 = vpop.eup %5670 }
 0x16b   :  { %v4869_v0 = vand.u32 2147483647, %v4868_v24  ;;  %v1567_v46 = vsub.f32 %v1435_v32, %v6948_v34  ;;  %v1436_v40 = vmul.f32 %v6954_v17, %v10010_v37  ;;  %v927_v48 = vadd.f32 %v6897_v10, %v7067_v49  ;;  %v7339_v32 = vpop.f32.mrf.mxu0 }
 0x16c   :  { %v7325_v15 = vsel %vm7287_vm4, %v4863_v29, %v1564_v21  ;;  %vm7327_vm6 = vcmp.lt.f32.partialorder %v4873_v11, 8388608.0  ;;  %v4876_v50 = vcvt.s32.f32 %v4875_v14  ;;  %4002 = vmatpush3.xpose.msk.msra.mxu1 %vm1785_vm2, %v10013_v61  ;;  %v10014_v21 = vld [vmem:[#allocation17_spill] sm:$0xff]  ;;  %v942_v49 = vadd.f32 %v6897_v10, %v7087_v53 }
 0x16d   :  { %4385 = vmatmul.mubr.msk.f32.gmra.mxu1 %vm1785_vm2, %v7325_v15  ;;  %v4871_v28 = vor.u32 %v4870_v42, %v4869_v0  ;;  %v4881_v56 = vand.u32 2147483647, %v1567_v46  ;;  %v4883_v24 = vcvt.f32.s32 %v1567_v46  ;;  %v4886_v6 = vand.u32 2147483648, %v1567_v46  ;;  %4003 = vmatprep.subr.msk.mxu1 %vm1785_vm2, %v10014_v21  ;;  %v10017_v21 = vld [vmem:[#allocation10_spill] sm:$0xff] }
 0x16e   :  { %v4877_v29 = vand.u32 2147483647, %v4876_v50  ;;  %v1568_v11 = vsub.f32 %v1436_v40, %v6948_v34  ;;  %5680 = vtanh.f32 %v927_v48  ;;  %v1437_v50 = vmul.f32 %v6954_v17, %v7118_v26  ;;  %v7365_v26 = vpop.f32.mrf.mxu0 }
 0x16f   :  { %v7344_v14 = vpop.eup %5672  ;;  %v7348_v42 = vsel %vm7306_vm5, %v4871_v28, %v1565_v4  ;;  %vm7350_vm7 = vcmp.lt.f32.partialorder %v4881_v56, 8388608.0  ;;  %v4884_v37 = vcvt.s32.f32 %v4883_v24  ;;  %5682 = vtanh.f32 %v942_v49  ;;  %v10018_v56 = vld [vmem:[#allocation16_spill] sm:$0xff] }
 0x170   :  { %4387 = vmatprep.mubr.msk.f32.mxu1 %vm1785_vm2, %v7348_v42  ;;  %v4879_v40 = vor.u32 %v4878_v27, %v4877_v29  ;;  %v4889_v48 = vand.u32 2147483647, %v1568_v11  ;;  %v4891_v53 = vcvt.f32.s32 %v1568_v11  ;;  %v4894_v61 = vand.u32 2147483648, %v1568_v11  ;;  %4004 = vmatpush3.xpose.msk.msra.mxu1 %vm1785_vm2, %v10017_v21  ;;  %v7367_v24 = vpop.eup %5674 }
 0x171   :  { %v4885_v4 = vand.u32 2147483647, %v4884_v37  ;;  %v1569_v30 = vsub.f32 %v1437_v50, %v6948_v34  ;;  %v1438_v28 = vmul.f32 %v6954_v17, %v7097_v1  ;;  %4005 = vmatprep.subr.msk.mxu1 %vm1785_vm2, %v10018_v56  ;;  %v937_v37 = vadd.f32 %v6897_v10, %v7095_v55 }
 0x172   :  { %v7371_v27 = vsel %vm7327_vm6, %v4879_v40, %v1566_v31  ;;  %vm7373_vm8 = vcmp.lt.f32.partialorder %v4889_v48, 8388608.0  ;;  %v4892_v49 = vcvt.s32.f32 %v4891_v53  ;;  %v952_v31 = vadd.f32 %v6897_v10, %v7111_v25  ;;  %v10021_v40 = vld [vmem:[#allocation9_spill] sm:$0xff]  ;;  %v7400_v25 = vpop.f32.mrf.mxu0 }
 0x173   :  { %4388 = vmatmul.mubr.msk.f32.gmra.mxu1 %vm1785_vm2, %v7371_v27  ;;  %v4887_v1 = vor.u32 %v4886_v6, %v4885_v4  ;;  %v4897_v50 = vand.u32 2147483647, %v1569_v30  ;;  %v4899_v21 = vcvt.f32.s32 %v1569_v30  ;;  %v4902_v56 = vand.u32 2147483648, %v1569_v30 }
 0x174   :  { %v4893_v45 = vand.u32 2147483647, %v4892_v49  ;;  %v1570_v57 = vsub.f32 %v1438_v28, %v6948_v34  ;;  %5684 = vtanh.f32 %v937_v37  ;;  %4006 = vmatpush3.xpose.msk.msra.mxu1 %vm1785_vm2, %v10021_v40  ;;  %v1439_v4 = vmul.f32 %v6954_v17, %v7164_v5  ;;  %v10024_v28 = vld [vmem:[#allocation15_spill] sm:$0xff] }
 0x175   :  { %v7386_v48 = vpop.eup %5676  ;;  %v7390_v55 = vsel %vm7350_vm7, %v4887_v1, %v1567_v46  ;;  %vm7392_vm9 = vcmp.lt.f32.partialorder %v4897_v50, 8388608.0  ;;  %v4900_v53 = vcvt.s32.f32 %v4899_v21  ;;  %4007 = vmatprep.subr.msk.mxu1 %vm1785_vm2, %v10024_v28  ;;  %5686 = vtanh.f32 %v952_v31  ;;  %v10027_v31 = vld [vmem:[#allocation8_spill] sm:$0xff] }
 0x176   :  { %4390 = vmatprep.mubr.msk.f32.mxu1 %vm1785_vm2, %v7390_v55  ;;  %v4895_v49 = vor.u32 %v4894_v61, %v4893_v45  ;;  %v4905_v0 = vand.u32 2147483647, %v1570_v57  ;;  %v4907_v46 = vcvt.f32.s32 %v1570_v57  ;;  %v4910_v37 = vand.u32 2147483648, %v1570_v57  ;;  %v7407_v5 = vpop.eup %5678 }
 0x177   :  { %v4901_v1 = vand.u32 2147483647, %v4900_v53  ;;  %v1571_v50 = vsub.f32 %v1439_v4, %v6948_v34  ;;  %v1440_v21 = vmul.f32 %v6954_v17, %v7141_v58  ;;  %v947_v61 = vadd.f32 %v6897_v10, %v7132_v63 }
 0x178   :  { %v7411_v40 = vsel %vm7373_vm8, %v4895_v49, %v1568_v11  ;;  %vm7413_vm10 = vcmp.lt.f32.partialorder %v4905_v0, 8388608.0  ;;  %v4908_v45 = vcvt.s32.f32 %v4907_v46  ;;  %4008 = vmatpush3.xpose.msk.msra.mxu1 %vm1785_vm2, %v10027_v31  ;;  %v10028_v11 = vld [vmem:[#allocation14_spill] sm:$0xff]  ;;  %v7425_v49 = vpop.f32.mrf.mxu0  ;;  %v962_v63 = vadd.f32 %v6897_v10, %v7139_v3 }
 0x179   :  { %4391 = vmatmul.mubr.msk.f32.gmra.mxu1 %vm1785_vm2, %v7411_v40  ;;  %v4903_v58 = vor.u32 %v4902_v56, %v4901_v1  ;;  %v4913_v53 = vand.u32 2147483647, %v1571_v50  ;;  %v4915_v4 = vcvt.f32.s32 %v1571_v50  ;;  %v4918_v29 = vand.u32 2147483648, %v1571_v50  ;;  %4009 = vmatprep.subr.msk.mxu1 %vm1785_vm2, %v10028_v11 }
 0x17a   :  { %v4909_v0 = vand.u32 2147483647, %v4908_v45  ;;  %v1572_v46 = vsub.f32 %v1440_v21, %v6948_v34  ;;  %5688 = vtanh.f32 %v947_v61  ;;  %v1441_v45 = vmul.f32 %v6954_v17, %v7210_v60  ;;  %v7451_v60 = vpop.f32.mrf.mxu0 }
 0x17b   :  { %v7430_v31 = vpop.eup %5680  ;;  %v7434_v56 = vsel %vm7392_vm9, %v4903_v58, %v1569_v30  ;;  %vm7436_vm11 = vcmp.lt.f32.partialorder %v4913_v53, 8388608.0  ;;  %v4916_v11 = vcvt.s32.f32 %v4915_v4  ;;  %5690 = vtanh.f32 %v962_v63  ;;  %v10033_v53 = vld [vmem:[#allocation13_spill] sm:$0xff] }
 0x17c   :  { %10029 = vst [vmem:[#allocation18_spill] sm:$0xff] %v7434_v56  ;;  %4393 = vmatprep.mubr.msk.f32.mxu1 %vm1785_vm2, %v7434_v56  ;;  %v4911_v21 = vor.u32 %v4910_v37, %v4909_v0  ;;  %v4921_v61 = vand.u32 2147483647, %v1572_v46  ;;  %v4923_v3 = vcvt.f32.s32 %v1572_v46  ;;  %v4926_v9 = vand.u32 2147483648, %v1572_v46  ;;  %4010 = vmatpush3.xpose.msk.msra.mxu1 %vm1785_vm2, %v10032_v20  ;;  %v7453_v4 = vpop.eup %5682 }
 0x17d   :  { %v4917_v30 = vand.u32 2147483647, %v4916_v11  ;;  %v1573_v6 = vsub.f32 %v1441_v45, %v6948_v34  ;;  %v1442_v58 = vmul.f32 %v6954_v17, %v7189_v7  ;;  %4011 = vmatprep.subr.msk.mxu1 %vm1785_vm2, %v10033_v53  ;;  %v957_v63 = vadd.f32 %v6897_v10, %v7159_v41 }
 0x17e   :  { %v7457_v37 = vsel %vm7413_vm10, %v4911_v21, %v1570_v57  ;;  %vm7459_vm12 = vcmp.lt.f32.partialorder %v4921_v61, 8388608.0  ;;  %v4924_v0 = vcvt.s32.f32 %v4923_v3  ;;  %v972_v57 = vadd.f32 %v6897_v10, %v7176_v47  ;;  %v10037_v21 = vld [vmem:[#allocation5_spill] sm:$0xff]  ;;  %v7486_v47 = vpop.f32.mrf.mxu0 }
 0x17f   :  { %10034 = vst [vmem:[#allocation11_spill] sm:$0xff] %v7457_v37  ;;  %4394 = vmatmul.mubr.msk.f32.gmra.mxu1 %vm1785_vm2, %v7457_v37  ;;  %v4919_v7 = vor.u32 %v4918_v29, %v4917_v30  ;;  %v4929_v11 = vand.u32 2147483647, %v1573_v6  ;;  %v4931_v45 = vcvt.f32.s32 %v1573_v6  ;;  %v4934_v53 = vand.u32 2147483648, %v1573_v6 }
 0x180   :  { %v4925_v56 = vand.u32 2147483647, %v4924_v0  ;;  %v1574_v28 = vsub.f32 %v1442_v58, %v6948_v34  ;;  %5692 = vtanh.f32 %v957_v63  ;;  %4012 = vmatpush3.xpose.msk.msra.mxu1 %vm1785_vm2, %v10037_v21  ;;  %v1443_v30 = vmul.f32 %v6954_v17, %v7256_v52  ;;  %v10041_v58 = vld [vmem:[#allocation12_spill] sm:$0xff] }
 0x181   :  { %v7472_v61 = vpop.eup %5684  ;;  %v7476_v41 = vsel %vm7436_vm11, %v4919_v7, %v1571_v50  ;;  %vm7478_vm13 = vcmp.lt.f32.partialorder %v4929_v11, 8388608.0  ;;  %v4932_v3 = vcvt.s32.f32 %v4931_v45  ;;  %4013 = vmatprep.subr.msk.mxu1 %vm1785_vm2, %v10041_v58  ;;  %5694 = vtanh.f32 %v972_v57  ;;  %v10045_v57 = vld [vmem:[#allocation6_spill] sm:$0xff] }
 0x182   :  { %10038 = vst [vmem:[#allocation17_spill] sm:$0xff] %v7476_v41  ;;  %4396 = vmatprep.mubr.msk.f32.mxu1 %vm1785_vm2, %v7476_v41  ;;  %v4927_v0 = vor.u32 %v4926_v9, %v4925_v56  ;;  %v4937_v1 = vand.u32 2147483647, %v1574_v28  ;;  %v4939_v50 = vcvt.f32.s32 %v1574_v28  ;;  %v4942_v63 = vand.u32 2147483648, %v1574_v28  ;;  %v7493_v52 = vpop.eup %5686 }
 0x183   :  { %v4933_v7 = vand.u32 2147483647, %v4932_v3  ;;  %v1575_v11 = vsub.f32 %v1443_v30, %v6948_v34  ;;  %v1444_v45 = vmul.f32 %v6954_v17, %v7233_v19  ;;  %v967_v56 = vadd.f32 %v6897_v10, %v7187_v16 }
 0x184   :  { %v7497_v21 = vsel %vm7459_vm12, %v4927_v0, %v1572_v46  ;;  %vm7499_vm14 = vcmp.lt.f32.partialorder %v4937_v1, 8388608.0  ;;  %v4940_v9 = vcvt.s32.f32 %v4939_v50  ;;  %4014 = vmatpush3.xpose.msk.msra.mxu1 %vm1785_vm2, %v10045_v57  ;;  %v7509_v46 = vpop.f32.mrf.mxu0  ;;  %v982_v50 = vadd.f32 %v6897_v10, %v7203_v22 }
 0x185   :  { %10042 = vst [vmem:[#allocation10_spill] sm:$0xff] %v7497_v21  ;;  %4397 = vmatmul.mubr.msk.f32.gmra.mxu1 %vm1785_vm2, %v7497_v21  ;;  %v4935_v19 = vor.u32 %v4934_v53, %v4933_v7  ;;  %v4945_v3 = vand.u32 2147483647, %v1575_v11  ;;  %v4947_v30 = vcvt.f32.s32 %v1575_v11  ;;  %v4950_v20 = vand.u32 2147483648, %v1575_v11 }
 0x186   :  { %v4941_v0 = vand.u32 2147483647, %v4940_v9  ;;  %v1576_v1 = vsub.f32 %v1444_v45, %v6948_v34  ;;  %5696 = vtanh.f32 %v967_v56  ;;  %v1445_v9 = vmul.f32 %v6954_v17, %v7300_v59 }
 0x187   :  { %v7514_v16 = vpop.eup %5688  ;;  %v7518_v57 = vsel %vm7478_vm13, %v4935_v19, %v1573_v6  ;;  %vm7520_vm15 = vcmp.lt.f32.partialorder %v4945_v3, 8388608.0  ;;  %v4948_v7 = vcvt.s32.f32 %v4947_v30  ;;  %5698 = vtanh.f32 %v982_v50  ;;  %v7531_v19 = vpop.f32.mrf.mxu0 }
 0x188   :  { %10046 = vst [vmem:[#allocation16_spill] sm:$0xff] %v7518_v57  ;;  %4399 = vmatprep.mubr.msk.f32.mxu1 %vm1785_vm2, %v7518_v57  ;;  %v4943_v45 = vor.u32 %v4942_v63, %v4941_v0  ;;  %v4953_v56 = vand.u32 2147483647, %v1576_v1  ;;  %v4955_v22 = vcvt.f32.s32 %v1576_v1  ;;  %v4958_v37 = vand.u32 2147483648, %v1576_v1  ;;  %v7533_v3 = vpop.eup %5690 }
 0x189   :  { %v4949_v41 = vand.u32 2147483647, %v4948_v7  ;;  %v1577_v6 = vsub.f32 %v1445_v9, %v6948_v34  ;;  %v1446_v29 = vmul.f32 %v6954_v17, %v7281_v2  ;;  %v977_v0 = vadd.f32 %v6897_v10, %v7224_v33 }
 0x18a   :  { %v7537_v59 = vsel %vm7499_vm14, %v4943_v45, %v1574_v28  ;;  %vm7539_vm1 = vcmp.lt.f32.partialorder %v4953_v56, 8388608.0  ;;  %v4956_v30 = vcvt.s32.f32 %v4955_v22  ;;  %v992_v28 = vadd.f32 %v6897_v10, %v7231_v12  ;;  %v7562_v22 = vpop.f32.mrf.mxu0 }
 0x18b   :  { %10049 = vst [vmem:[#allocation9_spill] sm:$0xff] %v7537_v59  ;;  %4400 = vmatmul.mubr.msk.f32.gmra.mxu1 %vm1785_vm2, %v7537_v59  ;;  %v4951_v2 = vor.u32 %v4950_v20, %v4949_v41  ;;  %v4961_v50 = vand.u32 2147483647, %v1577_v6  ;;  %v4963_v7 = vcvt.f32.s32 %v1577_v6  ;;  %v4966_v9 = vand.u32 2147483648, %v1577_v6 }
 0x18c   :  { %v4957_v18 = vand.u32 2147483647, %v4956_v30  ;;  %v1578_v58 = vsub.f32 %v1446_v29, %v6948_v34  ;;  %5700 = vtanh.f32 %v977_v0  ;;  %v1447_v20 = vmul.f32 %v6954_v17, %v7344_v14 }
 0x18d   :  { %v7550_v45 = vpop.eup %5692  ;;  %v7554_v56 = vsel %vm7520_vm15, %v4951_v2, %v1575_v11  ;;  %vm7556_vm3 = vcmp.lt.f32.partialorder %v4961_v50, 8388608.0  ;;  %v4964_v41 = vcvt.s32.f32 %v4963_v7  ;;  %5702 = vtanh.f32 %v992_v28 }
 0x18e   :  { %10052 = vst [vmem:[#allocation15_spill] sm:$0xff] %v7554_v56  ;;  %4402 = vmatprep.mubr.msk.f32.mxu1 %vm1785_vm2, %v7554_v56  ;;  %v4959_v10 = vor.u32 %v4958_v37, %v4957_v18  ;;  %v4969_v12 = vand.u32 2147483647, %v1578_v58  ;;  %v4971_v29 = vcvt.f32.s32 %v1578_v58  ;;  %v4974_v30 = vand.u32 2147483648, %v1578_v58  ;;  %v7569_v2 = vpop.eup %5694  ;;  %v7582_v37 = vld [vmem:[%s9818_s2] ss:$0 sm:$0xff] }
 0x18f   :  { %v4965_v53 = vand.u32 2147483647, %v4964_v41  ;;  %v1579_v11 = vsub.f32 %v1447_v20, %v6948_v34  ;;  %v1448_v0 = vmul.f32 %v6954_v17, %v7321_v39  ;;  %v987_v7 = vadd.f32 %v7582_v37, %v7251_v36  ;;  %v7588_v41 = vpop.f32.mrf.mxu0 }
 0x190   :  { %v7573_v14 = vsel %vm7539_vm1, %v4959_v10, %v1576_v1  ;;  %vm7575_vm4 = vcmp.lt.f32.partialorder %v4969_v12, 8388608.0  ;;  %v4972_v18 = vcvt.s32.f32 %v4971_v29  ;;  %v1002_v12 = vadd.f32 %v7582_v37, %v7268_v44 }
 0x191   :  { %4403 = vmatmul.mubr.msk.f32.gmra.mxu1 %vm1785_vm2, %v7573_v14  ;;  %v4967_v39 = vor.u32 %v4966_v9, %v4965_v53  ;;  %v4977_v63 = vand.u32 2147483647, %v1579_v11  ;;  %v4979_v1 = vcvt.f32.s32 %v1579_v11  ;;  %v4982_v28 = vand.u32 2147483648, %v1579_v11 }
 0x192   :  { %v4973_v20 = vand.u32 2147483647, %v4972_v18  ;;  %v1580_v10 = vsub.f32 %v1448_v0, %v6948_v34  ;;  %5704 = vtanh.f32 %v987_v7  ;;  %v1449_v18 = vmul.f32 %v6954_v17, %v7386_v48 }
 0x193   :  { %v7593_v29 = vpop.eup %5696  ;;  %v7597_v36 = vsel %vm7556_vm3, %v4967_v39, %v1577_v6  ;;  %vm7599_vm5 = vcmp.lt.f32.partialorder %v4977_v63, 8388608.0  ;;  %v4980_v53 = vcvt.s32.f32 %v4979_v1  ;;  %5706 = vtanh.f32 %v1002_v12  ;;  %v7610_v39 = vpop.f32.mrf.mxu0 }
 0x194   :  { %4405 = vmatprep.mubr.msk.f32.mxu1 %vm1785_vm2, %v7597_v36  ;;  %v4975_v0 = vor.u32 %v4974_v30, %v4973_v20  ;;  %v4985_v7 = vand.u32 2147483647, %v1580_v10  ;;  %v4987_v44 = vcvt.f32.s32 %v1580_v10  ;;  %v4990_v21 = vand.u32 2147483648, %v1580_v10  ;;  %v7612_v63 = vpop.eup %5698 }
 0x195   :  { %v4981_v54 = vand.u32 2147483647, %v4980_v53  ;;  %v1581_v6 = vsub.f32 %v1449_v18, %v6948_v34  ;;  %v1450_v33 = vmul.f32 %v6954_v17, %v7367_v24  ;;  %v997_v20 = vadd.f32 %v7582_v37, %v7279_v43  ;;  %v7635_v43 = vld [vmem:[%s9821_s5 + $0x8] ss:$0 sm:$0xff] }
 0x196   :  { %v7616_v48 = vsel %vm7575_vm4, %v4975_v0, %v1578_v58  ;;  %vm7618_vm6 = vcmp.lt.f32.partialorder %v4985_v7, 8388608.0  ;;  %v4988_v1 = vcvt.s32.f32 %v4987_v44  ;;  %v7629_v58 = vld [vmem:[%s9821_s5 + $0x9] ss:$0 sm:$0xff]  ;;  %v1012_v44 = vadd.f32 %v7582_v37, %v7314_v38 }
 0x197   :  { %4406 = vmatmul.mubr.msk.f32.gmra.mxu1 %vm1785_vm2, %v7616_v48  ;;  %v4983_v34 = vor.u32 %v4982_v28, %v4981_v54  ;;  %v4993_v17 = vand.u32 2147483647, %v1581_v6  ;;  %v4995_v24 = vcvt.f32.s32 %v1581_v6  ;;  %v4998_v12 = vand.u32 2147483648, %v1581_v6 }
 0x198   :  { %v4989_v53 = vand.u32 2147483647, %v4988_v1  ;;  %v1582_v50 = vsub.f32 %v1450_v33, %v7629_v58  ;;  %5708 = vtanh.f32 %v997_v20  ;;  %v1452_v54 = vmul.f32 %v7635_v43, %v7407_v5  ;;  %v7651_v33 = vpop.f32.mrf.mxu0 }
 0x199   :  { %v7639_v28 = vpop.eup %5700  ;;  %v7643_v18 = vsel %vm7599_vm5, %v4983_v34, %v1579_v11  ;;  %vm7645_vm7 = vcmp.lt.f32.partialorder %v4993_v17, 8388608.0  ;;  %v4996_v7 = vcvt.s32.f32 %v4995_v24  ;;  %5710 = vtanh.f32 %v1012_v44 }
 0x19a   :  { %4408 = vmatprep.mubr.msk.f32.mxu1 %vm1785_vm2, %v7643_v18  ;;  %v4991_v5 = vor.u32 %v4990_v21, %v4989_v53  ;;  %v5001_v1 = vand.u32 2147483647, %v1582_v50  ;;  %v5003_v20 = vcvt.f32.s32 %v1582_v50  ;;  %v5006_v57 = vand.u32 2147483648, %v1582_v50  ;;  %v7658_v17 = vpop.eup %5702  ;;  %v7672_v62 = vpop.f32.mrf.mxu0 }
 0x19b   :  { %v4997_v9 = vand.u32 2147483647, %v4996_v7  ;;  %v1584_v11 = vsub.f32 %v1452_v54, %v7629_v58  ;;  %v1451_v34 = vmul.f32 %v7635_v43, %v7430_v31  ;;  %v1007_v53 = vadd.f32 %v7582_v37, %v7339_v32 }
 0x19c   :  { %v7662_v38 = vsel %vm7618_vm6, %v4991_v5, %v1580_v10  ;;  %vm7664_vm8 = vcmp.lt.f32.partialorder %v5001_v1, 8388608.0  ;;  %v5004_v21 = vcvt.s32.f32 %v5003_v20  ;;  %v1022_v5 = vadd.f32 %v7582_v37, %v7365_v26 }
 0x19d   :  { %4409 = vmatmul.mubr.msk.f32.gmra.mxu1 %vm1785_vm2, %v7662_v38  ;;  %v4999_v54 = vor.u32 %v4998_v12, %v4997_v9  ;;  %v5017_v7 = vand.u32 2147483647, %v1584_v11  ;;  %v5019_v31 = vcvt.f32.s32 %v1584_v11  ;;  %v5022_v44 = vand.u32 2147483648, %v1584_v11 }
 0x19e   :  { %v5005_v30 = vand.u32 2147483647, %v5004_v21  ;;  %v1583_v10 = vsub.f32 %v1451_v34, %v7629_v58  ;;  %5712 = vtanh.f32 %v1007_v53  ;;  %v1453_v9 = vmul.f32 %v7635_v43, %v7472_v61 }
 0x19f   :  { %v7677_v1 = vpop.eup %5704  ;;  %v7681_v32 = vsel %vm7645_vm7, %v4999_v54, %v1581_v6  ;;  %vm7683_vm9 = vcmp.lt.f32.partialorder %v5017_v7, 8388608.0  ;;  %v5020_v20 = vcvt.s32.f32 %v5019_v31  ;;  %5714 = vtanh.f32 %v1022_v5  ;;  %v7694_v54 = vpop.f32.mrf.mxu0 }
 0x1a0   :  { %4411 = vmatprep.mubr.msk.f32.mxu1 %vm1785_vm2, %v7681_v32  ;;  %v5007_v34 = vor.u32 %v5006_v57, %v5005_v30  ;;  %v5009_v21 = vand.u32 2147483647, %v1583_v10  ;;  %v5011_v26 = vcvt.f32.s32 %v1583_v10  ;;  %v5014_v53 = vand.u32 2147483648, %v1583_v10  ;;  %v7696_v7 = vpop.eup %5706 }
 0x1a1   :  { %v5021_v59 = vand.u32 2147483647, %v5020_v20  ;;  %v1585_v6 = vsub.f32 %v1453_v9, %v7629_v58  ;;  %v1454_v0 = vmul.f32 %v7635_v43, %v7453_v4  ;;  %v1017_v30 = vadd.f32 %v7582_v37, %v7400_v25 }
 0x1a2   :  { %v5008_v61 = vsel %vm7664_vm8, %v5007_v34, %v1582_v50  ;;  %vm7700_vm10 = vcmp.lt.f32.partialorder %v5009_v21, 8388608.0  ;;  %v5012_v57 = vcvt.s32.f32 %v5011_v26  ;;  %v1032_v50 = vadd.f32 %v7582_v37, %v7425_v49  ;;  %v7720_v21 = vpop.f32.mrf.mxu0 }
 0x1a3   :  { %4412 = vmatmul.mubr.msk.f32.gmra.mxu1 %vm1785_vm2, %v5008_v61  ;;  %v5023_v5 = vor.u32 %v5022_v44, %v5021_v59  ;;  %v5025_v20 = vand.u32 2147483647, %v1585_v6  ;;  %v5027_v4 = vcvt.f32.s32 %v1585_v6  ;;  %v5030_v9 = vand.u32 2147483648, %v1585_v6 }
 0x1a4   :  { %v5013_v23 = vand.u32 2147483647, %v5012_v57  ;;  %v1586_v56 = vsub.f32 %v1454_v0, %v7629_v58  ;;  %5716 = vtanh.f32 %v1017_v30  ;;  %v1455_v44 = vmul.f32 %v7635_v43, %v7514_v16 }
 0x1a5   :  { %v7710_v24 = vpop.eup %5708  ;;  %v5024_v34 = vsel %vm7683_vm9, %v5023_v5, %v1584_v11  ;;  %vm7714_vm11 = vcmp.lt.f32.partialorder %v5025_v20, 8388608.0  ;;  %v5028_v59 = vcvt.s32.f32 %v5027_v4  ;;  %5718 = vtanh.f32 %v1032_v50 }
 0x1a6   :  { %4017 = vmatprep.subr.msk.mxu0 %vm1785_vm2, %v5024_v34  ;;  %v5015_v26 = vor.u32 %v5014_v53, %v5013_v23  ;;  %v5033_v0 = vand.u32 2147483647, %v1586_v56  ;;  %v5035_v49 = vcvt.f32.s32 %v1586_v56  ;;  %v5038_v57 = vand.u32 2147483648, %v1586_v56  ;;  %v7728_v5 = vpop.eup %5710 }
 0x1a7   :  { %4018 = vmatpush3.xpose.msk.msra.mxu0 %vm1785_vm2, %v7411_v40  ;;  %v5029_v11 = vand.u32 2147483647, %v5028_v59  ;;  %v1587_v12 = vsub.f32 %v1455_v44, %v7629_v58  ;;  %v1456_v30 = vmul.f32 %v7635_v43, %v7493_v52  ;;  %v1027_v40 = vadd.f32 %v7582_v37, %v7451_v60  ;;  %v7740_v59 = vpop.f32.mrf.mxu0 }
 0x1a8   :  { %v5016_v16 = vsel %vm7700_vm10, %v5015_v26, %v1583_v10  ;;  %vm7732_vm12 = vcmp.lt.f32.partialorder %v5033_v0, 8388608.0  ;;  %v5036_v53 = vcvt.s32.f32 %v5035_v49  ;;  %v1042_v44 = vadd.f32 %v7582_v37, %v7486_v47 }
 0x1a9   :  { %4414 = vmatprep.mubr.msk.f32.mxu1 %vm1785_vm2, %v5016_v16  ;;  %4019 = vmatprep.subr.msk.mxu0 %vm1785_vm2, %v5016_v16  ;;  %v5031_v20 = vor.u32 %v5030_v9, %v5029_v11  ;;  %v5041_v4 = vand.u32 2147483647, %v1587_v12  ;;  %v5043_v52 = vcvt.f32.s32 %v1587_v12  ;;  %v5046_v50 = vand.u32 2147483648, %v1587_v12 }
 0x1aa   :  { %4415 = vmatmul.mubr.msk.f32.gmra.mxu1 %vm1785_vm2, %v5024_v34  ;;  %v5037_v10 = vand.u32 2147483647, %v5036_v53  ;;  %v1588_v31 = vsub.f32 %v1456_v30, %v7629_v58  ;;  %5720 = vtanh.f32 %v1027_v40  ;;  %v1457_v0 = vmul.f32 %v7635_v43, %v7550_v45  ;;  %v7768_v53 = vpop.f32.mrf.mxu0 }
 0x1ab   :  { %v7746_v60 = vpop.eup %5712  ;;  %4020 = vmatpush3.xpose.msk.msra.mxu0 %vm1785_vm2, %v7390_v55  ;;  %v7752_v9 = vsel %vm7714_vm11, %v5031_v20, %v1585_v6  ;;  %vm7754_vm13 = vcmp.lt.f32.partialorder %v5041_v4, 8388608.0  ;;  %v5044_v34 = vcvt.s32.f32 %v5043_v52  ;;  %v7763_v25 = vpop.f32.mrf.mxu1  ;;  %5722 = vtanh.f32 %v1042_v44 }
 0x1ac   :  { %10073 = vst [vmem:[#allocation8_spill] sm:$0xff] %v7752_v9  ;;  %4417 = vmatprep.mubr.msk.f32.mxu1 %vm1785_vm2, %v7752_v9  ;;  %4021 = vmatprep.subr.msk.mxu0 %vm1785_vm2, %v5008_v61  ;;  %v5039_v47 = vor.u32 %v5038_v57, %v5037_v10  ;;  %v5049_v49 = vand.u32 2147483647, %v1588_v31  ;;  %v5051_v55 = vcvt.f32.s32 %v1588_v31  ;;  %v5054_v11 = vand.u32 2147483648, %v1588_v31  ;;  %v7770_v45 = vpop.eup %5714 }
 0x1ad   :  { %v5045_v6 = vand.u32 2147483647, %v5044_v34  ;;  %v1589_v30 = vsub.f32 %v1457_v0, %v7629_v58  ;;  %v1458_v16 = vmul.f32 %v7635_v43, %v7533_v3  ;;  %v1037_v20 = vadd.f32 %v7582_v37, %v7509_v46  ;;  %v7782_v4 = vpop.f32.mrf.mxu1 }
 0x1ae   :  { %v7774_v61 = vsel %vm7732_vm12, %v5039_v47, %v1586_v56  ;;  %vm7776_vm14 = vcmp.lt.f32.partialorder %v5049_v49, 8388608.0  ;;  %v5052_v40 = vcvt.s32.f32 %v5051_v55  ;;  %v1052_v46 = vadd.f32 %v7582_v37, %v7531_v19  ;;  %v7805_v47 = vpop.f32.mrf.mxu0 }
 0x1af   :  { %10076 = vst [vmem:[#allocation14_spill] sm:$0xff] %v7774_v61  ;;  %4418 = vmatmul.mubr.msk.f32.gmra.mxu1 %vm1785_vm2, %v7774_v61  ;;  %4022 = vmatpush3.xpose.msk.msra.mxu0 %vm1785_vm2, %v7371_v27  ;;  %v5047_v3 = vor.u32 %v5046_v50, %v5045_v6  ;;  %v5057_v23 = vand.u32 2147483647, %v1589_v30  ;;  %v5059_v56 = vcvt.f32.s32 %v1589_v30  ;;  %v5062_v52 = vand.u32 2147483648, %v1589_v30  ;;  %v10115_v61 = vld [vmem:[#allocation24_spill] sm:$0xff] }
 0x1b0   :  { %4023 = vmatprep.subr.msk.mxu0 %vm1785_vm2, %v7681_v32  ;;  %v5053_v10 = vand.u32 2147483647, %v5052_v40  ;;  %v1590_v44 = vsub.f32 %v1458_v16, %v7629_v58  ;;  %5724 = vtanh.f32 %v1037_v20  ;;  %v1459_v32 = vmul.f32 %v7635_v43, %v7593_v29 }
 0x1b1   :  { %v7793_v34 = vpop.eup %5716  ;;  %v7797_v0 = vsel %vm7754_vm13, %v5047_v3, %v1587_v12  ;;  %vm7799_vm15 = vcmp.lt.f32.partialorder %v5057_v23, 8388608.0  ;;  %v5060_v50 = vcvt.s32.f32 %v5059_v56  ;;  %v7809_v26 = vpop.f32.mrf.mxu1  ;;  %5726 = vtanh.f32 %v1052_v46 }
 0x1b2   :  { %10079 = vst [vmem:[#allocation7_spill] sm:$0xff] %v7797_v0  ;;  %4420 = vmatprep.mubr.msk.f32.mxu1 %vm1785_vm2, %v7797_v0  ;;  %v5055_v19 = vor.u32 %v5054_v11, %v5053_v10  ;;  %v5065_v49 = vand.u32 2147483647, %v1590_v44  ;;  %v5067_v55 = vcvt.f32.s32 %v1590_v44  ;;  %v5070_v6 = vand.u32 2147483648, %v1590_v44  ;;  %v7816_v40 = vpop.eup %5718 }
 0x1b3   :  { %4024 = vmatpush3.xpose.msk.msra.mxu0 %vm1785_vm2, %v7348_v42  ;;  %v5061_v12 = vand.u32 2147483647, %v5060_v50  ;;  %v1591_v16 = vsub.f32 %v1459_v32, %v7629_v58  ;;  %v1460_v29 = vmul.f32 %v7635_v43, %v7569_v2  ;;  %v1047_v3 = vadd.f32 %v7582_v37, %v7562_v22  ;;  %v7834_v10 = vpop.f32.mrf.mxu1 }
 0x1b4   :  { %v7820_v11 = vsel %vm7776_vm14, %v5055_v19, %v1588_v31  ;;  %4025 = vmatprep.subr.msk.mxu0 %vm1785_vm2, %v7662_v38  ;;  %vm7824_vm1 = vcmp.lt.f32.partialorder %v5065_v49, 8388608.0  ;;  %v5068_v42 = vcvt.s32.f32 %v5067_v55  ;;  %v7832_v31 = vpop.f32.mrf.mxu0  ;;  %v1062_v50 = vadd.f32 %v7582_v37, %v7588_v41 }
 0x1b5   :  { %10082 = vst [vmem:[#allocation13_spill] sm:$0xff] %v7820_v11  ;;  %4421 = vmatmul.mubr.msk.f32.gmra.mxu1 %vm1785_vm2, %v7820_v11  ;;  %v5063_v2 = vor.u32 %v5062_v52, %v5061_v12  ;;  %v5073_v23 = vand.u32 2147483647, %v1591_v16  ;;  %v5075_v56 = vcvt.f32.s32 %v1591_v16  ;;  %v5078_v57 = vand.u32 2147483648, %v1591_v16 }
 0x1b6   :  { %v5069_v38 = vand.u32 2147483647, %v5068_v42  ;;  %v1592_v46 = vsub.f32 %v1460_v29, %v7629_v58  ;;  %5728 = vtanh.f32 %v1047_v3  ;;  %v1461_v49 = vmul.f32 %v7635_v43, %v7639_v28  ;;  %v7860_v42 = vpop.f32.mrf.mxu0 }
 0x1b7   :  { %v7839_v32 = vpop.eup %5720  ;;  %v7843_v22 = vsel %vm7799_vm15, %v5063_v2, %v1589_v30  ;;  %4026 = vmatpush3.xpose.msk.msra.mxu0 %vm1785_vm2, %v7325_v15  ;;  %vm7847_vm3 = vcmp.lt.f32.partialorder %v5073_v23, 8388608.0  ;;  %v5076_v19 = vcvt.s32.f32 %v5075_v56  ;;  %5730 = vtanh.f32 %v1062_v50 }
 0x1b8   :  { %10085 = vst [vmem:[#allocation5_spill] sm:$0xff] %v7843_v22  ;;  %4423 = vmatprep.mubr.msk.f32.mxu1 %vm1785_vm2, %v7843_v22  ;;  %v5071_v41 = vor.u32 %v5070_v6, %v5069_v38  ;;  %4027 = vmatprep.subr.msk.mxu0 %vm1785_vm2, %v7643_v18  ;;  %v5081_v30 = vand.u32 2147483647, %v1592_v46  ;;  %v5083_v27 = vcvt.f32.s32 %v1592_v46  ;;  %v5086_v55 = vand.u32 2147483648, %v1592_v46  ;;  %v7862_v28 = vpop.f32.mrf.mxu1  ;;  %v7864_v3 = vpop.eup %5722  ;;  %v10120_v22 = vld [vmem:[#allocation23_spill] sm:$0xff] }
 0x1b9   :  { %v5077_v12 = vand.u32 2147483647, %v5076_v19  ;;  %v1593_v15 = vsub.f32 %v1461_v49, %v7629_v58  ;;  %v1462_v29 = vmul.f32 %v7635_v43, %v7612_v63  ;;  %v1057_v23 = vadd.f32 %v7582_v37, %v7610_v39 }
 0x1ba   :  { %v7868_v6 = vsel %vm7824_vm1, %v5071_v41, %v1590_v44  ;;  %vm7870_vm4 = vcmp.lt.f32.partialorder %v5081_v30, 8388608.0  ;;  %v5084_v2 = vcvt.s32.f32 %v5083_v27  ;;  %v1072_v39 = vadd.f32 %v7582_v37, %v7651_v33  ;;  %v7885_v19 = vpop.f32.mrf.mxu1  ;;  %v7899_v30 = vpop.f32.mrf.mxu0 }
 0x1bb   :  { %10088 = vst [vmem:[#allocation12_spill] sm:$0xff] %v7868_v6  ;;  %4424 = vmatmul.mubr.msk.f32.gmra.mxu1 %vm1785_vm2, %v7868_v6  ;;  %v5079_v63 = vor.u32 %v5078_v57, %v5077_v12  ;;  %4028 = vmatpush3.xpose.msk.msra.mxu0 %vm1785_vm2, %v7304_v35  ;;  %v5089_v56 = vand.u32 2147483647, %v1593_v15  ;;  %v5091_v38 = vcvt.f32.s32 %v1593_v15  ;;  %v5094_v20 = vand.u32 2147483648, %v1593_v15  ;;  %v10125_v6 = vld [vmem:[#allocation22_spill] sm:$0xff] }
 0x1bc   :  { %v5085_v44 = vand.u32 2147483647, %v5084_v2  ;;  %4029 = vmatprep.subr.msk.mxu0 %vm1785_vm2, %v7616_v48  ;;  %v1594_v50 = vsub.f32 %v1462_v29, %v7629_v58  ;;  %5732 = vtanh.f32 %v1057_v23  ;;  %v1463_v48 = vmul.f32 %v7635_v43, %v7677_v1 }
 0x1bd   :  { %v7887_v49 = vpop.eup %5724  ;;  %v7891_v35 = vsel %vm7847_vm3, %v5079_v63, %v1591_v16  ;;  %vm7893_vm5 = vcmp.lt.f32.partialorder %v5089_v56, 8388608.0  ;;  %v5092_v41 = vcvt.s32.f32 %v5091_v38  ;;  %5734 = vtanh.f32 %v1072_v39 }
 0x1be   :  { %10091 = vst [vmem:[#allocation6_spill] sm:$0xff] %v7891_v35  ;;  %4426 = vmatprep.mubr.msk.f32.mxu1 %vm1785_vm2, %v7891_v35  ;;  %v5087_v33 = vor.u32 %v5086_v55, %v5085_v44  ;;  %v5097_v27 = vand.u32 2147483647, %v1594_v50  ;;  %v5099_v12 = vcvt.f32.s32 %v1594_v50  ;;  %v5102_v29 = vand.u32 2147483648, %v1594_v50  ;;  %v7908_v1 = vpop.eup %5726  ;;  %v7926_v44 = vpop.f32.mrf.mxu0 }
 0x1bf   :  { %v5093_v52 = vand.u32 2147483647, %v5092_v41  ;;  %4030 = vmatpush3.xpose.msk.msra.mxu0 %vm1785_vm2, %v7285_v8  ;;  %v1595_v16 = vsub.f32 %v1463_v48, %v7629_v58  ;;  %v1464_v2 = vmul.f32 %v7635_v43, %v7658_v17  ;;  %v1067_v8 = vadd.f32 %v7582_v37, %v7672_v62  ;;  %v7922_v56 = vpop.f32.mrf.mxu1 }
 0x1c0   :  { %v7912_v23 = vsel %vm7870_vm4, %v5087_v33, %v1592_v46  ;;  %vm7914_vm6 = vcmp.lt.f32.partialorder %v5097_v27, 8388608.0  ;;  %v5100_v63 = vcvt.s32.f32 %v5099_v12  ;;  %4031 = vmatprep.subr.msk.mxu0 %vm1785_vm2, %v7597_v36  ;;  %v1082_v36 = vadd.f32 %v7582_v37, %v7694_v54 }
 0x1c1   :  { %10094 = vst [vmem:[#allocation26_spill] sm:$0xff] %v7912_v23  ;;  %4427 = vmatmul.mubr.msk.f32.gmra.mxu1 %vm1785_vm2, %v7912_v23  ;;  %v5095_v17 = vor.u32 %v5094_v20, %v5093_v52  ;;  %v5105_v18 = vand.u32 2147483647, %v1595_v16  ;;  %v5107_v46 = vcvt.f32.s32 %v1595_v16  ;;  %v5110_v38 = vand.u32 2147483648, %v1595_v16  ;;  %v7945_v12 = vpop.f32.mrf.mxu1 }
 0x1c2   :  { %v5101_v39 = vand.u32 2147483647, %v5100_v63  ;;  %v1596_v41 = vsub.f32 %v1464_v2, %v7629_v58  ;;  %5736 = vtanh.f32 %v1067_v8  ;;  %v1465_v27 = vmul.f32 %v7635_v43, %v7710_v24  ;;  %v7954_v24 = vpop.f32.mrf.mxu0 }
 0x1c3   :  { %v7931_v48 = vpop.eup %5728  ;;  %v7935_v62 = vsel %vm7893_vm5, %v5095_v17, %v1593_v15  ;;  %vm7937_vm7 = vcmp.lt.f32.partialorder %v5105_v18, 8388608.0  ;;  %v5108_v33 = vcvt.s32.f32 %v5107_v46  ;;  %4032 = vmatpush3.xpose.msk.msra.mxu0 %vm1785_vm2, %v7260_v13  ;;  %5738 = vtanh.f32 %v1082_v36 }
 0x1c4   :  { %10097 = vst [vmem:[#allocation27_spill] sm:$0xff] %v7935_v62  ;;  %4429 = vmatprep.mubr.msk.f32.mxu1 %vm1785_vm2, %v7935_v62  ;;  %v5103_v54 = vor.u32 %v5102_v29, %v5101_v39  ;;  %v5113_v57 = vand.u32 2147483647, %v1596_v41  ;;  %v5115_v15 = vcvt.f32.s32 %v1596_v41  ;;  %v5118_v52 = vand.u32 2147483648, %v1596_v41  ;;  %4033 = vmatprep.subr.msk.mxu0 %vm1785_vm2, %v7573_v14  ;;  %v7956_v8 = vpop.eup %5730  ;;  %v10133_v62 = vld [vmem:[#allocation21_spill] sm:$0xff] }
 0x1c5   :  { %v5109_v2 = vand.u32 2147483647, %v5108_v33  ;;  %v1597_v63 = vsub.f32 %v1465_v27, %v7629_v58  ;;  %v1466_v13 = vmul.f32 %v7635_v43, %v7696_v7  ;;  %v1077_v18 = vadd.f32 %v7582_v37, %v7720_v21  ;;  %v10103_v21 = vld [vmem:[#allocation15_spill] sm:$0xff] }
 0x1c6   :  { %v7960_v29 = vsel %vm7914_vm6, %v5103_v54, %v1594_v50  ;;  %vm7962_vm8 = vcmp.lt.f32.partialorder %v5113_v57, 8388608.0  ;;  %v5116_v14 = vcvt.s32.f32 %v5115_v15  ;;  %v7972_v50 = vpop.f32.mrf.mxu1  ;;  %v1092_v27 = vadd.f32 %v7582_v37, %v7740_v59 }
 0x1c7   :  { %10100 = vst [vmem:[#allocation28_spill] sm:$0xff] %v7960_v29  ;;  %4430 = vmatmul.mubr.msk.f32.gmra.mxu1 %vm1785_vm2, %v7960_v29  ;;  %v5111_v7 = vor.u32 %v5110_v38, %v5109_v2  ;;  %v5121_v46 = vand.u32 2147483647, %v1597_v63  ;;  %v5123_v39 = vcvt.f32.s32 %v1597_v63  ;;  %v5126_v36 = vand.u32 2147483648, %v1597_v63  ;;  %4034 = vmatpush3.xpose.msk.msra.mxu0 %vm1785_vm2, %v7237_v51  ;;  %v7991_v2 = vpop.f32.mrf.mxu0 }
 0x1c8   :  { %v5117_v55 = vand.u32 2147483647, %v5116_v14  ;;  %v1598_v33 = vsub.f32 %v1466_v13, %v7629_v58  ;;  %5740 = vtanh.f32 %v1077_v18  ;;  %4035 = vmatprep.subr.msk.mxu0 %vm1785_vm2, %v10103_v21  ;;  %v1467_v15 = vmul.f32 %v7635_v43, %v7746_v60  ;;  %v7993_v59 = vpop.f32.mrf.mxu1 }
 0x1c9   :  { %v7979_v54 = vpop.eup %5732  ;;  %v7983_v38 = vsel %vm7937_vm7, %v5111_v7, %v1595_v16  ;;  %vm7985_vm9 = vcmp.lt.f32.partialorder %v5121_v46, 8388608.0  ;;  %v5124_v57 = vcvt.s32.f32 %v5123_v39  ;;  %5742 = vtanh.f32 %v1092_v27  ;;  %v10107_v39 = vld [vmem:[#allocation25_spill] sm:$0xff] }
 0x1ca   :  { %10104 = vst [vmem:[#allocation15_spill] sm:$0xff] %v7983_v38  ;;  %4432 = vmatprep.mubr.msk.f32.mxu1 %vm1785_vm2, %v7983_v38  ;;  %v5119_v13 = vor.u32 %v5118_v52, %v5117_v55  ;;  %v5129_v14 = vand.u32 2147483647, %v1598_v33  ;;  %v5131_v20 = vcvt.f32.s32 %v1598_v33  ;;  %v5134_v16 = vand.u32 2147483648, %v1598_v33  ;;  %v8002_v60 = vpop.eup %5734  ;;  %v10138_v38 = vld [vmem:[#allocation20_spill] sm:$0xff] }
 0x1cb   :  { %v5125_v18 = vand.u32 2147483647, %v5124_v57  ;;  %v1599_v7 = vsub.f32 %v1467_v15, %v7629_v58  ;;  %v1468_v46 = vmul.f32 %v7635_v43, %v7728_v5  ;;  %4036 = vmatpush3.xpose.msk.msra.mxu0 %vm1785_vm2, %v10107_v39  ;;  %v1087_v27 = vadd.f32 %v7582_v37, %v7768_v53  ;;  %v10111_v57 = vld [vmem:[#allocation9_spill] sm:$0xff]  ;;  %v8016_v5 = vpop.f32.mrf.mxu1 }
 0x1cc   :  { %v8006_v21 = vsel %vm7962_vm8, %v5119_v13, %v1596_v41  ;;  %vm8008_vm10 = vcmp.lt.f32.partialorder %v5129_v14, 8388608.0  ;;  %v5132_v55 = vcvt.s32.f32 %v5131_v20  ;;  %4037 = vmatprep.subr.msk.mxu0 %vm1785_vm2, %v10111_v57  ;;  %v8020_v14 = vpop.f32.mrf.mxu0  ;;  %v1102_v53 = vadd.f32 %v7582_v37, %v7805_v47 }
 0x1cd   :  { %10108 = vst [vmem:[#allocation25_spill] sm:$0xff] %v8006_v21  ;;  %4433 = vmatmul.mubr.msk.f32.gmra.mxu1 %vm1785_vm2, %v8006_v21  ;;  %v5127_v15 = vor.u32 %v5126_v36, %v5125_v18  ;;  %v5137_v17 = vand.u32 2147483647, %v1599_v7  ;;  %v5139_v41 = vcvt.f32.s32 %v1599_v7  ;;  %v5142_v13 = vand.u32 2147483648, %v1599_v7 }
 0x1ce   :  { %v5133_v39 = vand.u32 2147483647, %v5132_v55  ;;  %v1600_v20 = vsub.f32 %v1468_v46, %v7629_v58  ;;  %5744 = vtanh.f32 %v1087_v27  ;;  %v1469_v55 = vmul.f32 %v7635_v43, %v7793_v34  ;;  %v8039_v46 = vpop.f32.mrf.mxu1 }
 0x1cf   :  { %v8025_v9 = vpop.eup %5736  ;;  %v8029_v57 = vsel %vm7985_vm9, %v5127_v15, %v1597_v63  ;;  %vm8031_vm11 = vcmp.lt.f32.partialorder %v5137_v17, 8388608.0  ;;  %v5140_v18 = vcvt.s32.f32 %v5139_v41  ;;  %4038 = vmatpush3.xpose.msk.msra.mxu0 %vm1785_vm2, %v10115_v61  ;;  %v10116_v15 = vld [vmem:[#allocation16_spill] sm:$0xff]  ;;  %5746 = vtanh.f32 %v1102_v53  ;;  %v8048_v61 = vpop.f32.mrf.mxu0 }
 0x1d0   :  { %10112 = vst [vmem:[#allocation9_spill] sm:$0xff] %v8029_v57  ;;  %4435 = vmatprep.mubr.msk.f32.mxu1 %vm1785_vm2, %v8029_v57  ;;  %v5135_v47 = vor.u32 %v5134_v16, %v5133_v39  ;;  %v5145_v51 = vand.u32 2147483647, %v1600_v20  ;;  %v5147_v63 = vcvt.f32.s32 %v1600_v20  ;;  %v5150_v27 = vand.u32 2147483648, %v1600_v20  ;;  %4039 = vmatprep.subr.msk.mxu0 %vm1785_vm2, %v10116_v15  ;;  %v8050_v0 = vpop.eup %5738 }
 0x1d1   :  { %v5141_v17 = vand.u32 2147483647, %v5140_v18  ;;  %v1601_v41 = vsub.f32 %v1469_v55, %v7629_v58  ;;  %v1470_v34 = vmul.f32 %v7635_v43, %v7770_v45  ;;  %v1097_v53 = vadd.f32 %v7582_v37, %v7832_v31  ;;  %v10121_v31 = vld [vmem:[#allocation10_spill] sm:$0xff] }
 0x1d2   :  { %v8054_v16 = vsel %vm8008_vm10, %v5135_v47, %v1598_v33  ;;  %vm8056_vm12 = vcmp.lt.f32.partialorder %v5145_v51, 8388608.0  ;;  %v5148_v15 = vcvt.s32.f32 %v5147_v63  ;;  %v8066_v33 = vpop.f32.mrf.mxu1  ;;  %v1112_v51 = vadd.f32 %v7582_v37, %v7860_v42 }
 0x1d3   :  { %10117 = vst [vmem:[#allocation24_spill] sm:$0xff] %v8054_v16  ;;  %4436 = vmatmul.mubr.msk.f32.gmra.mxu1 %vm1785_vm2, %v8054_v16  ;;  %v5143_v45 = vor.u32 %v5142_v13, %v5141_v17  ;;  %v5153_v18 = vand.u32 2147483647, %v1601_v41  ;;  %v5155_v55 = vcvt.f32.s32 %v1601_v41  ;;  %v5158_v11 = vand.u32 2147483648, %v1601_v41  ;;  %4040 = vmatpush3.xpose.msk.msra.mxu0 %vm1785_vm2, %v10120_v22 }
 0x1d4   :  { %v5149_v52 = vand.u32 2147483647, %v5148_v15  ;;  %v1602_v47 = vsub.f32 %v1470_v34, %v7629_v58  ;;  %5748 = vtanh.f32 %v1097_v53  ;;  %4041 = vmatprep.subr.msk.mxu0 %vm1785_vm2, %v10121_v31  ;;  %v1471_v34 = vmul.f32 %v7635_v43, %v7839_v32  ;;  %v8085_v15 = vpop.f32.mrf.mxu0  ;;  %v8087_v42 = vpop.f32.mrf.mxu1 }
 0x1d5   :  { %v8073_v63 = vpop.eup %5740  ;;  %v8077_v13 = vsel %vm8031_vm11, %v5143_v45, %v1599_v7  ;;  %vm8079_vm13 = vcmp.lt.f32.partialorder %v5153_v18, 8388608.0  ;;  %v5156_v17 = vcvt.s32.f32 %v5155_v55  ;;  %5750 = vtanh.f32 %v1112_v51 }
 0x1d6   :  { %10122 = vst [vmem:[#allocation16_spill] sm:$0xff] %v8077_v13  ;;  %4438 = vmatprep.mubr.msk.f32.mxu1 %vm1785_vm2, %v8077_v13  ;;  %v5151_v53 = vor.u32 %v5150_v27, %v5149_v52  ;;  %v5161_v31 = vand.u32 2147483647, %v1602_v47  ;;  %v5163_v36 = vcvt.f32.s32 %v1602_v47  ;;  %v5166_v7 = vand.u32 2147483648, %v1602_v47  ;;  %v8096_v32 = vpop.eup %5742 }
 0x1d7   :  { %v5157_v45 = vand.u32 2147483647, %v5156_v17  ;;  %v1603_v18 = vsub.f32 %v1471_v34, %v7629_v58  ;;  %v1472_v55 = vmul.f32 %v7635_v43, %v7816_v40  ;;  %4042 = vmatpush3.xpose.msk.msra.mxu0 %vm1785_vm2, %v10125_v6  ;;  %v1107_v51 = vadd.f32 %v7582_v37, %v7899_v30  ;;  %v10129_v17 = vld [vmem:[#allocation17_spill] sm:$0xff] }
 0x1d8   :  { %v8100_v35 = vsel %vm8056_vm12, %v5151_v53, %v1600_v20  ;;  %vm8102_vm14 = vcmp.lt.f32.partialorder %v5161_v31, 8388608.0  ;;  %v5164_v52 = vcvt.s32.f32 %v5163_v36  ;;  %4043 = vmatprep.subr.msk.mxu0 %vm1785_vm2, %v10129_v17  ;;  %v8110_v40 = vpop.f32.mrf.mxu1  ;;  %v8114_v53 = vpop.f32.mrf.mxu0  ;;  %v1122_v30 = vadd.f32 %v7582_v37, %v7926_v44 }
 0x1d9   :  { %10126 = vst [vmem:[#allocation23_spill] sm:$0xff] %v8100_v35  ;;  %4439 = vmatmul.mubr.msk.f32.gmra.mxu1 %vm1785_vm2, %v8100_v35  ;;  %v5159_v6 = vor.u32 %v5158_v11, %v5157_v45  ;;  %v5169_v39 = vand.u32 2147483647, %v1603_v18  ;;  %v5171_v20 = vcvt.f32.s32 %v1603_v18  ;;  %v5174_v34 = vand.u32 2147483648, %v1603_v18 }
 0x1da   :  { %v5165_v31 = vand.u32 2147483647, %v5164_v52  ;;  %v1604_v36 = vsub.f32 %v1472_v55, %v7629_v58  ;;  %5752 = vtanh.f32 %v1107_v51  ;;  %v1473_v52 = vmul.f32 %v7635_v43, %v7887_v49  ;;  %v8133_v55 = vpop.f32.mrf.mxu1 }
 0x1db   :  { %v8119_v23 = vpop.eup %5744  ;;  %v8123_v17 = vsel %vm8079_vm13, %v5159_v6, %v1601_v41  ;;  %vm8125_vm15 = vcmp.lt.f32.partialorder %v5169_v39, 8388608.0  ;;  %v5172_v45 = vcvt.s32.f32 %v5171_v20  ;;  %4044 = vmatpush3.xpose.msk.msra.mxu0 %vm1785_vm2, %v10133_v62  ;;  %v10134_v6 = vld [vmem:[#allocation11_spill] sm:$0xff]  ;;  %5754 = vtanh.f32 %v1122_v30  ;;  %v8142_v62 = vpop.f32.mrf.mxu0 }
 0x1dc   :  { %10130 = vst [vmem:[#allocation10_spill] sm:$0xff] %v8123_v17  ;;  %4441 = vmatprep.mubr.msk.f32.mxu1 %vm1785_vm2, %v8123_v17  ;;  %v5167_v44 = vor.u32 %v5166_v7, %v5165_v31  ;;  %v5177_v22 = vand.u32 2147483647, %v1604_v36  ;;  %v5179_v41 = vcvt.f32.s32 %v1604_v36  ;;  %v5182_v51 = vand.u32 2147483648, %v1604_v36  ;;  %4045 = vmatprep.subr.msk.mxu0 %vm1785_vm2, %v10134_v6  ;;  %v8144_v29 = vpop.eup %5746 }
 0x1dd   :  { %v5173_v39 = vand.u32 2147483647, %v5172_v45  ;;  %v1605_v20 = vsub.f32 %v1473_v52, %v7629_v58  ;;  %v1474_v49 = vmul.f32 %v7635_v43, %v7864_v3  ;;  %v1117_v30 = vadd.f32 %v7582_v37, %v7954_v24  ;;  %v10139_v24 = vld [vmem:[#allocation18_spill] sm:$0xff] }
 0x1de   :  { %v8148_v7 = vsel %vm8102_vm14, %v5167_v44, %v1602_v47  ;;  %vm8150_vm1 = vcmp.lt.f32.partialorder %v5177_v22, 8388608.0  ;;  %v5180_v6 = vcvt.s32.f32 %v5179_v41  ;;  %v8160_v47 = vpop.f32.mrf.mxu1  ;;  %v1132_v22 = vadd.f32 %v7582_v37, %v7991_v2 }
 0x1df   :  { %10135 = vst [vmem:[#allocation22_spill] sm:$0xff] %v8148_v7  ;;  %4442 = vmatmul.mubr.msk.f32.gmra.mxu1 %vm1785_vm2, %v8148_v7  ;;  %v5175_v3 = vor.u32 %v5174_v34, %v5173_v39  ;;  %v5185_v45 = vand.u32 2147483647, %v1605_v20  ;;  %v5187_v52 = vcvt.f32.s32 %v1605_v20  ;;  %v5190_v17 = vand.u32 2147483648, %v1605_v20  ;;  %4046 = vmatpush3.xpose.msk.msra.mxu0 %vm1785_vm2, %v10138_v38  ;;  %v10143_v7 = vld [vmem:[#allocation19_spill] sm:$0xff] }
 0x1e0   :  { %v5181_v27 = vand.u32 2147483647, %v5180_v6  ;;  %v1606_v44 = vsub.f32 %v1474_v49, %v7629_v58  ;;  %5756 = vtanh.f32 %v1117_v30  ;;  %4047 = vmatprep.subr.msk.mxu0 %vm1785_vm2, %v10139_v24  ;;  %v1475_v49 = vmul.f32 %v7635_v43, %v7931_v48  ;;  %v8179_v6 = vpop.f32.mrf.mxu0  ;;  %v8181_v2 = vpop.f32.mrf.mxu1  ;;  %v3007_v48 = vld [vmem:[%s9821_s5] sm:$0xff] }
 0x1e1   :  { %v8167_v41 = vpop.eup %5748  ;;  %v8171_v34 = vsel %vm8125_vm15, %v5175_v3, %v1603_v18  ;;  %vm8173_vm3 = vcmp.lt.f32.partialorder %v5185_v45, 8388608.0  ;;  %v5188_v39 = vcvt.s32.f32 %v5187_v52  ;;  %5758 = vtanh.f32 %v1132_v22  ;;  %4049 = vmatprep.mubr.msk.f32.mxu0 %vm1785_vm2, %v3007_v48 }
 0x1e2   :  { %10140 = vst [vmem:[#allocation17_spill] sm:$0xff] %v8171_v34  ;;  %4444 = vmatprep.mubr.msk.f32.mxu1 %vm1785_vm2, %v8171_v34  ;;  %v5183_v30 = vor.u32 %v5182_v51, %v5181_v27  ;;  %v5193_v24 = vand.u32 2147483647, %v1606_v44  ;;  %v5195_v11 = vcvt.f32.s32 %v1606_v44  ;;  %v5198_v18 = vand.u32 2147483648, %v1606_v44  ;;  %v8193_v21 = vpop.eup %5750 }
 0x1e3   :  { %v5189_v3 = vand.u32 2147483647, %v5188_v39  ;;  %v1607_v45 = vsub.f32 %v1475_v49, %v7629_v58  ;;  %v1476_v52 = vmul.f32 %v7635_v43, %v7908_v1  ;;  %4048 = vmatpush3.xpose.msk.msra.mxu0 %vm1785_vm2, %v10143_v7  ;;  %v1127_v1 = vadd.f32 %v7582_v37, %v8020_v14  ;;  %v8205_v39 = vpop.f32.mrf.mxu1 }
 0x1e4   :  { %v8197_v51 = vsel %vm8150_vm1, %v5183_v30, %v1604_v36  ;;  %vm8199_vm4 = vcmp.lt.f32.partialorder %v5193_v24, 8388608.0  ;;  %v5196_v22 = vcvt.s32.f32 %v5195_v11  ;;  %v8210_v30 = vpop.f32.mrf.mxu0  ;;  %v1142_v14 = vadd.f32 %v7582_v37, %v8048_v61 }
 0x1e5   :  { %10144 = vst [vmem:[#allocation21_spill] sm:$0xff] %v8197_v51  ;;  %4445 = vmatmul.mubr.msk.f32.gmra.mxu1 %vm1785_vm2, %v8197_v51  ;;  %v5191_v7 = vor.u32 %v5190_v17, %v5189_v3  ;;  %v5201_v49 = vand.u32 2147483647, %v1607_v45  ;;  %v5203_v31 = vcvt.f32.s32 %v1607_v45  ;;  %v5206_v36 = vand.u32 2147483648, %v1607_v45 }
 0x1e6   :  { %v5197_v24 = vand.u32 2147483647, %v5196_v22  ;;  %v1608_v34 = vsub.f32 %v1476_v52, %v7629_v58  ;;  %5760 = vtanh.f32 %v1127_v1  ;;  %4050 = vmatmul.mubr.msk.f32.vlgmr.msra.gmra.mxu0 %vm1785_vm2, %v3007_v48  ;;  %v1477_v52 = vmul.f32 %v7635_v43, %v7979_v54  ;;  %v8228_v22 = vpop.f32.mrf.mxu1  ;;  %v8236_v57 = vpop.f32.mrf.mxu0 }
 0x1e7   :  { %v8216_v11 = vpop.eup %5752  ;;  %v8220_v51 = vsel %vm8173_vm3, %v5191_v7, %v1605_v20  ;;  %vm8222_vm5 = vcmp.lt.f32.partialorder %v5201_v49, 8388608.0  ;;  %v5204_v3 = vcvt.s32.f32 %v5203_v31  ;;  %4117 = vmatprep.mubr.msk.f32.mxu0 %vm1785_vm2, %v3007_v48  ;;  %5762 = vtanh.f32 %v1142_v14 }
 0x1e8   :  { %10147 = vst [vmem:[#allocation11_spill] sm:$0xff] %v8220_v51  ;;  %4447 = vmatprep.mubr.msk.f32.mxu1 %vm1785_vm2, %v8220_v51  ;;  %v5199_v61 = vor.u32 %v5198_v18, %v5197_v24  ;;  %v5209_v1 = vand.u32 2147483647, %v1608_v34  ;;  %v5211_v38 = vcvt.f32.s32 %v1608_v34  ;;  %v5214_v20 = vand.u32 2147483648, %v1608_v34  ;;  %v8238_v54 = vpop.eup %5754 }
 0x1e9   :  { %v5205_v7 = vand.u32 2147483647, %v5204_v3  ;;  %v1609_v49 = vsub.f32 %v1477_v52, %v7629_v58  ;;  %v1478_v31 = vmul.f32 %v7635_v43, %v7956_v8  ;;  %v1137_v14 = vadd.f32 %v7582_v37, %v8085_v15 }
 0x1ea   :  { %v8242_v48 = vsel %vm8199_vm4, %v5199_v61, %v1606_v44  ;;  %vm8244_vm6 = vcmp.lt.f32.partialorder %v5209_v1, 8388608.0  ;;  %v5212_v24 = vcvt.s32.f32 %v5211_v38  ;;  %v1152_v61 = vadd.f32 %v7582_v37, %v8114_v53 }
 0x1eb   :  { %10150 = vst [vmem:[#allocation20_spill] sm:$0xff] %v8242_v48  ;;  %4448 = vmatmul.mubr.msk.f32.gmra.mxu1 %vm1785_vm2, %v8242_v48  ;;  %v5207_v8 = vor.u32 %v5206_v36, %v5205_v7  ;;  %v5217_v3 = vand.u32 2147483647, %v1609_v49  ;;  %v5219_v52 = vcvt.f32.s32 %v1609_v49  ;;  %v5222_v51 = vand.u32 2147483648, %v1609_v49  ;;  %v8252_v16 = vpop.f32.mrf.mxu1 }
 0x1ec   :  { %v5213_v27 = vand.u32 2147483647, %v5212_v24  ;;  %v1610_v44 = vsub.f32 %v1478_v31, %v7629_v58  ;;  %5764 = vtanh.f32 %v1137_v14  ;;  %v1479_v7 = vmul.f32 %v7635_v43, %v8025_v9  ;;  %v8269_v24 = vpop.f32.mrf.mxu0 }
 0x1ed   :  { %v8257_v1 = vpop.eup %5756  ;;  %v8261_v15 = vsel %vm8222_vm5, %v5207_v8, %v1607_v45  ;;  %vm8263_vm7 = vcmp.lt.f32.partialorder %v5217_v3, 8388608.0  ;;  %v5220_v38 = vcvt.s32.f32 %v5219_v52  ;;  %v8271_v31 = vpop.f32.mrf.mxu1  ;;  %5766 = vtanh.f32 %v1152_v61 }
 0x1ee   :  { %10153 = vst [vmem:[#allocation18_spill] sm:$0xff] %v8261_v15  ;;  %4450 = vmatprep.mubr.msk.f32.mxu1 %vm1785_vm2, %v8261_v15  ;;  %v5215_v37 = vor.u32 %v5214_v20, %v5213_v27  ;;  %v5225_v53 = vand.u32 2147483647, %v1610_v44  ;;  %v5227_v17 = vcvt.f32.s32 %v1610_v44  ;;  %v5230_v45 = vand.u32 2147483648, %v1610_v44  ;;  %v8278_v52 = vpop.eup %5758  ;;  %v8291_v27 = vld [vmem:[%s9818_s2] ss:$0 sm:$0xff] }
 0x1ef   :  { %v5221_v14 = vand.u32 2147483647, %v5220_v38  ;;  %v1611_v8 = vsub.f32 %v1479_v7, %v7629_v58  ;;  %v1480_v3 = vmul.f32 %v7635_v43, %v8002_v60  ;;  %v1147_v61 = vadd.f32 %v8291_v27, %v8142_v62  ;;  %v8297_v7 = vpop.f32.mrf.mxu0 }
 0x1f0   :  { %v8282_v9 = vsel %vm8244_vm6, %v5215_v37, %v1608_v34  ;;  %vm8284_vm8 = vcmp.lt.f32.partialorder %v5225_v53, 8388608.0  ;;  %v5228_v20 = vcvt.s32.f32 %v5227_v17  ;;  %v8299_v37 = vpop.f32.mrf.mxu1  ;;  %v1162_v15 = vadd.f32 %v8291_v27, %v8179_v6 }
 0x1f1   :  { %10156 = vst [vmem:[#allocation19_spill] sm:$0xff] %v8282_v9  ;;  %4451 = vmatmul.mubr.msk.f32.gmra.mxu1 %vm1785_vm2, %v8282_v9  ;;  %v5223_v60 = vor.u32 %v5222_v51, %v5221_v14  ;;  %v5233_v18 = vand.u32 2147483647, %v1611_v8  ;;  %v5235_v34 = vcvt.f32.s32 %v1611_v8  ;;  %v5238_v38 = vand.u32 2147483648, %v1611_v8 }
 0x1f2   :  { %v5229_v53 = vand.u32 2147483647, %v5228_v20  ;;  %v1612_v17 = vsub.f32 %v1480_v3, %v7629_v58  ;;  %5768 = vtanh.f32 %v1147_v61  ;;  %v1481_v20 = vmul.f32 %v7635_v43, %v8073_v63  ;;  %v8316_v9 = vpop.f32.mrf.mxu1  ;;  %v8329_v43 = vld [vmem:[%s9821_s5 + $0x8] ss:$0 sm:$0xff] }
 0x1f3   :  { %v8304_v13 = vpop.eup %5760  ;;  %v8308_v62 = vsel %vm8263_vm7, %v5223_v60, %v1609_v49  ;;  %vm8310_vm9 = vcmp.lt.f32.partialorder %v5233_v18, 8388608.0  ;;  %v5236_v14 = vcvt.s32.f32 %v5235_v34  ;;  %10162 = vst [vmem:[#allocation30_spill] sm:$0xff] %v8316_v9  ;;  %5770 = vtanh.f32 %v1162_v15  ;;  %v8323_v49 = vld [vmem:[%s9821_s5 + $0x9] ss:$0 sm:$0xff] }
 0x1f4   :  { %10159 = vst [vmem:[#allocation29_spill] sm:$0xff] %v8308_v62  ;;  %4453 = vmatprep.mubr.msk.f32.mxu1 %vm1785_vm2, %v8308_v62  ;;  %v5231_v58 = vor.u32 %v5230_v45, %v5229_v53  ;;  %v5241_v6 = vand.u32 2147483647, %v1612_v17  ;;  %v5243_v3 = vcvt.f32.s32 %v1612_v17  ;;  %v5246_v61 = vand.u32 2147483648, %v1612_v17  ;;  %v8333_v45 = vpop.f32.mrf.mxu0  ;;  %v8335_v18 = vpop.eup %5762 }
 0x1f5   :  { %v5237_v36 = vand.u32 2147483647, %v5236_v14  ;;  %v1613_v60 = vsub.f32 %v1481_v20, %v8323_v49  ;;  %v1482_v63 = vmul.f32 %v8329_v43, %v8050_v0  ;;  %v1157_v14 = vadd.f32 %v8291_v27, %v8210_v30 }
 0x1f6   :  { %v8339_v15 = vsel %vm8284_vm8, %v5231_v58, %v1610_v44  ;;  %vm8341_vm10 = vcmp.lt.f32.partialorder %v5241_v6, 8388608.0  ;;  %v5244_v53 = vcvt.s32.f32 %v5243_v3  ;;  %v8349_v9 = vpop.f32.mrf.mxu1  ;;  %v1172_v58 = vadd.f32 %v8291_v27, %v8236_v57 }
 0x1f7   :  { %10163 = vst [vmem:[#allocation31_spill] sm:$0xff] %v8339_v15  ;;  %4454 = vmatmul.mubr.msk.f32.gmra.mxu1 %vm1785_vm2, %v8339_v15  ;;  %v5239_v0 = vor.u32 %v5238_v38, %v5237_v36  ;;  %v5249_v20 = vand.u32 2147483647, %v1613_v60  ;;  %v5251_v62 = vcvt.f32.s32 %v1613_v60  ;;  %v5254_v35 = vand.u32 2147483648, %v1613_v60  ;;  %10166 = vst [vmem:[#allocation32_spill] sm:$0xff] %v8349_v9 }
 0x1f8   :  { %v5245_v48 = vand.u32 2147483647, %v5244_v53  ;;  %v1614_v44 = vsub.f32 %v1482_v63, %v8323_v49  ;;  %5772 = vtanh.f32 %v1157_v14  ;;  %v1483_v36 = vmul.f32 %v8329_v43, %v8119_v23  ;;  %v8366_v53 = vpop.f32.mrf.mxu0  ;;  %v8368_v63 = vpop.f32.mrf.mxu1 }
 0x1f9   :  { %v8354_v6 = vpop.eup %5764  ;;  %v8358_v30 = vsel %vm8310_vm9, %v5239_v0, %v1611_v8  ;;  %vm8360_vm11 = vcmp.lt.f32.partialorder %v5249_v20, 8388608.0  ;;  %v5252_v3 = vcvt.s32.f32 %v5251_v62  ;;  %10170 = vst [vmem:[#allocation34_spill] sm:$0xff] %v8368_v63  ;;  %5774 = vtanh.f32 %v1172_v58 }
 0x1fa   :  { %10167 = vst [vmem:[#allocation33_spill] sm:$0xff] %v8358_v30  ;;  %4456 = vmatprep.mubr.msk.f32.mxu1 %vm1785_vm2, %v8358_v30  ;;  %v5247_v57 = vor.u32 %v5246_v61, %v5245_v48  ;;  %v5257_v14 = vand.u32 2147483647, %v1614_v44  ;;  %v5259_v51 = vcvt.f32.s32 %v1614_v44  ;;  %v5262_v8 = vand.u32 2147483648, %v1614_v44  ;;  %v8375_v15 = vpop.eup %5766  ;;  %v8389_v30 = vpop.f32.mrf.mxu0 }
 0x1fb   :  { %v5253_v0 = vand.u32 2147483647, %v5252_v3  ;;  %v1615_v20 = vsub.f32 %v1483_v36, %v8323_v49  ;;  %v1484_v62 = vmul.f32 %v8329_v43, %v8096_v32  ;;  %v1167_v48 = vadd.f32 %v8291_v27, %v8269_v24  ;;  %v8399_v24 = vld [vmem:[%s9820_s4] ss:$0 sm:$0xff] }
 0x1fc   :  { %v8379_v23 = vsel %vm8341_vm10, %v5247_v57, %v1612_v17  ;;  %vm8381_vm12 = vcmp.lt.f32.partialorder %v5257_v14, 8388608.0  ;;  %v5260_v61 = vcvt.s32.f32 %v5259_v51  ;;  %v8391_v34 = vpop.f32.mrf.mxu1  ;;  %v1182_v14 = vadd.f32 %v8291_v27, %v8297_v7 }
 0x1fd   :  { %10171 = vst [vmem:[#allocation35_spill] sm:$0xff] %v8379_v23  ;;  %4457 = vmatmul.mubr.msk.f32.gmra.mxu1 %vm1785_vm2, %v8379_v23  ;;  %v5255_v58 = vor.u32 %v5254_v35, %v5253_v0  ;;  %v5265_v3 = vand.u32 2147483647, %v1615_v20  ;;  %v5267_v32 = vcvt.f32.s32 %v1615_v20  ;;  %v5270_v36 = vand.u32 2147483648, %v1615_v20  ;;  %10174 = vst [vmem:[#allocation36_spill] sm:$0xff] %v8391_v34 }
 0x1fe   :  { %v5261_v17 = vand.u32 2147483647, %v5260_v61  ;;  %v1616_v57 = vsub.f32 %v1484_v62, %v8323_v49  ;;  %5776 = vtanh.f32 %v1167_v48  ;;  %v1485_v61 = vmul.f32 %v8329_v43, %v8167_v41  ;;  %v8413_v7 = vpop.f32.mrf.mxu1 }
 0x1ff   :  { %v8401_v35 = vpop.eup %5768  ;;  %v8405_v51 = vsel %vm8360_vm11, %v5255_v58, %v1613_v60  ;;  %vm8407_vm13 = vcmp.lt.f32.partialorder %v5265_v3, 8388608.0  ;;  %v5268_v62 = vcvt.s32.f32 %v5267_v32  ;;  %5778 = vtanh.f32 %v1182_v14  ;;  %v4303_v3 = vpop.f32.mrf.mxu0 }
 0x200   :  { %10175 = vst [vmem:[#allocation37_spill] sm:$0xff] %v8405_v51  ;;  %4459 = vmatprep.mubr.msk.f32.mxu1 %vm1785_vm2, %v8405_v51  ;;  %v5263_v48 = vor.u32 %v5262_v8, %v5261_v17  ;;  %v5273_v23 = vand.u32 2147483647, %v1616_v57  ;;  %v5275_v34 = vcvt.f32.s32 %v1616_v57  ;;  %v5278_v9 = vand.u32 2147483648, %v1616_v57  ;;  %v8420_v32 = vpop.eup %5770 }
 0x201   :  { %v5269_v38 = vand.u32 2147483647, %v5268_v62  ;;  %v1617_v60 = vsub.f32 %v1485_v61, %v8323_v49  ;;  %v2246_v58 = vadd.f32 %v7763_v25, %v8399_v24  ;;  %v1486_v17 = vmul.f32 %v8329_v43, %v8144_v29 }
 0x202   :  { %v8424_v41 = vsel %vm8381_vm12, %v5263_v48, %v1614_v44  ;;  %vm8426_vm14 = vcmp.lt.f32.partialorder %v5273_v23, 8388608.0  ;;  %v5276_v8 = vcvt.s32.f32 %v5275_v34  ;;  %v8438_v44 = vpop.f32.mrf.mxu1  ;;  %v1177_v29 = vadd.f32 %v8291_v27, %v8333_v45 }
 0x203   :  { %10178 = vst [vmem:[#allocation38_spill] sm:$0xff] %v8424_v41  ;;  %4460 = vmatmul.mubr.msk.f32.gmra.mxu1 %vm1785_vm2, %v8424_v41  ;;  %v5271_v14 = vor.u32 %v5270_v36, %v5269_v38  ;;  %v5281_v25 = vand.u32 2147483647, %v1617_v60  ;;  %v5283_v62 = vcvt.f32.s32 %v1617_v60  ;;  %v5286_v61 = vand.u32 2147483648, %v1617_v60  ;;  %2880 = vst.msk [vmem:[%s9822_s6 + $0x8] sm:$0xff] %vm165_vm0, %v2246_v58 }
 0x204   :  { %10181 = vst [vmem:[#allocation39_spill] sm:$0xff] %v8438_v44  ;;  %v5277_v63 = vand.u32 2147483647, %v5276_v8  ;;  %v1618_v23 = vsub.f32 %v1486_v17, %v8323_v49  ;;  %v2241_v34 = vadd.f32 %v8399_v24, %v7782_v4  ;;  %v1192_v8 = vadd.f32 %v8291_v27, %v8366_v53  ;;  %v8457_v17 = vpop.f32.mrf.mxu0 }
 0x205   :  { %v8445_v36 = vpop.eup %5772  ;;  %v8449_v48 = vsel %vm8407_vm13, %v5271_v14, %v1615_v20  ;;  %vm8451_vm15 = vcmp.lt.f32.partialorder %v5281_v25, 8388608.0  ;;  %v5284_v58 = vcvt.s32.f32 %v5283_v62  ;;  %v8465_v20 = vpop.f32.mrf.mxu1  ;;  %5780 = vtanh.f32 %v1177_v29 }
 0x206   :  { %10182 = vst [vmem:[#allocation40_spill] sm:$0xff] %v8449_v48  ;;  %4462 = vmatprep.mubr.msk.f32.mxu1 %vm1785_vm2, %v8449_v48  ;;  %v5279_v4 = vor.u32 %v5278_v9, %v5277_v63  ;;  %v5289_v45 = vand.u32 2147483647, %v1618_v23  ;;  %v5291_v41 = vcvt.f32.s32 %v1618_v23  ;;  %v5294_v44 = vand.u32 2147483648, %v1618_v23  ;;  %2879 = vst.msk [vmem:[%s9822_s6] sm:$0xff] %vm165_vm0, %v2241_v34  ;;  %v8471_v25 = vpop.eup %5774 }
 0x207   :  { %v5285_v0 = vand.u32 2147483647, %v5284_v58  ;;  %v1487_v53 = vmul.f32 %v8329_v43, %v8216_v11  ;;  %v2256_v14 = vadd.f32 %v7809_v26, %v8399_v24  ;;  %5782 = vtanh.f32 %v1192_v8 }
 0x208   :  { %v5280_v9 = vsel %vm8426_vm14, %v5279_v4, %v1616_v57  ;;  %vm8475_vm1 = vcmp.lt.f32.partialorder %v5289_v45, 8388608.0  ;;  %v5292_v63 = vcvt.s32.f32 %v5291_v41  ;;  %v1488_v26 = vmul.f32 %v8329_v43, %v8193_v21  ;;  %v4306_v57 = vpop.f32.mrf.mxu0 }
 0x209   :  { %4463 = vmatmul.mubr.msk.f32.gmra.mxu1 %vm1785_vm2, %v5280_v9  ;;  %v5287_v29 = vor.u32 %v5286_v61, %v5285_v0  ;;  %v1619_v34 = vsub.f32 %v1487_v53, %v8323_v49  ;;  %2882 = vst.msk [vmem:[%s9822_s6 + $0x18] sm:$0xff] %vm165_vm0, %v2256_v14  ;;  %v1187_v11 = vadd.f32 %v8291_v27, %v8389_v30  ;;  %v8494_v8 = vpop.f32.mrf.mxu1 }
 0x20a   :  { %v5293_v51 = vand.u32 2147483647, %v5292_v63  ;;  %v2251_v41 = vadd.f32 %v8399_v24, %v7834_v10  ;;  %v1202_v61 = vadd.f32 %v8291_v27, %v4303_v3  ;;  %v1489_v58 = vmul.f32 %v8329_v43, %v8257_v1  ;;  %4051 = vmatprep.subr.msk.mxu1 %vm1785_vm2, %v5280_v9  ;;  %v1206_v14 = vpop.f32.mrf.mxu0 }
 0x20b   :  { %v8497_v4 = vpop.eup %5776  ;;  %v8501_v21 = vsel %vm8451_vm15, %v5287_v29, %v1617_v60  ;;  %v5297_v30 = vand.u32 2147483647, %v1619_v34  ;;  %v5299_v45 = vcvt.f32.s32 %v1619_v34  ;;  %v5302_v0 = vand.u32 2147483648, %v1619_v34  ;;  %v8511_v38 = vpop.f32.mrf.mxu1 }
 0x20c   :  { %10187 = vst [vmem:[#allocation41_spill] sm:$0xff] %v8501_v21  ;;  %4465 = vmatprep.mubr.msk.f32.mxu1 %vm1785_vm2, %v8501_v21  ;;  %v5295_v10 = vor.u32 %v5294_v44, %v5293_v51  ;;  %v1620_v3 = vsub.f32 %v1488_v26, %v8323_v49  ;;  %5784 = vtanh.f32 %v1187_v11  ;;  %2881 = vst.msk [vmem:[%s9822_s6 + $0x10] sm:$0xff] %vm165_vm0, %v2251_v41  ;;  %v5779_v9 = vpop.eup %5778  ;;  %v4309_v21 = vpop.f32.mrf.mxu0 }
 0x20d   :  { %v1621_v1 = vsub.f32 %v1489_v58, %v8323_v49  ;;  %vm8513_vm3 = vcmp.lt.f32.partialorder %v5297_v30, 8388608.0  ;;  %v5300_v53 = vcvt.s32.f32 %v5299_v45  ;;  %5786 = vtanh.f32 %v1202_v61 }
 0x20e   :  { %v2266_v44 = vadd.f32 %v7862_v28, %v8399_v24  ;;  %v8521_v63 = vsel %vm8475_vm1, %v5295_v10, %v1618_v23  ;;  %v5305_v29 = vand.u32 2147483647, %v1620_v3  ;;  %v5307_v26 = vcvt.f32.s32 %v1620_v3  ;;  %v8532_v28 = vpop.f32.mrf.mxu1 }
 0x20f   :  { %10190 = vst [vmem:[#allocation42_spill] sm:$0xff] %v8521_v63  ;;  %v5310_v11 = vand.u32 2147483648, %v1620_v3  ;;  %v8524_v51 = vmul.f32 %v8329_v43, %v5779_v9  ;;  %4466 = vmatmul.mubr.msk.f32.gmra.mxu1 %vm1785_vm2, %v8521_v63  ;;  %v5301_v41 = vand.u32 2147483647, %v5300_v53  ;;  %v5313_v61 = vand.u32 2147483647, %v1621_v1 }
 0x210   :  { %v5315_v58 = vcvt.f32.s32 %v1621_v1  ;;  %2884 = vst.msk [vmem:[%s9822_s6 + $0x28] sm:$0xff] %vm165_vm0, %v2266_v44  ;;  %vm8534_vm4 = vcmp.lt.f32.partialorder %v5305_v29, 8388608.0  ;;  %v5308_v62 = vcvt.s32.f32 %v5307_v26  ;;  %v5318_v30 = vand.u32 2147483648, %v1621_v1  ;;  %v8546_v63 = vpop.f32.mrf.mxu1 }
 0x211   :  { %v1490_v45 = vmul.f32 %v8329_v43, %v8238_v54  ;;  %v5303_v10 = vor.u32 %v5302_v0, %v5301_v41  ;;  %vm8540_vm5 = vcmp.lt.f32.partialorder %v5313_v61, 8388608.0  ;;  %v1197_v44 = vadd.f32 %v8291_v27, %v8457_v17 }
 0x212   :  { %v5316_v9 = vcvt.s32.f32 %v5315_v58  ;;  %v5309_v29 = vand.u32 2147483647, %v5308_v62  ;;  %v2261_v26 = vadd.f32 %v8399_v24, %v7885_v19  ;;  %v1212_v54 = vadd.f32 %v8291_v27, %v4306_v57  ;;  %v8558_v61 = vpop.eup %5780 }
 0x213   :  { %v1622_v48 = vsub.f32 %v1490_v45, %v8323_v49  ;;  %v8554_v0 = vsel %vm8513_vm3, %v5303_v10, %v1619_v34  ;;  %5788 = vtanh.f32 %v1197_v44  ;;  %v1491_v17 = vmul.f32 %v8329_v43, %v8304_v13  ;;  %v1216_v10 = vpop.f32.mrf.mxu0 }
 0x214   :  { %10195 = vst [vmem:[#allocation43_spill] sm:$0xff] %v8554_v0  ;;  %v5317_v41 = vand.u32 2147483647, %v5316_v9  ;;  %4468 = vmatprep.mubr.msk.f32.mxu1 %vm1785_vm2, %v8554_v0  ;;  %v5311_v58 = vor.u32 %v5310_v11, %v5309_v29  ;;  %2883 = vst.msk [vmem:[%s9822_s6 + $0x20] sm:$0xff] %vm165_vm0, %v2261_v26  ;;  %v5783_v34 = vpop.eup %5782  ;;  %5790 = vtanh.f32 %v1212_v54  ;;  %v2276_v13 = vadd.f32 %v7922_v56, %v8399_v24  ;;  %v8569_v9 = vpop.f32.mrf.mxu1 }
 0x215   :  { %v5321_v62 = vand.u32 2147483647, %v1622_v48  ;;  %v5323_v45 = vcvt.f32.s32 %v1622_v48  ;;  %v5326_v19 = vand.u32 2147483648, %v1622_v48  ;;  %v1623_v60 = vsub.f32 %v1491_v17, %v8323_v49 }
 0x216   :  { %v5319_v57 = vor.u32 %v5318_v30, %v5317_v41  ;;  %v8572_v11 = vmul.f32 %v8329_v43, %v5783_v34  ;;  %v8576_v44 = vsel %vm8534_vm4, %v5311_v58, %v1620_v3  ;;  %2886 = vst.msk [vmem:[%s9822_s6 + $0x38] sm:$0xff] %vm165_vm0, %v2276_v13  ;;  %v8592_v3 = vpop.f32.mrf.mxu1  ;;  %v1492_v17 = vmul.f32 %v8329_v43, %v8278_v52  ;;  %v4312_v13 = vpop.f32.mrf.mxu0 }
 0x217   :  { %10196 = vst [vmem:[#allocation44_spill] sm:$0xff] %v8576_v44  ;;  %vm8578_vm6 = vcmp.lt.f32.partialorder %v5321_v62, 8388608.0  ;;  %v5324_v30 = vcvt.s32.f32 %v5323_v45  ;;  %4469 = vmatmul.mubr.msk.f32.gmra.mxu1 %vm1785_vm2, %v8576_v44  ;;  %v5329_v26 = vand.u32 2147483647, %v1623_v60  ;;  %v5331_v54 = vcvt.f32.s32 %v1623_v60 }
 0x218   :  { %v8586_v56 = vsel %vm8540_vm5, %v5319_v57, %v1621_v1  ;;  %v5334_v41 = vand.u32 2147483648, %v1623_v60  ;;  %v1207_v1 = vadd.f32 %v8291_v27, %v1206_v14  ;;  %v2271_v53 = vadd.f32 %v8399_v24, %v7945_v12 }
 0x219   :  { %10199 = vst [vmem:[#allocation45_spill] sm:$0xff] %v8586_v56  ;;  %4471 = vmatprep.mubr.msk.f32.mxu1 %vm1785_vm2, %v8586_v56  ;;  %v5325_v23 = vand.u32 2147483647, %v5324_v30  ;;  %v8601_v58 = vpop.eup %5784  ;;  %vm8603_vm7 = vcmp.lt.f32.partialorder %v5329_v26, 8388608.0  ;;  %v5332_v45 = vcvt.s32.f32 %v5331_v54  ;;  %v1222_v34 = vadd.f32 %v8291_v27, %v4309_v21 }
 0x21a   :  { %v1493_v57 = vmul.f32 %v8329_v43, %v8354_v6  ;;  %v5787_v30 = vpop.eup %5786  ;;  %v1624_v14 = vsub.f32 %v1492_v17, %v8323_v49  ;;  %5792 = vtanh.f32 %v1207_v1  ;;  %2885 = vst.msk [vmem:[%s9822_s6 + $0x30] sm:$0xff] %vm165_vm0, %v2271_v53  ;;  %v2286_v12 = vadd.f32 %v7972_v50, %v8399_v24  ;;  %v8621_v54 = vpop.f32.mrf.mxu1 }
 0x21b   :  { %v5327_v52 = vor.u32 %v5326_v19, %v5325_v23  ;;  %v8618_v26 = vmul.f32 %v8329_v43, %v5787_v30  ;;  %v5333_v21 = vand.u32 2147483647, %v5332_v45  ;;  %5794 = vtanh.f32 %v1222_v34 }
 0x21c   :  { %v1625_v6 = vsub.f32 %v1493_v57, %v8323_v49  ;;  %v5337_v23 = vand.u32 2147483647, %v1624_v14  ;;  %v5339_v17 = vcvt.f32.s32 %v1624_v14  ;;  %v5342_v1 = vand.u32 2147483648, %v1624_v14  ;;  %2888 = vst.msk [vmem:[%s9822_s6 + $0x48] sm:$0xff] %vm165_vm0, %v2286_v12  ;;  %v1226_v57 = vpop.f32.mrf.mxu0  ;;  %v8633_v30 = vpop.f32.mrf.mxu1 }
 0x21d   :  { %v8625_v19 = vsel %vm8578_vm6, %v5327_v52, %v1622_v48  ;;  %v5335_v50 = vor.u32 %v5334_v41, %v5333_v21  ;;  %v1494_v52 = vmul.f32 %v8329_v43, %v8335_v18  ;;  %v1217_v12 = vadd.f32 %v8291_v27, %v1216_v10 }
 0x21e   :  { %10202 = vst [vmem:[#allocation46_spill] sm:$0xff] %v8625_v19  ;;  %4472 = vmatmul.mubr.msk.f32.gmra.mxu1 %vm1785_vm2, %v8625_v19  ;;  %v5345_v53 = vand.u32 2147483647, %v1625_v6  ;;  %v5347_v45 = vcvt.f32.s32 %v1625_v6  ;;  %v5350_v34 = vand.u32 2147483648, %v1625_v6  ;;  %vm8635_vm8 = vcmp.lt.f32.partialorder %v5337_v23, 8388608.0 }
 0x21f   :  { %v5340_v29 = vcvt.s32.f32 %v5339_v17  ;;  %v8644_v0 = vsel %vm8603_vm7, %v5335_v50, %v1623_v60  ;;  %v2281_v23 = vadd.f32 %v8399_v24, %v7993_v59  ;;  %v1626_v10 = vsub.f32 %v1494_v52, %v8323_v49 }
 0x220   :  { %10205 = vst [vmem:[#allocation47_spill] sm:$0xff] %v8644_v0  ;;  %vm8646_vm9 = vcmp.lt.f32.partialorder %v5345_v53, 8388608.0  ;;  %v5348_v21 = vcvt.s32.f32 %v5347_v45  ;;  %v8652_v44 = vpop.eup %5788  ;;  %4474 = vmatprep.mubr.msk.f32.mxu1 %vm1785_vm2, %v8644_v0  ;;  %5796 = vtanh.f32 %v1217_v12  ;;  %v1232_v60 = vadd.f32 %v8291_v27, %v4312_v13  ;;  %v4315_v53 = vpop.f32.mrf.mxu0 }
 0x221   :  { %v5341_v18 = vand.u32 2147483647, %v5340_v29  ;;  %2887 = vst.msk [vmem:[%s9822_s6 + $0x40] sm:$0xff] %vm165_vm0, %v2281_v23  ;;  %v1495_v59 = vmul.f32 %v8329_v43, %v8401_v35  ;;  %v2296_v17 = vadd.f32 %v8016_v5, %v8399_v24  ;;  %v1496_v50 = vmul.f32 %v8329_v43, %v8375_v15  ;;  %v8668_v45 = vpop.f32.mrf.mxu1  ;;  %v5791_v29 = vpop.eup %5790 }
 0x222   :  { %v5349_v62 = vand.u32 2147483647, %v5348_v21  ;;  %v5353_v52 = vand.u32 2147483647, %v1626_v10  ;;  %v5355_v12 = vcvt.f32.s32 %v1626_v10  ;;  %v5358_v21 = vand.u32 2147483648, %v1626_v10  ;;  %v1236_v48 = vpop.f32.mrf.mxu0 }
 0x223   :  { %v5343_v13 = vor.u32 %v5342_v1, %v5341_v18  ;;  %v8671_v56 = vmul.f32 %v8329_v43, %v5791_v29  ;;  %5798 = vtanh.f32 %v1232_v60  ;;  %v1627_v35 = vsub.f32 %v1495_v59, %v8323_v49  ;;  %2890 = vst.msk [vmem:[%s9822_s6 + $0x58] sm:$0xff] %vm165_vm0, %v2296_v17  ;;  %v8678_v5 = vpop.f32.mrf.mxu1 }
 0x224   :  { %v5351_v23 = vor.u32 %v5350_v34, %v5349_v62  ;;  %10208 = vst [vmem:[#allocation48_spill] sm:$0xff] %v8678_v5  ;;  %vm8684_vm10 = vcmp.lt.f32.partialorder %v5353_v52, 8388608.0  ;;  %v5356_v18 = vcvt.s32.f32 %v5355_v12  ;;  %v1628_v34 = vsub.f32 %v1496_v50, %v8323_v49 }
 0x225   :  { %v8682_v15 = vsel %vm8635_vm8, %v5343_v13, %v1624_v14  ;;  %v5361_v62 = vand.u32 2147483647, %v1627_v35  ;;  %v5363_v59 = vcvt.f32.s32 %v1627_v35  ;;  %v5366_v17 = vand.u32 2147483648, %v1627_v35 }
 0x226   :  { %10209 = vst [vmem:[#allocation49_spill] sm:$0xff] %v8682_v15  ;;  %4475 = vmatmul.mubr.msk.f32.gmra.mxu1 %vm1785_vm2, %v8682_v15  ;;  %v8693_v60 = vsel %vm8646_vm9, %v5351_v23, %v1625_v6  ;;  %v5357_v14 = vand.u32 2147483647, %v5356_v18  ;;  %v5369_v29 = vand.u32 2147483647, %v1628_v34  ;;  %v5371_v13 = vcvt.f32.s32 %v1628_v34 }
 0x227   :  { %10212 = vst [vmem:[#allocation50_spill] sm:$0xff] %v8693_v60  ;;  %4477 = vmatprep.mubr.msk.f32.mxu1 %vm1785_vm2, %v8693_v60  ;;  %v5374_v52 = vand.u32 2147483648, %v1628_v34  ;;  %v8697_v12 = vpop.eup %5792  ;;  %vm8699_vm11 = vcmp.lt.f32.partialorder %v5361_v62, 8388608.0  ;;  %v5364_v41 = vcvt.s32.f32 %v5363_v59  ;;  %v1227_v6 = vadd.f32 %v8291_v27, %v1226_v57  ;;  %v8706_v19 = vpop.f32.mrf.mxu1 }
 0x228   :  { %v2291_v23 = vadd.f32 %v8399_v24, %v8039_v46  ;;  %v5795_v0 = vpop.eup %5794  ;;  %v5359_v15 = vor.u32 %v5358_v21, %v5357_v14  ;;  %vm8708_vm12 = vcmp.lt.f32.partialorder %v5369_v29, 8388608.0  ;;  %v5372_v60 = vcvt.s32.f32 %v5371_v13  ;;  %v4318_v57 = vpop.f32.mrf.mxu0 }
 0x229   :  { %v1242_v62 = vadd.f32 %v8291_v27, %v4315_v53  ;;  %v8714_v5 = vmul.f32 %v8329_v43, %v5795_v0  ;;  %v5365_v59 = vand.u32 2147483647, %v5364_v41  ;;  %5800 = vtanh.f32 %v1227_v6  ;;  %v8722_v21 = vpop.f32.mrf.mxu1 }
 0x22a   :  { %2889 = vst.msk [vmem:[%s9822_s6 + $0x50] sm:$0xff] %vm165_vm0, %v2291_v23  ;;  %v1497_v46 = vmul.f32 %v8329_v43, %v8445_v36  ;;  %v8726_v14 = vsel %vm8684_vm10, %v5359_v15, %v1626_v10  ;;  %v5373_v53 = vand.u32 2147483647, %v5372_v60  ;;  %v2306_v0 = vadd.f32 %v8066_v33, %v8399_v24 }
 0x22b   :  { %10217 = vst [vmem:[#allocation51_spill] sm:$0xff] %v8726_v14  ;;  %5802 = vtanh.f32 %v1242_v62  ;;  %4478 = vmatmul.mubr.msk.f32.gmra.mxu1 %vm1785_vm2, %v8726_v14  ;;  %v5367_v29 = vor.u32 %v5366_v17, %v5365_v59  ;;  %v1498_v36 = vmul.f32 %v8329_v43, %v8420_v32  ;;  %v1237_v41 = vadd.f32 %v8291_v27, %v1236_v48 }
 0x22c   :  { %v1629_v13 = vsub.f32 %v1497_v46, %v8323_v49  ;;  %v5375_v6 = vor.u32 %v5374_v52, %v5373_v53  ;;  %2892 = vst.msk [vmem:[%s9822_s6 + $0x68] sm:$0xff] %vm165_vm0, %v2306_v0  ;;  %v2301_v33 = vadd.f32 %v8399_v24, %v8087_v42  ;;  %v1252_v10 = vadd.f32 %v8291_v27, %v4318_v57  ;;  %v1246_v0 = vpop.f32.mrf.mxu0 }
 0x22d   :  { %v1499_v15 = vmul.f32 %v8329_v43, %v8497_v4  ;;  %v8745_v1 = vpop.eup %5796  ;;  %v8749_v32 = vsel %vm8699_vm11, %v5367_v29, %v1627_v35  ;;  %v8751_v52 = vpop.f32.mrf.mxu1  ;;  %v1630_v4 = vsub.f32 %v1498_v36, %v8323_v49  ;;  %5804 = vtanh.f32 %v1237_v41 }
 0x22e   :  { %10218 = vst [vmem:[#allocation52_spill] sm:$0xff] %v8749_v32  ;;  %v5377_v60 = vand.u32 2147483647, %v1629_v13  ;;  %v5379_v17 = vcvt.f32.s32 %v1629_v13  ;;  %v5382_v48 = vand.u32 2147483648, %v1629_v13  ;;  %4480 = vmatprep.mubr.msk.f32.mxu1 %vm1785_vm2, %v8749_v32  ;;  %v8757_v42 = vsel %vm8708_vm12, %v5375_v6, %v1628_v34  ;;  %2891 = vst.msk [vmem:[%s9822_s6 + $0x60] sm:$0xff] %vm165_vm0, %v2301_v33 }
 0x22f   :  { %10219 = vst [vmem:[#allocation53_spill] sm:$0xff] %v8757_v42  ;;  %v1631_v35 = vsub.f32 %v1499_v15, %v8323_v49  ;;  %4481 = vmatmul.mubr.msk.f32.gmra.mxu1 %vm1785_vm2, %v8757_v42  ;;  %5806 = vtanh.f32 %v1252_v10  ;;  %v2316_v34 = vadd.f32 %v8110_v40, %v8399_v24  ;;  %v8773_v18 = vpop.f32.mrf.mxu1  ;;  %v5385_v59 = vand.u32 2147483647, %v1630_v4 }
 0x230   :  { %vm8767_vm13 = vcmp.lt.f32.partialorder %v5377_v60, 8388608.0  ;;  %v5380_v23 = vcvt.s32.f32 %v5379_v17  ;;  %v5799_v62 = vpop.eup %5798  ;;  %v5387_v46 = vcvt.f32.s32 %v1630_v4  ;;  %v5390_v57 = vand.u32 2147483648, %v1630_v4 }
 0x231   :  { %v5393_v53 = vand.u32 2147483647, %v1631_v35  ;;  %v8776_v29 = vmul.f32 %v8329_v43, %v5799_v62  ;;  %v5395_v41 = vcvt.f32.s32 %v1631_v35  ;;  %v5398_v6 = vand.u32 2147483648, %v1631_v35  ;;  %2894 = vst.msk [vmem:[%s9822_s6 + $0x78] sm:$0xff] %vm165_vm0, %v2316_v34 }
 0x232   :  { %v5381_v36 = vand.u32 2147483647, %v5380_v23  ;;  %vm8782_vm14 = vcmp.lt.f32.partialorder %v5385_v59, 8388608.0  ;;  %v5388_v33 = vcvt.s32.f32 %v5387_v46  ;;  %v1500_v15 = vmul.f32 %v8329_v43, %v8471_v25 }
 0x233   :  { %vm8786_vm15 = vcmp.lt.f32.partialorder %v5393_v53, 8388608.0  ;;  %v5396_v17 = vcvt.s32.f32 %v5395_v41  ;;  %v1247_v23 = vadd.f32 %v8291_v27, %v1246_v0  ;;  %v2311_v62 = vadd.f32 %v8399_v24, %v8133_v55  ;;  %v8795_v34 = vpop.f32.mrf.mxu1 }
 0x234   :  { %v5383_v60 = vor.u32 %v5382_v48, %v5381_v36  ;;  %v5389_v59 = vand.u32 2147483647, %v5388_v33  ;;  %v1632_v14 = vsub.f32 %v1500_v15, %v8323_v49  ;;  %v1501_v46 = vmul.f32 %v8329_v43, %v8558_v61 }
 0x235   :  { %v2326_v53 = vadd.f32 %v8160_v47, %v8399_v24  ;;  %v5397_v48 = vand.u32 2147483647, %v5396_v17  ;;  %5808 = vtanh.f32 %v1247_v23  ;;  %2893 = vst.msk [vmem:[%s9822_s6 + $0x70] sm:$0xff] %vm165_vm0, %v2311_v62  ;;  %v1634_v55 = vsub.f32 %v8524_v51, %v8323_v49  ;;  %v8812_v27 = vpop.f32.mrf.mxu1 }
 0x236   :  { %v8804_v25 = vsel %vm8767_vm13, %v5383_v60, %v1629_v13  ;;  %v8814_v61 = vpop.eup %5800  ;;  %v5391_v47 = vor.u32 %v5390_v57, %v5389_v59  ;;  %v5401_v13 = vand.u32 2147483647, %v1632_v14  ;;  %v5403_v50 = vcvt.f32.s32 %v1632_v14 }
 0x237   :  { %4483 = vmatprep.mubr.msk.f32.mxu1 %vm1785_vm2, %v8804_v25  ;;  %v5406_v0 = vand.u32 2147483648, %v1632_v14  ;;  %2896 = vst.msk [vmem:[%s9822_s6 + $0x88] sm:$0xff] %vm165_vm0, %v2326_v53  ;;  %v5399_v41 = vor.u32 %v5398_v6, %v5397_v48  ;;  %v1633_v51 = vsub.f32 %v1501_v46, %v8323_v49  ;;  %v5417_v33 = vand.u32 2147483647, %v1634_v55 }
 0x238   :  { %v5803_v36 = vpop.eup %5802  ;;  %v5419_v15 = vcvt.f32.s32 %v1634_v55  ;;  %v8828_v57 = vsel %vm8782_vm14, %v5391_v47, %v1630_v4  ;;  %vm8830_vm1 = vcmp.lt.f32.partialorder %v5401_v13, 8388608.0  ;;  %v5404_v23 = vcvt.s32.f32 %v5403_v50 }
 0x239   :  { %v8824_v60 = vmul.f32 %v8329_v43, %v5803_v36  ;;  %4484 = vmatmul.mubr.msk.f32.gmra.mxu1 %vm1785_vm2, %v8828_v57  ;;  %v8838_v6 = vsel %vm8786_vm15, %v5399_v41, %v1631_v35  ;;  %v5409_v62 = vand.u32 2147483647, %v1633_v51  ;;  %v5411_v59 = vcvt.f32.s32 %v1633_v51  ;;  %v8840_v53 = vpop.f32.mrf.mxu1 }
 0x23a   :  { %v5414_v46 = vand.u32 2147483648, %v1633_v51  ;;  %4486 = vmatprep.mubr.msk.f32.mxu1 %vm1785_vm2, %v8838_v6  ;;  %v5405_v4 = vand.u32 2147483647, %v5404_v23  ;;  %vm8844_vm3 = vcmp.lt.f32.partialorder %v5417_v33, 8388608.0  ;;  %v5420_v48 = vcvt.s32.f32 %v5419_v15  ;;  %v8848_v13 = vpop.eup %5804 }
 0x23b   :  { %v5422_v47 = vand.u32 2147483648, %v1634_v55  ;;  %vm8850_vm4 = vcmp.lt.f32.partialorder %v5409_v62, 8388608.0  ;;  %v5412_v10 = vcvt.s32.f32 %v5411_v59  ;;  %v2321_v50 = vadd.f32 %v8399_v24, %v8181_v2  ;;  %v8858_v41 = vpop.f32.mrf.mxu1 }
 0x23c   :  { %v1503_v36 = vmul.f32 %v8329_v43, %v8601_v58  ;;  %v8860_v33 = vpop.eup %5806  ;;  %v5407_v23 = vor.u32 %v5406_v0, %v5405_v4  ;;  %v5421_v15 = vand.u32 2147483647, %v5420_v48  ;;  %v2336_v32 = vadd.f32 %v8205_v39, %v8399_v24 }
 0x23d   :  { %v1636_v62 = vsub.f32 %v8572_v11, %v8323_v49  ;;  %v5413_v42 = vand.u32 2147483647, %v5412_v10  ;;  %2895 = vst.msk [vmem:[%s9822_s6 + $0x80] sm:$0xff] %vm165_vm0, %v2321_v50  ;;  %v2331_v58 = vadd.f32 %v8399_v24, %v8228_v22  ;;  %v1505_v0 = vmul.f32 %v8329_v43, %v8652_v44 }
 0x23e   :  { %v1635_v2 = vsub.f32 %v1503_v36, %v8323_v49  ;;  %v8877_v39 = vsel %vm8830_vm1, %v5407_v23, %v1632_v14  ;;  %v5423_v59 = vor.u32 %v5422_v47, %v5421_v15  ;;  %2898 = vst.msk [vmem:[%s9822_s6 + $0x98] sm:$0xff] %vm165_vm0, %v2336_v32  ;;  %v2346_v35 = vadd.f32 %v8252_v16, %v8399_v24 }
 0x23f   :  { %v5433_v11 = vand.u32 2147483647, %v1636_v62  ;;  %v5435_v4 = vcvt.f32.s32 %v1636_v62  ;;  %4487 = vmatmul.mubr.msk.f32.gmra.mxu1 %vm1785_vm2, %v8877_v39  ;;  %v5415_v48 = vor.u32 %v5414_v46, %v5413_v42  ;;  %2897 = vst.msk [vmem:[%s9822_s6 + $0x90] sm:$0xff] %vm165_vm0, %v2331_v58  ;;  %v8889_v44 = vpop.f32.mrf.mxu1  ;;  %v5438_v42 = vand.u32 2147483648, %v1636_v62 }
 0x240   :  { %v5425_v22 = vand.u32 2147483647, %v1635_v2  ;;  %v5427_v10 = vcvt.f32.s32 %v1635_v2  ;;  %v5430_v50 = vand.u32 2147483648, %v1635_v2  ;;  %v8893_v14 = vsel %vm8844_vm3, %v5423_v59, %v1634_v55  ;;  %2900 = vst.msk [vmem:[%s9822_s6 + $0xa8] sm:$0xff] %vm165_vm0, %v2346_v35 }
 0x241   :  { %10232 = vst [vmem:[#allocation54_spill] sm:$0xff] %v8893_v14  ;;  %vm8895_vm5 = vcmp.lt.f32.partialorder %v5433_v11, 8388608.0  ;;  %v5436_v17 = vcvt.s32.f32 %v5435_v4  ;;  %v8901_v46 = vsel %vm8850_vm4, %v5415_v48, %v1633_v51  ;;  %v1637_v23 = vsub.f32 %v1505_v0, %v8323_v49  ;;  %v8908_v40 = vpop.f32.mrf.mxu1 }
 0x242   :  { %10235 = vst [vmem:[#allocation55_spill] sm:$0xff] %v8901_v46  ;;  %vm8903_vm6 = vcmp.lt.f32.partialorder %v5425_v22, 8388608.0  ;;  %v5428_v36 = vcvt.s32.f32 %v5427_v10  ;;  %v8910_v55 = vpop.eup %5808  ;;  %4489 = vmatprep.mubr.msk.f32.mxu1 %vm1785_vm2, %v8901_v46  ;;  %v1638_v51 = vsub.f32 %v8618_v26, %v8323_v49  ;;  %v2341_v58 = vadd.f32 %v8399_v24, %v8271_v31 }
 0x243   :  { %v5437_v15 = vand.u32 2147483647, %v5436_v17  ;;  %4490 = vmatmul.mubr.msk.f32.gmra.mxu1 %vm1785_vm2, %v8893_v14  ;;  %v5441_v59 = vand.u32 2147483647, %v1637_v23  ;;  %v5443_v11 = vcvt.f32.s32 %v1637_v23  ;;  %v5446_v4 = vand.u32 2147483648, %v1637_v23 }
 0x244   :  { %v5429_v0 = vand.u32 2147483647, %v5428_v36  ;;  %v5449_v16 = vand.u32 2147483647, %v1638_v51  ;;  %v5451_v22 = vcvt.f32.s32 %v1638_v51  ;;  %v5454_v10 = vand.u32 2147483648, %v1638_v51  ;;  %2899 = vst.msk [vmem:[%s9822_s6 + $0xa0] sm:$0xff] %vm165_vm0, %v2341_v58 }
 0x245   :  { %v5439_v48 = vor.u32 %v5438_v42, %v5437_v15  ;;  %vm8930_vm7 = vcmp.lt.f32.partialorder %v5441_v59, 8388608.0  ;;  %v5444_v17 = vcvt.s32.f32 %v5443_v11  ;;  %v1507_v42 = vmul.f32 %v8329_v43, %v8697_v12  ;;  %v8936_v36 = vpop.f32.mrf.mxu1 }
 0x246   :  { %v5431_v31 = vor.u32 %v5430_v50, %v5429_v0  ;;  %vm8942_vm8 = vcmp.lt.f32.partialorder %v5449_v16, 8388608.0  ;;  %v5452_v58 = vcvt.s32.f32 %v5451_v22  ;;  %v2356_v50 = vadd.f32 %v8299_v37, %v8399_v24  ;;  %v10244_v37 = vld [vmem:[#allocation30_spill] sm:$0xff] }
 0x247   :  { %v8940_v15 = vsel %vm8895_vm5, %v5439_v48, %v1636_v62  ;;  %v5445_v59 = vand.u32 2147483647, %v5444_v17  ;;  %v1639_v12 = vsub.f32 %v1507_v42, %v8323_v49  ;;  %v1640_v32 = vsub.f32 %v8671_v56, %v8323_v49  ;;  %v8955_v62 = vpop.f32.mrf.mxu1  ;;  %v10245_v48 = vld [vmem:[#allocation32_spill] sm:$0xff] }
 0x248   :  { %10240 = vst [vmem:[#allocation56_spill] sm:$0xff] %v8940_v15  ;;  %v8950_v0 = vsel %vm8903_vm6, %v5431_v31, %v1635_v2  ;;  %v5453_v11 = vand.u32 2147483647, %v5452_v58  ;;  %2902 = vst.msk [vmem:[%s9822_s6 + $0xb8] sm:$0xff] %vm165_vm0, %v2356_v50  ;;  %v2351_v2 = vadd.f32 %v8399_v24, %v10244_v37  ;;  %v1509_v47 = vmul.f32 %v8329_v43, %v8745_v1 }
 0x249   :  { %10243 = vst [vmem:[#allocation57_spill] sm:$0xff] %v8950_v0  ;;  %4492 = vmatprep.mubr.msk.f32.mxu1 %vm1785_vm2, %v8950_v0  ;;  %v2366_v56 = vadd.f32 %v10245_v48, %v8399_v24  ;;  %v5447_v16 = vor.u32 %v5446_v4, %v5445_v59  ;;  %v5457_v22 = vand.u32 2147483647, %v1639_v12  ;;  %v5459_v31 = vcvt.f32.s32 %v1639_v12 }
 0x24a   :  { %4493 = vmatmul.mubr.msk.f32.gmra.mxu1 %vm1785_vm2, %v8940_v15  ;;  %v5462_v17 = vand.u32 2147483648, %v1639_v12  ;;  %v5455_v42 = vor.u32 %v5454_v10, %v5453_v11  ;;  %v5465_v58 = vand.u32 2147483647, %v1640_v32  ;;  %v5467_v46 = vcvt.f32.s32 %v1640_v32  ;;  %2901 = vst.msk [vmem:[%s9822_s6 + $0xb0] sm:$0xff] %vm165_vm0, %v2351_v2 }
 0x24b   :  { %v5470_v50 = vand.u32 2147483648, %v1640_v32  ;;  %2904 = vst.msk [vmem:[%s9822_s6 + $0xc8] sm:$0xff] %vm165_vm0, %v2366_v56  ;;  %v8981_v1 = vsel %vm8930_vm7, %v5447_v16, %v1637_v23  ;;  %vm8983_vm9 = vcmp.lt.f32.partialorder %v5457_v22, 8388608.0  ;;  %v5460_v10 = vcvt.s32.f32 %v5459_v31  ;;  %v8988_v11 = vpop.f32.mrf.mxu1 }
 0x24c   :  { %10246 = vst [vmem:[#allocation30_spill] sm:$0xff] %v8981_v1  ;;  %v1641_v59 = vsub.f32 %v1509_v47, %v8323_v49  ;;  %4495 = vmatprep.mubr.msk.f32.mxu1 %vm1785_vm2, %v8981_v1  ;;  %v8994_v37 = vsel %vm8942_vm8, %v5455_v42, %v1638_v51  ;;  %vm8996_vm10 = vcmp.lt.f32.partialorder %v5465_v58, 8388608.0  ;;  %v5468_v23 = vcvt.s32.f32 %v5467_v46 }
 0x24d   :  { %v1642_v2 = vsub.f32 %v8714_v5, %v8323_v49  ;;  %v5461_v47 = vand.u32 2147483647, %v5460_v10  ;;  %v9004_v22 = vpop.f32.mrf.mxu1  ;;  %v10253_v5 = vld [vmem:[#allocation34_spill] sm:$0xff] }
 0x24e   :  { %4496 = vmatmul.mubr.msk.f32.gmra.mxu1 %vm1785_vm2, %v8994_v37  ;;  %v5473_v48 = vand.u32 2147483647, %v1641_v59  ;;  %v5475_v56 = vcvt.f32.s32 %v1641_v59  ;;  %v5478_v16 = vand.u32 2147483648, %v1641_v59  ;;  %v5469_v35 = vand.u32 2147483647, %v5468_v23 }
 0x24f   :  { %v5481_v51 = vand.u32 2147483647, %v1642_v2  ;;  %v5483_v31 = vcvt.f32.s32 %v1642_v2  ;;  %v5486_v42 = vand.u32 2147483648, %v1642_v2  ;;  %v5463_v58 = vor.u32 %v5462_v17, %v5461_v47 }
 0x250   :  { %vm9006_vm11 = vcmp.lt.f32.partialorder %v5473_v48, 8388608.0  ;;  %v5476_v46 = vcvt.s32.f32 %v5475_v56  ;;  %v2361_v0 = vadd.f32 %v8399_v24, %v10253_v5  ;;  %v5471_v15 = vor.u32 %v5470_v50, %v5469_v35  ;;  %v10256_v50 = vld [vmem:[#allocation36_spill] sm:$0xff] }
 0x251   :  { %vm9012_vm12 = vcmp.lt.f32.partialorder %v5481_v51, 8388608.0  ;;  %v5484_v1 = vcvt.s32.f32 %v5483_v31  ;;  %v1511_v23 = vmul.f32 %v8329_v43, %v8814_v61  ;;  %v9020_v17 = vsel %vm8983_vm9, %v5463_v58, %v1639_v12  ;;  %v9030_v35 = vpop.f32.mrf.mxu1 }
 0x252   :  { %v5477_v47 = vand.u32 2147483647, %v5476_v46  ;;  %2903 = vst.msk [vmem:[%s9822_s6 + $0xc0] sm:$0xff] %vm165_vm0, %v2361_v0  ;;  %v2376_v48 = vadd.f32 %v10256_v50, %v8399_v24  ;;  %v1644_v56 = vsub.f32 %v8776_v29, %v8323_v49  ;;  %4498 = vmatprep.mubr.msk.f32.mxu1 %vm1785_vm2, %v9020_v17  ;;  %v9036_v43 = vsel %vm8996_vm10, %v5471_v15, %v1640_v32 }
 0x253   :  { %v5485_v61 = vand.u32 2147483647, %v5484_v1  ;;  %v1643_v12 = vsub.f32 %v1511_v23, %v8323_v49  ;;  %v2371_v0 = vadd.f32 %v8399_v24, %v8413_v7  ;;  %4499 = vmatmul.mubr.msk.f32.gmra.mxu1 %vm1785_vm2, %v9036_v43  ;;  %v9047_v15 = vpop.f32.mrf.mxu1  ;;  %v10261_v23 = vld [vmem:[#allocation39_spill] sm:$0xff] }
 0x254   :  { %v5479_v4 = vor.u32 %v5478_v16, %v5477_v47  ;;  %2906 = vst.msk [vmem:[%s9822_s6 + $0xd8] sm:$0xff] %vm165_vm0, %v2376_v48  ;;  %v5497_v29 = vand.u32 2147483647, %v1644_v56  ;;  %v5499_v51 = vcvt.f32.s32 %v1644_v56  ;;  %v5502_v26 = vand.u32 2147483648, %v1644_v56 }
 0x255   :  { %v5487_v32 = vor.u32 %v5486_v42, %v5485_v61  ;;  %v5489_v1 = vand.u32 2147483647, %v1643_v12  ;;  %v5491_v49 = vcvt.f32.s32 %v1643_v12  ;;  %v5494_v31 = vand.u32 2147483648, %v1643_v12  ;;  %2905 = vst.msk [vmem:[%s9822_s6 + $0xd0] sm:$0xff] %vm165_vm0, %v2371_v0  ;;  %v5819_v42 = vld [vmem:[%s9821_s5 + $0x8] ss:$0 sm:$0xff] }
 0x256   :  { %v9055_v7 = vsel %vm9006_vm11, %v5479_v4, %v1641_v59  ;;  %vm9057_vm13 = vcmp.lt.f32.partialorder %v5497_v29, 8388608.0  ;;  %v5500_v58 = vcvt.s32.f32 %v5499_v51  ;;  %v1513_v46 = vmul.f32 %v5819_v42, %v8848_v13  ;;  %v5820_v13 = vld [vmem:[%s9821_s5 + $0x9] ss:$0 sm:$0xff] }
 0x257   :  { %4501 = vmatprep.mubr.msk.f32.mxu1 %vm1785_vm2, %v9055_v7  ;;  %v9069_v5 = vsel %vm9012_vm12, %v5487_v32, %v1642_v2  ;;  %vm9071_vm14 = vcmp.lt.f32.partialorder %v5489_v1, 8388608.0  ;;  %v5492_v59 = vcvt.s32.f32 %v5491_v49  ;;  %v2386_v47 = vadd.f32 %v10261_v23, %v8399_v24  ;;  %v9084_v61 = vpop.f32.mrf.mxu1 }
 0x258   :  { %4502 = vmatmul.mubr.msk.f32.gmra.mxu1 %vm1785_vm2, %v9069_v5  ;;  %v5501_v50 = vand.u32 2147483647, %v5500_v58  ;;  %v1645_v48 = vsub.f32 %v1513_v46, %v5820_v13  ;;  %v1646_v2 = vsub.f32 %v8824_v60, %v5820_v13  ;;  %v1516_v10 = vmul.f32 %v5819_v42, %v8860_v33 }
 0x259   :  { %v5493_v0 = vand.u32 2147483647, %v5492_v59  ;;  %2908 = vst.msk [vmem:[%s9822_s6 + $0xe8] sm:$0xff] %vm165_vm0, %v2386_v47  ;;  %v2381_v4 = vadd.f32 %v8399_v24, %v8465_v20  ;;  %v1515_v29 = vmul.f32 %v5819_v42, %v8910_v55  ;;  %v2396_v51 = vadd.f32 %v8494_v8, %v8399_v24  ;;  %v9095_v49 = vpop.f32.mrf.mxu1 }
 0x25a   :  { %v5503_v32 = vor.u32 %v5502_v26, %v5501_v50  ;;  %v5505_v60 = vand.u32 2147483647, %v1645_v48  ;;  %v5507_v1 = vcvt.f32.s32 %v1645_v48  ;;  %v5510_v33 = vand.u32 2147483648, %v1645_v48 }
 0x25b   :  { %v5495_v58 = vor.u32 %v5494_v31, %v5493_v0  ;;  %v5513_v46 = vand.u32 2147483647, %v1646_v2  ;;  %v5515_v59 = vcvt.f32.s32 %v1646_v2  ;;  %v5518_v23 = vand.u32 2147483648, %v1646_v2  ;;  %2907 = vst.msk [vmem:[%s9822_s6 + $0xe0] sm:$0xff] %vm165_vm0, %v2381_v4  ;;  %2910 = vst.msk [vmem:[%s9822_s6 + $0xf8] sm:$0xff] %vm165_vm0, %v2396_v51 }
 0x25c   :  { %v9107_v24 = vsel %vm9057_vm13, %v5503_v32, %v1644_v56  ;;  %vm9109_vm15 = vcmp.lt.f32.partialorder %v5505_v60, 8388608.0  ;;  %v5508_v8 = vcvt.s32.f32 %v5507_v1  ;;  %v1648_v55 = vsub.f32 %v1516_v10, %v5820_v13  ;;  %v10272_v60 = vld [vmem:[#allocation40_spill] sm:$0xff] }
 0x25d   :  { %v9115_v26 = vsel %vm9071_vm14, %v5495_v58, %v1643_v12  ;;  %vm9117_vm1 = vcmp.lt.f32.partialorder %v5513_v46, 8388608.0  ;;  %v5516_v42 = vcvt.s32.f32 %v5515_v59  ;;  %v1647_v47 = vsub.f32 %v1515_v29, %v5820_v13  ;;  %v9123_v4 = vpop.f32.mrf.mxu1  ;;  %v9134_v29 = vld [vmem:[%s9820_s4] ss:$0 sm:$0xff]  ;;  %v10274_v59 = vld [vmem:[#allocation38_spill] sm:$0xff] }
 0x25e   :  { %4504 = vmatprep.mubr.msk.f32.mxu1 %vm1785_vm2, %v9115_v26  ;;  %v5509_v56 = vand.u32 2147483647, %v5508_v8  ;;  %v5529_v16 = vand.u32 2147483647, %v1648_v55  ;;  %v5531_v50 = vcvt.f32.s32 %v1648_v55  ;;  %v5534_v0 = vand.u32 2147483648, %v1648_v55 }
 0x25f   :  { %4505 = vmatmul.mubr.msk.f32.gmra.mxu1 %vm1785_vm2, %v9107_v24  ;;  %v5517_v12 = vand.u32 2147483647, %v5516_v42  ;;  %v5521_v14 = vand.u32 2147483647, %v1647_v47  ;;  %v5523_v10 = vcvt.f32.s32 %v1647_v47  ;;  %v5526_v51 = vand.u32 2147483648, %v1647_v47  ;;  %v9138_v58 = vpop.f32.mrf.mxu1 }
 0x260   :  { %v5511_v32 = vor.u32 %v5510_v33, %v5509_v56  ;;  %vm9127_vm3 = vcmp.lt.f32.partialorder %v5529_v16, 8388608.0  ;;  %v5532_v13 = vcvt.s32.f32 %v5531_v50  ;;  %v2391_v1 = vadd.f32 %v9134_v29, %v8511_v38 }
 0x261   :  { %v5519_v46 = vor.u32 %v5518_v23, %v5517_v12  ;;  %vm9140_vm4 = vcmp.lt.f32.partialorder %v5521_v14, 8388608.0  ;;  %v5524_v33 = vcvt.s32.f32 %v5523_v10  ;;  %v2406_v8 = vadd.f32 %v9134_v29, %v8532_v28 }
 0x262   :  { %v9148_v42 = vsel %vm9109_vm15, %v5511_v32, %v1645_v48  ;;  %v5533_v56 = vand.u32 2147483647, %v5532_v13  ;;  %2909 = vst.msk [vmem:[%s9822_s6 + $0xf0] sm:$0xff] %vm165_vm0, %v2391_v1  ;;  %v2401_v38 = vadd.f32 %v9134_v29, %v8546_v63  ;;  %v2416_v23 = vadd.f32 %v9134_v29, %v8569_v9 }
 0x263   :  { %4507 = vmatprep.mubr.msk.f32.mxu1 %vm1785_vm2, %v9148_v42  ;;  %v9162_v28 = vsel %vm9117_vm1, %v5519_v46, %v1646_v2  ;;  %v5525_v48 = vand.u32 2147483647, %v5524_v33  ;;  %2912 = vst.msk [vmem:[%s9822_s6 + $0x108] sm:$0xff] %vm165_vm0, %v2406_v8  ;;  %v2411_v20 = vadd.f32 %v9134_v29, %v8592_v3  ;;  %v2426_v63 = vadd.f32 %v9134_v29, %v8621_v54  ;;  %v10270_v2 = vld [vmem:[#allocation48_spill] sm:$0xff]  ;;  %v4413_v16 = vpop.f32.mrf.mxu1 }
 0x264   :  { %4508 = vmatmul.mubr.msk.f32.gmra.mxu1 %vm1785_vm2, %v9162_v28  ;;  %v5535_v9 = vor.u32 %v5534_v0, %v5533_v56  ;;  %2911 = vst.msk [vmem:[%s9822_s6 + $0x100] sm:$0xff] %vm165_vm0, %v2401_v38  ;;  %2914 = vst.msk [vmem:[%s9822_s6 + $0x118] sm:$0xff] %vm165_vm0, %v2416_v23  ;;  %v2421_v3 = vadd.f32 %v9134_v29, %v8633_v30  ;;  %v2436_v54 = vadd.f32 %v9134_v29, %v8668_v45  ;;  %v10275_v33 = vld [vmem:[#allocation24_spill] sm:$0xff]  ;;  %v10277_v38 = vld [vmem:[#allocation53_spill] sm:$0xff] }
 0x265   :  { %v2431_v31 = vadd.f32 %v9134_v29, %v10270_v2  ;;  %v5527_v50 = vor.u32 %v5526_v51, %v5525_v48  ;;  %2913 = vst.msk [vmem:[%s9822_s6 + $0x110] sm:$0xff] %vm165_vm0, %v2411_v20  ;;  %2916 = vst.msk [vmem:[%s9822_s6 + $0x128] sm:$0xff] %vm165_vm0, %v2426_v63  ;;  %v2446_v30 = vadd.f32 %v9134_v29, %v8706_v19  ;;  %v10271_v51 = vld [vmem:[#allocation23_spill] sm:$0xff]  ;;  %v10278_v23 = vld [vmem:[#allocation9_spill] sm:$0xff] }
 0x266   :  { %v2441_v45 = vadd.f32 %v9134_v29, %v8722_v21  ;;  %v2456_v0 = vadd.f32 %v9134_v29, %v8751_v52  ;;  %v5536_v12 = vsel %vm9127_vm3, %v5535_v9, %v1648_v55  ;;  %2915 = vst.msk [vmem:[%s9822_s6 + $0x120] sm:$0xff] %vm165_vm0, %v2421_v3  ;;  %2918 = vst.msk [vmem:[%s9822_s6 + $0x138] sm:$0xff] %vm165_vm0, %v2436_v54  ;;  %v10280_v48 = vld [vmem:[#allocation52_spill] sm:$0xff]  ;;  %v10281_v63 = vld [vmem:[#allocation25_spill] sm:$0xff] }
 0x267   :  { %2917 = vst.msk [vmem:[%s9822_s6 + $0x130] sm:$0xff] %vm165_vm0, %v2431_v31  ;;  %v2451_v19 = vadd.f32 %v9134_v29, %v8773_v18  ;;  %v2466_v21 = vadd.f32 %v9134_v29, %v8795_v34  ;;  %v2461_v52 = vadd.f32 %v9134_v29, %v8812_v27  ;;  %4085 = vmatprep.subr.msk.mxu0 %vm1785_vm2, %v5536_v12  ;;  %2920 = vst.msk [vmem:[%s9822_s6 + $0x148] sm:$0xff] %vm165_vm0, %v2446_v30  ;;  %v10282_v3 = vld [vmem:[#allocation33_spill] sm:$0xff]  ;;  %v10283_v2 = vld [vmem:[#allocation51_spill] sm:$0xff] }
 0x268   :  { %v5528_v55 = vsel %vm9140_vm4, %v5527_v50, %v1647_v47  ;;  %2919 = vst.msk [vmem:[%s9822_s6 + $0x140] sm:$0xff] %vm165_vm0, %v2441_v45  ;;  %2922 = vst.msk [vmem:[%s9822_s6 + $0x158] sm:$0xff] %vm165_vm0, %v2456_v0  ;;  %v2476_v18 = vadd.f32 %v9134_v29, %v8840_v53  ;;  %v2471_v34 = vadd.f32 %v9134_v29, %v8858_v41  ;;  %v2540_v47 = vpop.f32.mrf.mxu1  ;;  %4086 = vmatpush3.xpose.msk.msra.mxu0 %vm1785_vm2, %v8877_v39  ;;  %v10286_v30 = vld [vmem:[#allocation50_spill] sm:$0xff]  ;;  %v10287_v0 = vld [vmem:[#allocation28_spill] sm:$0xff] }
 0x269   :  { %v2486_v27 = vadd.f32 %v9134_v29, %v8889_v44  ;;  %4510 = vmatprep.mubr.msk.f32.mxu1 %vm1785_vm2, %v5528_v55  ;;  %2921 = vst.msk [vmem:[%s9822_s6 + $0x150] sm:$0xff] %vm165_vm0, %v2451_v19  ;;  %2924 = vst.msk [vmem:[%s9822_s6 + $0x168] sm:$0xff] %vm165_vm0, %v2466_v21  ;;  %v2481_v53 = vadd.f32 %v9134_v29, %v8908_v40  ;;  %v2496_v41 = vadd.f32 %v9134_v29, %v8936_v36  ;;  %v10289_v19 = vld [vmem:[#allocation49_spill] sm:$0xff] }
 0x26a   :  { %2923 = vst.msk [vmem:[%s9822_s6 + $0x160] sm:$0xff] %vm165_vm0, %v2461_v52  ;;  %v2491_v39 = vadd.f32 %v9134_v29, %v8955_v62  ;;  %4511 = vmatmul.mubr.msk.f32.gmra.mxu1 %vm1785_vm2, %v5536_v12  ;;  %4087 = vmatprep.subr.msk.mxu0 %vm1785_vm2, %v5528_v55  ;;  %2926 = vst.msk [vmem:[%s9822_s6 + $0x178] sm:$0xff] %vm165_vm0, %v2476_v18  ;;  %v2506_v44 = vadd.f32 %v9134_v29, %v8988_v11  ;;  %v9287_v62 = vld [vmem:[%s9821_s5] sm:$0xff]  ;;  %v10288_v12 = vld [vmem:[#allocation29_spill] sm:$0xff] }
 0x26b   :  { %2925 = vst.msk [vmem:[%s9822_s6 + $0x170] sm:$0xff] %vm165_vm0, %v2471_v34  ;;  %2928 = vst.msk [vmem:[%s9822_s6 + $0x188] sm:$0xff] %vm165_vm0, %v2486_v27  ;;  %v2501_v40 = vadd.f32 %v9134_v29, %v9004_v22  ;;  %v2516_v36 = vadd.f32 %v9134_v29, %v9030_v35  ;;  %4015 = vmatprep.mubr.msk.f32.mxu1 %vm1785_vm2, %v9287_v62  ;;  %v2511_v11 = vadd.f32 %v9134_v29, %v9047_v15  ;;  %v10290_v52 = vld [vmem:[#allocation27_spill] sm:$0xff] }
 0x26c   :  { %2927 = vst.msk [vmem:[%s9822_s6 + $0x180] sm:$0xff] %vm165_vm0, %v2481_v53  ;;  %2930 = vst.msk [vmem:[%s9822_s6 + $0x198] sm:$0xff] %vm165_vm0, %v2496_v41  ;;  %v2526_v22 = vadd.f32 %v9134_v29, %v9084_v61  ;;  %v2521_v35 = vadd.f32 %v9134_v29, %v9095_v49  ;;  %v2536_v14 = vadd.f32 %v9134_v29, %v9123_v4  ;;  %v4416_v4 = vpop.f32.mrf.mxu1  ;;  %4088 = vmatpush3.xpose.msk.msra.mxu0 %vm1785_vm2, %v8838_v6  ;;  %v10291_v18 = vld [vmem:[#allocation19_spill] sm:$0xff]  ;;  %v10294_v53 = vld [vmem:[#allocation18_spill] sm:$0xff] }
 0x26d   :  { %2929 = vst.msk [vmem:[%s9822_s6 + $0x190] sm:$0xff] %vm165_vm0, %v2491_v39  ;;  %2932 = vst.msk [vmem:[%s9822_s6 + $0x1a8] sm:$0xff] %vm165_vm0, %v2506_v44  ;;  %v2531_v15 = vadd.f32 %v9134_v29, %v9138_v58  ;;  %v2546_v61 = vadd.f32 %v9134_v29, %v4413_v16  ;;  %v2541_v49 = vadd.f32 %v9134_v29, %v2540_v47  ;;  %4089 = vmatprep.subr.msk.mxu0 %vm1785_vm2, %v9162_v28  ;;  %v10273_v58 = vld [vmem:[#allocation16_spill] sm:$0xff]  ;;  %v10279_v28 = vld [vmem:[#allocation35_spill] sm:$0xff] }
 0x26e   :  { %2931 = vst.msk [vmem:[%s9822_s6 + $0x1a0] sm:$0xff] %vm165_vm0, %v2501_v40  ;;  %2934 = vst.msk [vmem:[%s9822_s6 + $0x1b8] sm:$0xff] %vm165_vm0, %v2516_v36  ;;  %v2556_v6 = vadd.f32 %v9134_v29, %v4416_v4  ;;  %4016 = vmatmul.mubr.msk.f32.vlgmr.msra.gmra.mxu1 %vm1785_vm2, %v9287_v62  ;;  %v2550_v10 = vpop.f32.mrf.mxu1  ;;  %v10285_v16 = vld [vmem:[#allocation31_spill] sm:$0xff]  ;;  %v10295_v39 = vld [vmem:[#allocation46_spill] sm:$0xff] }
 0x26f   :  { %2933 = vst.msk [vmem:[%s9822_s6 + $0x1b0] sm:$0xff] %vm165_vm0, %v2511_v11  ;;  %2936 = vst.msk [vmem:[%s9822_s6 + $0x1c8] sm:$0xff] %vm165_vm0, %v2526_v22  ;;  %4052 = vmatpush3.xpose.msk.msra.mxu1 %vm1785_vm2, %v10271_v51  ;;  %v2551_v32 = vadd.f32 %v9134_v29, %v2550_v10  ;;  %4083 = vmatprep.mubr.msk.f32.mxu1 %vm1785_vm2, %v9287_v62  ;;  %v10292_v27 = vld [vmem:[#allocation47_spill] sm:$0xff]  ;;  %v10296_v40 = vld [vmem:[#allocation30_spill] sm:$0xff] }
 0x270   :  { %2935 = vst.msk [vmem:[%s9822_s6 + $0x1c0] sm:$0xff] %vm165_vm0, %v2521_v35  ;;  %2938 = vst.msk [vmem:[%s9822_s6 + $0x1d8] sm:$0xff] %vm165_vm0, %v2536_v14  ;;  %4053 = vmatprep.subr.msk.mxu1 %vm1785_vm2, %v10272_v60  ;;  %4090 = vmatpush3.xpose.msk.msra.mxu0 %vm1785_vm2, %v8828_v57  ;;  %v4419_v13 = vpop.f32.mrf.mxu1  ;;  %v10297_v36 = vld [vmem:[#allocation6_spill] sm:$0xff]  ;;  %v10298_v11 = vld [vmem:[#allocation20_spill] sm:$0xff] }
 0x271   :  { %2937 = vst.msk [vmem:[%s9822_s6 + $0x1d0] sm:$0xff] %vm165_vm0, %v2531_v15  ;;  %2940 = vst.msk [vmem:[%s9822_s6 + $0x1e8] sm:$0xff] %vm165_vm0, %v2546_v61  ;;  %4091 = vmatprep.subr.msk.mxu0 %vm1785_vm2, %v9148_v42  ;;  %v2566_v1 = vadd.f32 %v9134_v29, %v4419_v13  ;;  %v10276_v42 = vld [vmem:[#allocation37_spill] sm:$0xff]  ;;  %v10300_v14 = vld [vmem:[#allocation56_spill] sm:$0xff] }
 0x272   :  { %2939 = vst.msk [vmem:[%s9822_s6 + $0x1e0] sm:$0xff] %vm165_vm0, %v2541_v49  ;;  %2942 = vst.msk [vmem:[%s9822_s6 + $0x1f8] sm:$0xff] %vm165_vm0, %v2556_v6  ;;  %v2560_v46 = vpop.f32.mrf.mxu1  ;;  %v10299_v22 = vld [vmem:[#allocation45_spill] sm:$0xff]  ;;  %v10301_v61 = vld [vmem:[#allocation12_spill] sm:$0xff] }
 0x273   :  { %2941 = vst.msk [vmem:[%s9822_s6 + $0x1f0] sm:$0xff] %vm165_vm0, %v2551_v32  ;;  %4054 = vmatpush3.xpose.msk.msra.mxu1 %vm1785_vm2, %v10273_v58  ;;  %2944 = vst.msk [vmem:[%s9822_s6 + $0x208] sm:$0xff] %vm165_vm0, %v2566_v1  ;;  %v2561_v57 = vadd.f32 %v9134_v29, %v2560_v46  ;;  %v10302_v4 = vld [vmem:[#allocation11_spill] sm:$0xff]  ;;  %v10303_v10 = vld [vmem:[#allocation44_spill] sm:$0xff] }
 0x274   :  { %4055 = vmatprep.subr.msk.mxu1 %vm1785_vm2, %v10274_v59  ;;  %4092 = vmatpush3.xpose.msk.msra.mxu0 %vm1785_vm2, %v8804_v25  ;;  %v10304_v51 = vld [vmem:[#allocation57_spill] sm:$0xff]  ;;  %v10307_v58 = vld [vmem:[#allocation43_spill] sm:$0xff]  ;;  %v10308_v59 = vld [vmem:[#allocation54_spill] sm:$0xff] }
 0x275   :  { %4093 = vmatprep.subr.msk.mxu0 %vm1785_vm2, %v9107_v24  ;;  %2943 = vst.msk [vmem:[%s9822_s6 + $0x200] sm:$0xff] %vm165_vm0, %v2561_v57  ;;  %v4422_v8 = vpop.f32.mrf.mxu1  ;;  %v10305_v32 = vld [vmem:[#allocation5_spill] sm:$0xff] }
 0x276   :  { %v2576_v56 = vadd.f32 %v9134_v29, %v4422_v8  ;;  %v10306_v13 = vld [vmem:[#allocation21_spill] sm:$0xff] }
 0x277   :  { %4056 = vmatpush3.xpose.msk.msra.mxu1 %vm1785_vm2, %v10275_v33  ;;  %v2570_v25 = vpop.f32.mrf.mxu1  ;;  %v10309_v33 = vld [vmem:[#allocation13_spill] sm:$0xff] }
 0x278   :  { %4057 = vmatprep.subr.msk.mxu1 %vm1785_vm2, %v10276_v42  ;;  %4094 = vmatpush3.xpose.msk.msra.mxu0 %vm1785_vm2, %v10277_v38  ;;  %2946 = vst.msk [vmem:[%s9822_s6 + $0x218] sm:$0xff] %vm165_vm0, %v2576_v56  ;;  %v2571_v24 = vadd.f32 %v9134_v29, %v2570_v25  ;;  %v10310_v8 = vld [vmem:[#allocation17_spill] sm:$0xff]  ;;  %v10311_v42 = vld [vmem:[#allocation42_spill] sm:$0xff]  ;;  %v10312_v38 = vld [vmem:[#allocation55_spill] sm:$0xff] }
 0x279   :  { %4095 = vmatprep.subr.msk.mxu0 %vm1785_vm2, %v9115_v26 }
 0x27a   :  { %2945 = vst.msk [vmem:[%s9822_s6 + $0x210] sm:$0xff] %vm165_vm0, %v2571_v24  ;;  %v10313_v24 = vld [vmem:[#allocation7_spill] sm:$0xff] }
 0x27b   :  { %4058 = vmatpush3.xpose.msk.msra.mxu1 %vm1785_vm2, %v10278_v23  ;;  %v4425_v26 = vpop.f32.mrf.mxu1 }
 0x27c   :  { %4059 = vmatprep.subr.msk.mxu1 %vm1785_vm2, %v10279_v28  ;;  %4096 = vmatpush3.xpose.msk.msra.mxu0 %vm1785_vm2, %v10280_v48  ;;  %v2586_v20 = vadd.f32 %v9134_v29, %v4425_v26  ;;  %v10314_v28 = vld [vmem:[#allocation22_spill] sm:$0xff]  ;;  %v10315_v26 = vld [vmem:[#allocation41_spill] sm:$0xff] }
 0x27d   :  { %4097 = vmatprep.subr.msk.mxu0 %vm1785_vm2, %v9069_v5  ;;  %v2580_v9 = vpop.f32.mrf.mxu1  ;;  %v10284_v5 = vld [vmem:[#allocation15_spill] sm:$0xff] }
 0x27e   :  { %2948 = vst.msk [vmem:[%s9822_s6 + $0x228] sm:$0xff] %vm165_vm0, %v2586_v20  ;;  %v2581_v54 = vadd.f32 %v9134_v29, %v2580_v9  ;;  %v10316_v20 = vld [vmem:[#allocation14_spill] sm:$0xff] }
 0x27f   :  { %4060 = vmatpush3.xpose.msk.msra.mxu1 %vm1785_vm2, %v10281_v63  ;;  %v10317_v9 = vld [vmem:[#allocation10_spill] sm:$0xff] }
 0x280   :  { %4061 = vmatprep.subr.msk.mxu1 %vm1785_vm2, %v10282_v3  ;;  %4098 = vmatpush3.xpose.msk.msra.mxu0 %vm1785_vm2, %v10283_v2  ;;  %2947 = vst.msk [vmem:[%s9822_s6 + $0x220] sm:$0xff] %vm165_vm0, %v2581_v54 }
 0x281   :  { %4099 = vmatprep.subr.msk.mxu0 %vm1785_vm2, %v9055_v7  ;;  %v4428_v31 = vpop.f32.mrf.mxu1 }
 0x282   :  { %v2596_v50 = vadd.f32 %v9134_v29, %v4428_v31 }
 0x283   :  { %4062 = vmatpush3.xpose.msk.msra.mxu1 %vm1785_vm2, %v10284_v5  ;;  %v2590_v45 = vpop.f32.mrf.mxu1  ;;  %v10318_v5 = vld [vmem:[#allocation8_spill] sm:$0xff] }
 0x284   :  { %4063 = vmatprep.subr.msk.mxu1 %vm1785_vm2, %v10285_v16  ;;  %4100 = vmatpush3.xpose.msk.msra.mxu0 %vm1785_vm2, %v10286_v30  ;;  %2950 = vst.msk [vmem:[%s9822_s6 + $0x238] sm:$0xff] %vm165_vm0, %v2596_v50  ;;  %v2591_v7 = vadd.f32 %v9134_v29, %v2590_v45 }
 0x285   :  { %4101 = vmatprep.subr.msk.mxu0 %vm1785_vm2, %v9036_v43 }
 0x286   :  { %2949 = vst.msk [vmem:[%s9822_s6 + $0x230] sm:$0xff] %vm165_vm0, %v2591_v7 }
 0x287   :  { %4064 = vmatpush3.xpose.msk.msra.mxu1 %vm1785_vm2, %v10287_v0  ;;  %v4431_v43 = vpop.f32.mrf.mxu1 }
 0x288   :  { %4065 = vmatprep.subr.msk.mxu1 %vm1785_vm2, %v10288_v12  ;;  %4102 = vmatpush3.xpose.msk.msra.mxu0 %vm1785_vm2, %v10289_v19  ;;  %v2606_v21 = vadd.f32 %v9134_v29, %v4431_v43 }
 0x289   :  { %4103 = vmatprep.subr.msk.mxu0 %vm1785_vm2, %v9020_v17  ;;  %v2600_v55 = vpop.f32.mrf.mxu1  ;;  %v10293_v17 = vld [vmem:[#allocation26_spill] sm:$0xff] }
 0x28a   :  { %2952 = vst.msk [vmem:[%s9822_s6 + $0x248] sm:$0xff] %vm165_vm0, %v2606_v21  ;;  %v2601_v34 = vadd.f32 %v9134_v29, %v2600_v55 }
 0x28b   :  { %4066 = vmatpush3.xpose.msk.msra.mxu1 %vm1785_vm2, %v10290_v52 }
 0x28c   :  { %4067 = vmatprep.subr.msk.mxu1 %vm1785_vm2, %v10291_v18  ;;  %4104 = vmatpush3.xpose.msk.msra.mxu0 %vm1785_vm2, %v10292_v27  ;;  %2951 = vst.msk [vmem:[%s9822_s6 + $0x240] sm:$0xff] %vm165_vm0, %v2601_v34 }
 0x28d   :  { %4105 = vmatprep.subr.msk.mxu0 %vm1785_vm2, %v8994_v37  ;;  %v4434_v47 = vpop.f32.mrf.mxu1 }
 0x28e   :  { %v2616_v41 = vadd.f32 %v9134_v29, %v4434_v47 }
 0x28f   :  { %4068 = vmatpush3.xpose.msk.msra.mxu1 %vm1785_vm2, %v10293_v17  ;;  %v2610_v44 = vpop.f32.mrf.mxu1 }
 0x290   :  { %4069 = vmatprep.subr.msk.mxu1 %vm1785_vm2, %v10294_v53  ;;  %4106 = vmatpush3.xpose.msk.msra.mxu0 %vm1785_vm2, %v10295_v39  ;;  %2954 = vst.msk [vmem:[%s9822_s6 + $0x258] sm:$0xff] %vm165_vm0, %v2616_v41  ;;  %v2611_v37 = vadd.f32 %v9134_v29, %v2610_v44 }
 0x291   :  { %4107 = vmatprep.subr.msk.mxu0 %vm1785_vm2, %v10296_v40 }
 0x292   :  { %2953 = vst.msk [vmem:[%s9822_s6 + $0x250] sm:$0xff] %vm165_vm0, %v2611_v37 }
 0x293   :  { %4070 = vmatpush3.xpose.msk.msra.mxu1 %vm1785_vm2, %v10297_v36  ;;  %v4437_v35 = vpop.f32.mrf.mxu1 }
 0x294   :  { %4071 = vmatprep.subr.msk.mxu1 %vm1785_vm2, %v10298_v11  ;;  %4108 = vmatpush3.xpose.msk.msra.mxu0 %vm1785_vm2, %v10299_v22  ;;  %v2626_v15 = vadd.f32 %v9134_v29, %v4437_v35 }
 0x295   :  { %4109 = vmatprep.subr.msk.mxu0 %vm1785_vm2, %v10300_v14  ;;  %v2620_v49 = vpop.f32.mrf.mxu1 }
 0x296   :  { %2956 = vst.msk [vmem:[%s9822_s6 + $0x268] sm:$0xff] %vm165_vm0, %v2626_v15  ;;  %v2621_v6 = vadd.f32 %v9134_v29, %v2620_v49 }
 0x297   :  { %4072 = vmatpush3.xpose.msk.msra.mxu1 %vm1785_vm2, %v10301_v61 }
 0x298   :  { %4073 = vmatprep.subr.msk.mxu1 %vm1785_vm2, %v10302_v4  ;;  %4110 = vmatpush3.xpose.msk.msra.mxu0 %vm1785_vm2, %v10303_v10  ;;  %2955 = vst.msk [vmem:[%s9822_s6 + $0x260] sm:$0xff] %vm165_vm0, %v2621_v6 }
 0x299   :  { %4111 = vmatprep.subr.msk.mxu0 %vm1785_vm2, %v10304_v51  ;;  %v4440_v60 = vpop.f32.mrf.mxu1 }
 0x29a   :  { %v2636_v1 = vadd.f32 %v9134_v29, %v4440_v60 }
 0x29b   :  { %4074 = vmatpush3.xpose.msk.msra.mxu1 %vm1785_vm2, %v10305_v32  ;;  %v2630_v46 = vpop.f32.mrf.mxu1 }
 0x29c   :  { %4075 = vmatprep.subr.msk.mxu1 %vm1785_vm2, %v10306_v13  ;;  %4112 = vmatpush3.xpose.msk.msra.mxu0 %vm1785_vm2, %v10307_v58  ;;  %2958 = vst.msk [vmem:[%s9822_s6 + $0x278] sm:$0xff] %vm165_vm0, %v2636_v1  ;;  %v2631_v57 = vadd.f32 %v9134_v29, %v2630_v46 }
 0x29d   :  { %4113 = vmatprep.subr.msk.mxu0 %vm1785_vm2, %v10308_v59 }
 0x29e   :  { %2957 = vst.msk [vmem:[%s9822_s6 + $0x270] sm:$0xff] %vm165_vm0, %v2631_v57 }
 0x29f   :  { %4076 = vmatpush3.xpose.msk.msra.mxu1 %vm1785_vm2, %v10309_v33  ;;  %v4443_v56 = vpop.f32.mrf.mxu1 }
 0x2a0   :  { %4077 = vmatprep.subr.msk.mxu1 %vm1785_vm2, %v10310_v8  ;;  %4114 = vmatpush3.xpose.msk.msra.mxu0 %vm1785_vm2, %v10311_v42  ;;  %v2646_v25 = vadd.f32 %v9134_v29, %v4443_v56 }
 0x2a1   :  { %4115 = vmatprep.subr.msk.mxu0 %vm1785_vm2, %v10312_v38  ;;  %v2640_v23 = vpop.f32.mrf.mxu1 }
 0x2a2   :  { %2960 = vst.msk [vmem:[%s9822_s6 + $0x288] sm:$0xff] %vm165_vm0, %v2646_v25  ;;  %v2641_v48 = vadd.f32 %v9134_v29, %v2640_v23 }
 0x2a3   :  { %4078 = vmatpush3.xpose.msk.msra.mxu1 %vm1785_vm2, %v10313_v24 }
 0x2a4   :  { %4079 = vmatprep.subr.msk.mxu1 %vm1785_vm2, %v10314_v28  ;;  %4116 = vmatpush3.xpose.msk.msra.mxu0 %vm1785_vm2, %v10315_v26  ;;  %2959 = vst.msk [vmem:[%s9822_s6 + $0x280] sm:$0xff] %vm165_vm0, %v2641_v48 }
 0x2a5   :  { %v4446_v63 = vpop.f32.mrf.mxu1 }
 0x2a6   :  { %v2656_v3 = vadd.f32 %v9134_v29, %v4446_v63  ;;  %v3148_v50 = vpop.f32.mrf.mxu0 }
 0x2a7   :  { %4080 = vmatpush3.xpose.msk.msra.mxu1 %vm1785_vm2, %v10316_v20  ;;  %4118 = vmatmul.mubr.msk.f32.vlgmr.msra.gmra.mxu0 %vm1785_vm2, %v9287_v62  ;;  %v2650_v54 = vpop.f32.mrf.mxu1  ;;  %v3149_v0 = vadd.f32 500.5, %v3148_v50 }
 0x2a8   :  { %4081 = vmatprep.subr.msk.mxu1 %vm1785_vm2, %v10317_v9  ;;  %2962 = vst.msk [vmem:[%s9822_s6 + $0x298] sm:$0xff] %vm165_vm0, %v2656_v3  ;;  %v2651_v2 = vadd.f32 %v9134_v29, %v2650_v54  ;;  %v3150_v7 = vpop.f32.mrf.mxu0 }
 0x2a9   :  { %v3151_v12 = vadd.f32 500.5, %v3150_v7  ;;  %v5541_v19 = vtrunc.f32 %v3149_v0 }
 0x2aa   :  { %2961 = vst.msk [vmem:[%s9822_s6 + $0x290] sm:$0xff] %vm165_vm0, %v2651_v2 }
 0x2ab   :  { %4082 = vmatpush3.xpose.msk.msra.mxu1 %vm1785_vm2, %v10318_v5  ;;  %v4449_v31 = vpop.f32.mrf.mxu1  ;;  %v5543_v43 = vtrunc.f32 %v3151_v12  ;;  %v5542_v55 = vcvt.f32.s32 %v5541_v19 }
 0x2ac   :  { %v2666_v16 = vadd.f32 %v9134_v29, %v4449_v31 }
 0x2ad   :  { %v2660_v30 = vpop.f32.mrf.mxu1  ;;  %v5544_v18 = vcvt.f32.s32 %v5543_v43  ;;  %3305 = vst [vmem:[#allocation2 + $0x2] sm:$0x1] %v5542_v55 }
 0x2ae   :  { %4084 = vmatmul.mubr.msk.f32.vlgmr.msra.gmra.mxu1 %vm1785_vm2, %v9287_v62  ;;  %2964 = vst.msk [vmem:[%s9822_s6 + $0x2a8] sm:$0xff] %vm165_vm0, %v2666_v16  ;;  %v2661_v45 = vadd.f32 %v9134_v29, %v2660_v30 }
 0x2af   :  { %3306 = vst [vmem:[#allocation2 + $0x3] sm:$0x1] %v5544_v18 }
 0x2b0   :  { %2963 = vst.msk [vmem:[%s9822_s6 + $0x2a0] sm:$0xff] %vm165_vm0, %v2661_v45 }
 0x2b1   :  { %v4452_v62 = vpop.f32.mrf.mxu1 }
 0x2b2   :  { %v2676_v21 = vadd.f32 %v9134_v29, %v4452_v62 }
 0x2b3   :  { %v2670_v52 = vpop.f32.mrf.mxu1 }
 0x2b4   :  { %2966 = vst.msk [vmem:[%s9822_s6 + $0x2b8] sm:$0xff] %vm165_vm0, %v2676_v21  ;;  %v2671_v34 = vadd.f32 %v9134_v29, %v2670_v52 }
 0x2b6   :  { %2965 = vst.msk [vmem:[%s9822_s6 + $0x2b0] sm:$0xff] %vm165_vm0, %v2671_v34 }
 0x2b7   :  { %v4455_v27 = vpop.f32.mrf.mxu1 }
 0x2b8   :  { %v2686_v17 = vadd.f32 %v9134_v29, %v4455_v27 }
 0x2b9   :  { %v2680_v47 = vpop.f32.mrf.mxu1 }
 0x2ba   :  { %2968 = vst.msk [vmem:[%s9822_s6 + $0x2c8] sm:$0xff] %vm165_vm0, %v2686_v17  ;;  %v2681_v53 = vadd.f32 %v9134_v29, %v2680_v47 }
 0x2bc   :  { %2967 = vst.msk [vmem:[%s9822_s6 + $0x2c0] sm:$0xff] %vm165_vm0, %v2681_v53 }
 0x2bd   :  { %v4458_v41 = vpop.f32.mrf.mxu1 }
 0x2be   :  { %v2696_v39 = vadd.f32 %v9134_v29, %v4458_v41 }
 0x2bf   :  { %v2690_v44 = vpop.f32.mrf.mxu1 }
 0x2c0   :  { %2970 = vst.msk [vmem:[%s9822_s6 + $0x2d8] sm:$0xff] %vm165_vm0, %v2696_v39  ;;  %v2691_v40 = vadd.f32 %v9134_v29, %v2690_v44 }
 0x2c2   :  { %2969 = vst.msk [vmem:[%s9822_s6 + $0x2d0] sm:$0xff] %vm165_vm0, %v2691_v40 }
 0x2c3   :  { %v4461_v37 = vpop.f32.mrf.mxu1 }
 0x2c4   :  { %v2706_v36 = vadd.f32 %v9134_v29, %v4461_v37 }
 0x2c5   :  { %v2700_v11 = vpop.f32.mrf.mxu1 }
 0x2c6   :  { %2972 = vst.msk [vmem:[%s9822_s6 + $0x2e8] sm:$0xff] %vm165_vm0, %v2706_v36  ;;  %v2701_v22 = vadd.f32 %v9134_v29, %v2700_v11 }
 0x2c8   :  { %2971 = vst.msk [vmem:[%s9822_s6 + $0x2e0] sm:$0xff] %vm165_vm0, %v2701_v22 }
 0x2c9   :  { %v4464_v35 = vpop.f32.mrf.mxu1 }
 0x2ca   :  { %v2716_v14 = vadd.f32 %v9134_v29, %v4464_v35 }
 0x2cb   :  { %v2710_v15 = vpop.f32.mrf.mxu1 }
 0x2cc   :  { %2974 = vst.msk [vmem:[%s9822_s6 + $0x2f8] sm:$0xff] %vm165_vm0, %v2716_v14  ;;  %v2711_v61 = vadd.f32 %v9134_v29, %v2710_v15 }
 0x2ce   :  { %2973 = vst.msk [vmem:[%s9822_s6 + $0x2f0] sm:$0xff] %vm165_vm0, %v2711_v61 }
 0x2cf   :  { %v4467_v49 = vpop.f32.mrf.mxu1 }
 0x2d0   :  { %v2726_v4 = vadd.f32 %v9134_v29, %v4467_v49 }
 0x2d1   :  { %v2720_v6 = vpop.f32.mrf.mxu1 }
 0x2d2   :  { %2976 = vst.msk [vmem:[%s9822_s6 + $0x308] sm:$0xff] %vm165_vm0, %v2726_v4  ;;  %v2721_v10 = vadd.f32 %v9134_v29, %v2720_v6 }
 0x2d4   :  { %2975 = vst.msk [vmem:[%s9822_s6 + $0x300] sm:$0xff] %vm165_vm0, %v2721_v10 }
 0x2d7   :  { %v4470_v51 = vpop.f32.mrf.mxu1 }
 0x2d8   :  { %v2736_v32 = vadd.f32 %v9134_v29, %v4470_v51 }
 0x2d9   :  { %v2730_v60 = vpop.f32.mrf.mxu1 }
 0x2da   :  { %2978 = vst.msk [vmem:[%s9822_s6 + $0x318] sm:$0xff] %vm165_vm0, %v2736_v32  ;;  %v2731_v13 = vadd.f32 %v9134_v29, %v2730_v60 }
 0x2dc   :  { %2977 = vst.msk [vmem:[%s9822_s6 + $0x310] sm:$0xff] %vm165_vm0, %v2731_v13 }
 0x2de   :  { %v4473_v1 = vpop.f32.mrf.mxu1 }
 0x2df   :  { %v2746_v58 = vadd.f32 %v9134_v29, %v4473_v1 }
 0x2e0   :  { %v2740_v46 = vpop.f32.mrf.mxu1 }
 0x2e1   :  { %2980 = vst.msk [vmem:[%s9822_s6 + $0x328] sm:$0xff] %vm165_vm0, %v2746_v58  ;;  %v2741_v59 = vadd.f32 %v9134_v29, %v2740_v46 }
 0x2e3   :  { %2979 = vst.msk [vmem:[%s9822_s6 + $0x320] sm:$0xff] %vm165_vm0, %v2741_v59 }
 0x2e6   :  { %v4476_v57 = vpop.f32.mrf.mxu1 }
 0x2e7   :  { %v2756_v33 = vadd.f32 %v9134_v29, %v4476_v57 }
 0x2e8   :  { %v2750_v8 = vpop.f32.mrf.mxu1 }
 0x2e9   :  { %2982 = vst.msk [vmem:[%s9822_s6 + $0x338] sm:$0xff] %vm165_vm0, %v2756_v33  ;;  %v2751_v42 = vadd.f32 %v9134_v29, %v2750_v8 }
 0x2eb   :  { %2981 = vst.msk [vmem:[%s9822_s6 + $0x330] sm:$0xff] %vm165_vm0, %v2751_v42  ;;  %v4479_v56 = vpop.f32.mrf.mxu1 }
 0x2ec   :  { %v2766_v38 = vadd.f32 %v9134_v29, %v4479_v56 }
 0x2ed   :  { %v2760_v25 = vpop.f32.mrf.mxu1 }
 0x2ee   :  { %2984 = vst.msk [vmem:[%s9822_s6 + $0x348] sm:$0xff] %vm165_vm0, %v2766_v38  ;;  %v2761_v24 = vadd.f32 %v9134_v29, %v2760_v25 }
 0x2ef   :  { %v4482_v23 = vpop.f32.mrf.mxu1 }
 0x2f0   :  { %2983 = vst.msk [vmem:[%s9822_s6 + $0x340] sm:$0xff] %vm165_vm0, %v2761_v24  ;;  %v2776_v28 = vadd.f32 %v9134_v29, %v4482_v23 }
 0x2f1   :  { %v2770_v48 = vpop.f32.mrf.mxu1 }
 0x2f2   :  { %2986 = vst.msk [vmem:[%s9822_s6 + $0x358] sm:$0xff] %vm165_vm0, %v2776_v28  ;;  %v2771_v26 = vadd.f32 %v9134_v29, %v2770_v48 }
 0x2f4   :  { %2985 = vst.msk [vmem:[%s9822_s6 + $0x350] sm:$0xff] %vm165_vm0, %v2771_v26 }
 0x2f9   :  { %v4485_v20 = vpop.f32.mrf.mxu1 }
 0x2fa   :  { %v2786_v63 = vadd.f32 %v9134_v29, %v4485_v20 }
 0x2fb   :  { %v2780_v9 = vpop.f32.mrf.mxu1 }
 0x2fc   :  { %2988 = vst.msk [vmem:[%s9822_s6 + $0x368] sm:$0xff] %vm165_vm0, %v2786_v63  ;;  %v2781_v3 = vadd.f32 %v9134_v29, %v2780_v9 }
 0x2fe   :  { %2987 = vst.msk [vmem:[%s9822_s6 + $0x360] sm:$0xff] %vm165_vm0, %v2781_v3 }
 0x2ff   :  { %v4488_v54 = vpop.f32.mrf.mxu1 }
 0x300   :  { %v2796_v2 = vadd.f32 %v9134_v29, %v4488_v54 }
 0x301   :  { %v2790_v5 = vpop.f32.mrf.mxu1 }
 0x302   :  { %2990 = vst.msk [vmem:[%s9822_s6 + $0x378] sm:$0xff] %vm165_vm0, %v2796_v2  ;;  %v2791_v31 = vadd.f32 %v9134_v29, %v2790_v5 }
 0x303   :  { %v4491_v16 = vpop.f32.mrf.mxu1 }
 0x304   :  { %2989 = vst.msk [vmem:[%s9822_s6 + $0x370] sm:$0xff] %vm165_vm0, %v2791_v31  ;;  %v2806_v50 = vadd.f32 %v9134_v29, %v4491_v16 }
 0x305   :  { %v2800_v30 = vpop.f32.mrf.mxu1 }
 0x306   :  { %2992 = vst.msk [vmem:[%s9822_s6 + $0x388] sm:$0xff] %vm165_vm0, %v2806_v50  ;;  %v2801_v45 = vadd.f32 %v9134_v29, %v2800_v30 }
 0x308   :  { %2991 = vst.msk [vmem:[%s9822_s6 + $0x380] sm:$0xff] %vm165_vm0, %v2801_v45 }
 0x30a   :  { %v4494_v7 = vpop.f32.mrf.mxu1 }
 0x30b   :  { %v2816_v0 = vadd.f32 %v9134_v29, %v4494_v7 }
 0x30c   :  { %v2810_v12 = vpop.f32.mrf.mxu1 }
 0x30d   :  { %2994 = vst.msk [vmem:[%s9822_s6 + $0x398] sm:$0xff] %vm165_vm0, %v2816_v0  ;;  %v2811_v62 = vadd.f32 %v9134_v29, %v2810_v12 }
 0x30e   :  { %v4497_v19 = vpop.f32.mrf.mxu1 }
 0x30f   :  { %2993 = vst.msk [vmem:[%s9822_s6 + $0x390] sm:$0xff] %vm165_vm0, %v2811_v62  ;;  %v2826_v43 = vadd.f32 %v9134_v29, %v4497_v19 }
 0x310   :  { %v2820_v21 = vpop.f32.mrf.mxu1 }
 0x311   :  { %2996 = vst.msk [vmem:[%s9822_s6 + $0x3a8] sm:$0xff] %vm165_vm0, %v2826_v43  ;;  %v2821_v52 = vadd.f32 %v9134_v29, %v2820_v21 }
 0x313   :  { %2995 = vst.msk [vmem:[%s9822_s6 + $0x3a0] sm:$0xff] %vm165_vm0, %v2821_v52  ;;  %v4500_v55 = vpop.f32.mrf.mxu1 }
 0x314   :  { %v2836_v18 = vadd.f32 %v9134_v29, %v4500_v55 }
 0x315   :  { %v2830_v34 = vpop.f32.mrf.mxu1 }
 0x316   :  { %2998 = vst.msk [vmem:[%s9822_s6 + $0x3b8] sm:$0xff] %vm165_vm0, %v2836_v18  ;;  %v2831_v27 = vadd.f32 %v9134_v29, %v2830_v34 }
 0x318   :  { %v4503_v17 = vpop.f32.mrf.mxu1  ;;  %2997 = vst.msk [vmem:[%s9822_s6 + $0x3b0] sm:$0xff] %vm165_vm0, %v2831_v27 }
 0x319   :  { %v2846_v47 = vadd.f32 %v9134_v29, %v4503_v17 }
 0x31a   :  { %v2840_v53 = vpop.f32.mrf.mxu1 }
 0x31b   :  { %3000 = vst.msk [vmem:[%s9822_s6 + $0x3c8] sm:$0xff] %vm165_vm0, %v2846_v47  ;;  %v2841_v41 = vadd.f32 %v9134_v29, %v2840_v53 }
 0x31d   :  { %2999 = vst.msk [vmem:[%s9822_s6 + $0x3c0] sm:$0xff] %vm165_vm0, %v2841_v41 }
 0x31f   :  { %v4506_v39 = vpop.f32.mrf.mxu1 }
 0x320   :  { %v2856_v44 = vadd.f32 %v9134_v29, %v4506_v39 }
 0x321   :  { %v2850_v40 = vpop.f32.mrf.mxu1 }
 0x322   :  { %3002 = vst.msk [vmem:[%s9822_s6 + $0x3d8] sm:$0xff] %vm165_vm0, %v2856_v44  ;;  %v2851_v37 = vadd.f32 %v9134_v29, %v2850_v40 }
 0x324   :  { %3001 = vst.msk [vmem:[%s9822_s6 + $0x3d0] sm:$0xff] %vm165_vm0, %v2851_v37  ;;  %v4509_v36 = vpop.f32.mrf.mxu1 }
 0x325   :  { %v2866_v11 = vadd.f32 %v9134_v29, %v4509_v36 }
 0x326   :  { %v2860_v22 = vpop.f32.mrf.mxu1 }
 0x327   :  { %3004 = vst.msk [vmem:[%s9822_s6 + $0x3e8] sm:$0xff] %vm165_vm0, %v2866_v11  ;;  %v2861_v35 = vadd.f32 %v9134_v29, %v2860_v22 }
 0x329   :  { %3003 = vst.msk [vmem:[%s9822_s6 + $0x3e0] sm:$0xff] %vm165_vm0, %v2861_v35 }
 0x32a   :  { %v4512_v14 = vpop.f32.mrf.mxu1 }
 0x32b   :  { %v2876_v15 = vadd.f32 %v9134_v29, %v4512_v14 }
 0x32c   :  { %v2870_v61 = vpop.f32.mrf.mxu1 }
 0x32d   :  { %3006 = vst.msk [vmem:[%s9822_s6 + $0x3f8] sm:$0xff] %vm165_vm0, %v2876_v15  ;;  %v2871_v49 = vadd.f32 %v9134_v29, %v2870_v61 }
 0x32e   :  { %v3077_v4 = vpop.f32.mrf.mxu1 }
 0x32f   :  { %3005 = vst.msk [vmem:[%s9822_s6 + $0x3f0] sm:$0xff] %vm165_vm0, %v2871_v49  ;;  %v3078_v6 = vadd.f32 500.5, %v3077_v4  ;;  %s5845_s6 = smov [#allocation2]  }
 0x330   :  { %v3079_v10 = vpop.f32.mrf.mxu1  ;;  %s3319_s27 = sshll.u32 %s5845_s6, 4  ;;  %s3320_s27 = int_to_ptr.vmem [resolvable:$true] %s3319_s27 }
 0x331   :  { %v5537_v51 = vtrunc.f32 %v3078_v6  ;;  %v3080_v32 = vadd.f32 500.5, %v3079_v10  ;;  %s5823_s28 = scalar_lea.vmem %s3320_s27, 128  ;;  %p5828_p1 = scmp.lt.s32.totalorder %s3320_s27, %s3320_s27 }
 0x332   :  { %p5824_p0 = scmp.ne.s32.totalorder %s3320_s27, %s5823_s28  ;;  %p5829_p2 = scmp.lt.s32.totalorder %s5823_s28, %s5823_s28 }
 0x333   :  { %v5538_v60 = vcvt.f32.s32 %v5537_v51  ;;  %v5539_v13 = vtrunc.f32 %v3080_v32 }
 0x334   :  { %p5830_p3 = por %p5829_p2, %p5828_p1 }
 0x335   :  { %3303 = vst [vmem:[#allocation2] sm:$0x1] %v5538_v60  ;;  %v5540_v1 = vcvt.f32.s32 %v5539_v13 }
 0x336   :  { %p5831_p4 = pnand %p5830_p3, %p5824_p0 }
 0x337   :  { %3304 = vst [vmem:[#allocation2 + $0x1] sm:$0x1] %v5540_v1 }
 0x367   :  { %v3290_v58 = vpop.f32.mrf.mxu0 }
 0x368   :  { %v3291_v46 = vadd.f32 500.5, %v3290_v58 }
 0x369   :  { %v3292_v59 = vpop.f32.mrf.mxu0 }
 0x36a   :  { %v5549_v57 = vtrunc.f32 %v3291_v46  ;;  %v3293_v29 = vadd.f32 500.5, %v3292_v59 }
 0x36c   :  { %v5550_v33 = vcvt.f32.s32 %v5549_v57  ;;  %v5551_v8 = vtrunc.f32 %v3293_v29 }
 0x36e   :  { %v3219_v42 = vpop.f32.mrf.mxu1  ;;  %3309 = vst [vmem:[#allocation2 + $0x6] sm:$0x1] %v5550_v33  ;;  %v5552_v38 = vcvt.f32.s32 %v5551_v8 }
 0x36f   :  { %v3220_v56 = vadd.f32 500.5, %v3219_v42 }
 0x370   :  { %v3221_v25 = vpop.f32.mrf.mxu1  ;;  %3310 = vst [vmem:[#allocation2 + $0x7] sm:$0x1] %v5552_v38 }
 0x371   :  { %v5545_v24 = vtrunc.f32 %v3220_v56  ;;  %v3222_v23 = vadd.f32 500.5, %v3221_v25 }
 0x373   :  { %v5546_v28 = vcvt.f32.s32 %v5545_v24  ;;  %v5547_v48 = vtrunc.f32 %v3222_v23 }
 0x375   :  { %3307 = vst [vmem:[#allocation2 + $0x4] sm:$0x1] %v5546_v28  ;;  %v5548_v26 = vcvt.f32.s32 %v5547_v48 }
 0x377   :  { %3308 = vst [vmem:[#allocation2 + $0x5] sm:$0x1] %v5548_v26 }
 0x378   :  { %5834 = shalt.err (!%p5831_p4)
}
 0x379   :  { %3322 = dma.vmem_to_hbm [thread:$0]  %s3320_s27, 128, %s9823_s7, [#allocation3]  }
 0x37a   :  { %5843 = dma.done.wait [#allocation3], 128  }
 0x37b   :  { %5844 = vsyncadd [#allocation3], 4294967168 }
 0x37c   :  { %3328 = vsyncpa [#allocation3], 1 }

</bundles_post_ra>
